<compile_context>
chip_gen: v6e
topology: v6e:2x2x1
jax: 0.10.0
libtpu: 0.0.40
codegen_flags: <defaults>
</compile_context>

<pallas_src>
import functools
import math

import jax
import jax.numpy as jnp
from jax.experimental import pallas as pl
from jax.experimental.pallas import tpu as pltpu

# ---------------- small synthetic config ----------------
VOCAB = 50
B = 2               # batch_size
T = 8               # max_edu_num
TOK = 10            # max_tok_len
HB = 32             # bert_hidden_size
L = 4               # layer_num = bert_layers - start_layer
D = 32              # word_dims
GRU_HIDDENS = 32    # bidirectional output size (config.gru_hiddens)
H = GRU_HIDDENS // 2

OUT_PAD = 128       # kernel output padded to a full 128-lane group (unmasked store)

_HI = jax.lax.Precision.HIGHEST


def _hdot(a, b):
    return jnp.dot(a, b, precision=_HI, preferred_element_type=jnp.float32)


# ---------------- fused kernel: MLP+ScalarMix -> biGRU -> global_output ----------------
def _fused_kernel(cls_ref, mask_ref, wslab_ref, pslab_ref, out_ref,
                  *, bsz, seq, d, h, ld):
    h2, h4, h6 = 2 * h, 4 * h, 6 * h

    # ---- unpack the two packed parameter slabs (one-time slices) ----
    w_bd = wslab_ref[:, 0:ld]                     # (L*HB, L*D) block-diag MLP weight
    w2 = wslab_ref[:, ld:ld + d + h6]             # (L*D, D+6H)  [mix | mix@Wih]
    whh = pslab_ref[0:h2, 0:h6]                   # (2H, 6H) block-diag, gate-major cols
    b_mlp = pslab_ref[h2:h2 + 1, 0:ld]            # (1, L*D)
    bi = pslab_ref[h2 + 1:h2 + 2, 0:h6]           # (1, 6H)  bih + bhh(r,z) folded
    bhh = pslab_ref[h2 + 2:h2 + 3, 0:h6]          # (1, 6H)  bhh(n) only (inside r*(.))
    dm = pslab_ref[h2 + 3:h2 + 4, 0:h6]           # (1, 6H)  1.0 on forward-direction lanes

    # ---- stage 1: two full-lane 128-contraction MXU passes ----
    proj = jnp.tanh(jnp.dot(cls_ref[...], w_bd, precision=_HI,
                            preferred_element_type=jnp.float32) + b_mlp)        # (N, L*D)
    fused = jnp.dot(proj, w2, precision=_HI,
                    preferred_element_type=jnp.float32)                         # (N, D+6H)
    x_embed = fused[:, 0:d]                                                     # (N, D)
    gi_all = fused[:, d:d + h6] + bi                                            # (N, 6H)
    mask = mask_ref[...]                                                        # (N, 2H)

    # hoisted per-step row slices (time-major rows n = t*bsz + b; seq/bsz static)
    gi_rows = [gi_all[t * bsz:(t + 1) * bsz, :] for t in range(seq)]
    m_rows = [mask[t * bsz:(t + 1) * bsz, :] for t in range(seq)]

    # ---- stage 2: bidirectional GRU, ONE (B,2H)@(2H,6H) matmul per step ----
    h_cat = jnp.zeros((bsz, h2), jnp.float32)     # [h_fwd | h_bwd]
    out_steps = []
    for t in range(seq):
        tb = seq - 1 - t
        # forward lanes read time t, backward lanes read time tb (lane blend).
        gi_s = gi_rows[tb] + dm * (gi_rows[t] - gi_rows[tb])                    # (B, 6H)
        m_s = m_rows[t]                                                         # (B, 2H)
        gh = jnp.dot(h_cat, whh, precision=_HI,
                     preferred_element_type=jnp.float32) + bhh                  # (B, 6H)
        rz = jax.nn.sigmoid(gi_s[:, 0:h4] + gh[:, 0:h4])                        # [r | z]
        r, z = rz[:, 0:h2], rz[:, h2:h4]
        nn = jnp.tanh(gi_s[:, h4:h6] + r * gh[:, h4:h6])
        h_new = nn + z * (h_cat - nn)             # (1-z)*n + z*h
        h_cat = h_cat + m_s * (h_new - h_cat)     # freeze state past edu_lengths
        out_steps.append(m_s * h_cat)             # zero the padded positions

    # ---- single lane-dense store: [x_embed | h_fwd | h_bwd | 0-pad] ----
    fwd = jnp.concatenate([out_steps[t][:, 0:h] for t in range(seq)], axis=0)        # (N, H)
    bwd = jnp.concatenate([out_steps[seq - 1 - t][:, h:h2] for t in range(seq)], axis=0)
    pieces = [x_embed, fwd, bwd]
    pad_w = out_ref.shape[1] - (d + h2)
    if pad_w:
        pieces.append(jnp.zeros((bsz * seq, pad_w), jnp.float32))
    out_ref[...] = jnp.concatenate(pieces, axis=1)


def _fused_global_encoder(cls_flat, mask_gru, wslab, pslab, *, bsz, seq, d, h, ld):
    n = cls_flat.shape[0]
    vspec = pl.BlockSpec(memory_space=pltpu.MemorySpace.VMEM)
    kernel = functools.partial(_fused_kernel, bsz=bsz, seq=seq, d=d, h=h, ld=ld)
    return pl.pallas_call(
        kernel,
        out_shape=jax.ShapeDtypeStruct((n, OUT_PAD), jnp.float32),
        in_specs=[vspec] * 4,
        out_specs=vspec,
    )(cls_flat, mask_gru, wslab, pslab)


# ---------------- parameters (deterministic synthetic init) ----------------
def init_params(key):
    keys = jax.random.split(key, 16)

    def u(k, shape, bound):
        return jax.random.uniform(k, shape, jnp.float32, -bound, bound)

    p = {}
    # synthetic "bert" stub parameters
    p["emb"] = u(keys[0], (VOCAB, HB), 0.1)
    p["type_emb"] = u(keys[1], (2, HB), 0.1)
    p["bert_proj"] = u(keys[2], (L, HB, HB), 1.0 / math.sqrt(HB))
    # mlp_words (NonLinear: tanh(x @ W + b)) per layer
    p["mlp_w"] = u(keys[3], (L, HB, D), 1.0 / math.sqrt(HB))
    p["mlp_b"] = u(keys[4], (L, 1, D), 1.0 / math.sqrt(HB))
    # ScalarMix parameters
    p["mix_s"] = jnp.zeros((L,), jnp.float32)
    p["mix_gamma"] = jnp.float32(1.0)
    # bidirectional GRU (gate order [r, z, n])
    gb = 1.0 / math.sqrt(H)
    p["wih_f"] = u(keys[5], (3, D, H), gb)
    p["whh_f"] = u(keys[6], (3, H, H), gb)
    p["bih_f"] = u(keys[7], (3, 1, H), gb)
    p["bhh_f"] = u(keys[8], (3, 1, H), gb)
    p["wih_b"] = u(keys[9], (3, D, H), gb)
    p["whh_b"] = u(keys[10], (3, H, H), gb)
    p["bih_b"] = u(keys[11], (3, 1, H), gb)
    p["bhh_b"] = u(keys[12], (3, 1, H), gb)
    return p


def _block_diag(blocks):
    rows = []
    for i, blk in enumerate(blocks):
        row = [blk if j == i else jnp.zeros((blk.shape[0], other.shape[1]), blk.dtype)
               for j, other in enumerate(blocks)]
        rows.append(jnp.concatenate(row, axis=1))
    return jnp.concatenate(rows, axis=0)


def _synthetic_bert_cls(params, ids, ttids, amask):
    # TODO(synk): bert_extractor internals are external to this module; replaced
    # with a deterministic synthetic extractor producing per-layer CLS features.
    amask = amask.astype(jnp.float32)
    tok_emb = params["emb"][ids] + params["type_emb"][ttids]            # (N, TOK, HB)
    denom = jnp.maximum(amask.sum(1, keepdims=True), 1.0)
    pooled = (tok_emb * amask[..., None]).sum(1) / denom                # (N, HB)
    return jnp.tanh(jnp.einsum("nh,lhk->nlk", pooled, params["bert_proj"],
                               precision=_HI))                          # (N, L, HB)


# ---------------- forward ----------------
@jax.jit
def global_encoder_forward(params, input_ids, token_type_ids, attention_mask,
                           speakers, edu_lengths):
    bsz, seq, tok = input_ids.shape
    # the packed-slab / fused-matmul layout assumes exact 128-lane alignment
    assert L * HB == 128 and L * D == 128 and D + 6 * H == 128

    # time-major flatten (row n = t*bsz + b) so the GRU recurrence reads
    # contiguous row blocks and the kernel writes global_output directly.
    ids = jnp.transpose(input_ids, (1, 0, 2)).reshape(-1, tok)
    ttids = jnp.transpose(token_type_ids, (1, 0, 2)).reshape(-1, tok)
    amask = jnp.transpose(attention_mask, (1, 0, 2)).reshape(-1, tok)

    bert_cls = _synthetic_bert_cls(params, ids, ttids, amask)            # (N, L, HB)
    cls_flat = bert_cls.reshape(bsz * seq, L * HB)                       # (N, L*HB)

    # ---- weight slab 1 (128 x 256): [block-diag MLP | mix | mix@Wih] ----
    w_bd = _block_diag([params["mlp_w"][l] for l in range(L)])           # (L*HB, L*D)
    mixw = jax.nn.softmax(params["mix_s"]) * params["mix_gamma"]
    mix_mat = jnp.kron(mixw.reshape(L, 1), jnp.eye(D, dtype=jnp.float32))  # (L*D, D)

    # GRU weights, gate-major + direction-interleaved lanes [r_f r_b z_f z_b n_f n_b]
    def gate_major(wf, wb):                      # (3,I,H),(3,I,H) -> (I, 6H)
        return jnp.concatenate([wf[0], wb[0], wf[1], wb[1], wf[2], wb[2]], axis=-1)

    wih_cat = gate_major(params["wih_f"], params["wih_b"])               # (D, 6H)
    w2 = jnp.concatenate([mix_mat, _hdot(mix_mat, wih_cat)], axis=1)     # (L*D, D+6H)
    wslab = jnp.concatenate([w_bd, w2], axis=1)                          # (128, 256)

    # ---- small-parameter slab 2 ((2H+4) x 128) ----
    zH = jnp.zeros((H, H), jnp.float32)
    whh_bd = jnp.concatenate([
        jnp.concatenate([params["whh_f"][0], zH, params["whh_f"][1], zH,
                         params["whh_f"][2], zH], axis=1),
        jnp.concatenate([zH, params["whh_b"][0], zH, params["whh_b"][1],
                         zH, params["whh_b"][2]], axis=1),
    ], axis=0)                                                           # (2H, 6H)
    b_mlp = params["mlp_b"].reshape(1, L * D)                            # (1, 128)
    bi_cat = jnp.concatenate([
        params["bih_f"][0] + params["bhh_f"][0],
        params["bih_b"][0] + params["bhh_b"][0],
        params["bih_f"][1] + params["bhh_f"][1],
        params["bih_b"][1] + params["bhh_b"][1],
        params["bih_f"][2], params["bih_b"][2]], axis=-1)                # (1, 6H)
    z1 = jnp.zeros((1, H), jnp.float32)
    o1 = jnp.ones((1, H), jnp.float32)
    bhh_cat = jnp.concatenate([z1, z1, z1, z1,
                               params["bhh_f"][2], params["bhh_b"][2]], axis=-1)
    dir_mask = jnp.concatenate([o1, z1, o1, z1, o1, z1], axis=-1)        # (1, 6H)

    def pad_lanes(x):
        return jnp.pad(x, ((0, 0), (0, 128 - x.shape[1])))

    pslab = jnp.concatenate([pad_lanes(whh_bd), pad_lanes(b_mlp),
                             pad_lanes(bi_cat), pad_lanes(bhh_cat),
                             pad_lanes(dir_mask)], axis=0)               # (2H+4, 128)

    # pack/pad length mask: lanes [0:H] forward (time t), [H:2H] backward (time T-1-t)
    mask_tb = (jnp.arange(seq)[:, None] < edu_lengths[None, :]).astype(jnp.float32)  # (T,B)
    m_fwd = jnp.repeat(mask_tb.reshape(-1, 1), H, axis=1)
    m_bwd = jnp.repeat(mask_tb[::-1].reshape(-1, 1), H, axis=1)
    mask_gru = jnp.concatenate([m_fwd, m_bwd], axis=1)                   # (T*B, 2H)

    out_tm = _fused_global_encoder(cls_flat, mask_gru, wslab, pslab,
                                   bsz=bsz, seq=seq, d=D, h=H, ld=L * D)  # (T*B, 128)
    out_tm = out_tm[:, :D + 2 * H]
    # back to batch-first (batch, max_edu_num, word_dims + gru_hiddens)
    return jnp.transpose(out_tm.reshape(seq, bsz, D + 2 * H), (1, 0, 2))


# ---------------- pure-JAX reference (mirrors the PyTorch module) ----------------
def reference_forward(params, input_ids, token_type_ids, attention_mask, edu_lengths):
    bsz, seq, tok = input_ids.shape
    ids = input_ids.reshape(-1, tok)
    ttids = token_type_ids.reshape(-1, tok)
    amask = attention_mask.reshape(-1, tok)
    bert_cls = _synthetic_bert_cls(params, ids, ttids, amask)            # (N, L, HB)
    mixw = jax.nn.softmax(params["mix_s"]) * params["mix_gamma"]
    x = jnp.zeros((bsz * seq, D), jnp.float32)
    for l in range(L):
        x = x + mixw[l] * jnp.tanh(_hdot(bert_cls[:, l], params["mlp_w"][l])
                                   + params["mlp_b"][l])
    x_embed = x.reshape(bsz, seq, D)

    def cell(xt, hp, wih, whh, bih, bhh):
        r = jax.nn.sigmoid(_hdot(xt, wih[0]) + bih[0] + _hdot(hp, whh[0]) + bhh[0])
        z = jax.nn.sigmoid(_hdot(xt, wih[1]) + bih[1] + _hdot(hp, whh[1]) + bhh[1])
        n = jnp.tanh(_hdot(xt, wih[2]) + bih[2] + r * (_hdot(hp, whh[2]) + bhh[2]))
        return (1.0 - z) * n + z * hp

    mask = (jnp.arange(seq)[None, :] < edu_lengths[:, None]).astype(jnp.float32)  # (B, T)
    hf = jnp.zeros((bsz, H), jnp.float32)
    hb = jnp.zeros((bsz, H), jnp.float32)
    outs_f = [None] * seq
    outs_b = [None] * seq
    for t in range(seq):
        mt = mask[:, t:t + 1]
        hf = hf + mt * (cell(x_embed[:, t], hf, params["wih_f"], params["whh_f"],
                             params["bih_f"], params["bhh_f"]) - hf)
        outs_f[t] = mt * hf
        tb = seq - 1 - t
        mb = mask[:, tb:tb + 1]
        hb = hb + mb * (cell(x_embed[:, tb], hb, params["wih_b"], params["whh_b"],
                             params["bih_b"], params["bhh_b"]) - hb)
        outs_b[tb] = mb * hb
    hidden = jnp.concatenate([jnp.stack(outs_f, 1), jnp.stack(outs_b, 1)], axis=-1)
    return jnp.concatenate([x_embed, hidden], axis=-1)


if __name__ == "__main__":
    key = jax.random.PRNGKey(0)
    pkey, ikey = jax.random.split(key, 2)
    params = init_params(pkey)

    input_ids = jax.random.randint(ikey, (B, T, TOK), 0, VOCAB, dtype=jnp.int32)
    token_type_ids = jnp.zeros((B, T, TOK), jnp.int32)
    attention_mask = jnp.ones((B, T, TOK), jnp.int32)
    speakers = jnp.zeros((B, T), jnp.int32)          # unused by forward
    edu_lengths = jnp.array([T, T - 3], jnp.int32)

    out = global_encoder_forward(params, input_ids, token_type_ids,
                                 attention_mask, speakers, edu_lengths)
    out = jax.block_until_ready(out)
    assert out.shape == (B, T, D + GRU_HIDDENS)
    assert bool(jnp.all(jnp.isfinite(out)))

    ref = reference_forward(params, input_ids, token_type_ids, attention_mask,
                            edu_lengths)
    assert bool(jnp.allclose(out, ref, atol=1e-4, rtol=1e-4))
    print("KERNEL_OK")
</pallas_src>

<mosaic_0001>
module attributes {stable_mosaic.version = 11 : i64} {
  func.func @_fused_kernel(%arg0: memref<16x128xf32, #tpu.memory_space<vmem>>, %arg1: memref<16x32xf32, #tpu.memory_space<vmem>>, %arg2: memref<128x256xf32, #tpu.memory_space<vmem>>, %arg3: memref<36x128xf32, #tpu.memory_space<vmem>>, %arg4: memref<16x128xf32, #tpu.memory_space<vmem>>) attributes {dimension_semantics = [], scalar_prefetch = 0 : i64, scratch_operands = 0 : i64, tpu.core_type = #tpu.core_type<tc>} {
    %c0 = arith.constant 0 : index
    %c0_0 = arith.constant 0 : index
    %0 = vector.load %arg2[%c0, %c0_0] : memref<128x256xf32, #tpu.memory_space<vmem>>, vector<128x128xf32>
    %c0_1 = arith.constant 0 : index
    %c128 = arith.constant 128 : index
    %1 = vector.load %arg2[%c0_1, %c128] : memref<128x256xf32, #tpu.memory_space<vmem>>, vector<128x128xf32>
    %c0_2 = arith.constant 0 : index
    %c0_3 = arith.constant 0 : index
    %2 = vector.load %arg3[%c0_2, %c0_3] : memref<36x128xf32, #tpu.memory_space<vmem>>, vector<32x96xf32>
    %c32 = arith.constant 32 : index
    %c0_4 = arith.constant 0 : index
    %3 = vector.load %arg3[%c32, %c0_4] : memref<36x128xf32, #tpu.memory_space<vmem>>, vector<1x128xf32>
    %c33 = arith.constant 33 : index
    %c0_5 = arith.constant 0 : index
    %4 = vector.load %arg3[%c33, %c0_5] : memref<36x128xf32, #tpu.memory_space<vmem>>, vector<1x96xf32>
    %c34 = arith.constant 34 : index
    %c0_6 = arith.constant 0 : index
    %5 = vector.load %arg3[%c34, %c0_6] : memref<36x128xf32, #tpu.memory_space<vmem>>, vector<1x96xf32>
    %c35 = arith.constant 35 : index
    %c0_7 = arith.constant 0 : index
    %6 = vector.load %arg3[%c35, %c0_7] : memref<36x128xf32, #tpu.memory_space<vmem>>, vector<1x96xf32>
    %c0_8 = arith.constant 0 : index
    %c0_9 = arith.constant 0 : index
    %7 = vector.load %arg0[%c0_8, %c0_9] : memref<16x128xf32, #tpu.memory_space<vmem>>, vector<16x128xf32>
    %cst = arith.constant dense<0.000000e+00> : vector<16x128xf32>
    %8 = tpu.matmul %7, %0, %cst {dimension_numbers = #tpu.dot_dimension_numbers<[1], [0], [0], [1], [0, 0, 1, 1], [], []>, precision = #tpu.contract_precision<fp32>} : vector<16x128xf32>, vector<128x128xf32>, vector<16x128xf32> -> vector<16x128xf32>
    %9 = vector.broadcast %3 : vector<1x128xf32> to vector<16x128xf32>
    %10 = arith.addf %8, %9 : vector<16x128xf32>
    %11 = math.tanh %10 : vector<16x128xf32>
    %cst_10 = arith.constant dense<0.000000e+00> : vector<16x128xf32>
    %12 = tpu.matmul %11, %1, %cst_10 {dimension_numbers = #tpu.dot_dimension_numbers<[1], [0], [0], [1], [0, 0, 1, 1], [], []>, precision = #tpu.contract_precision<fp32>} : vector<16x128xf32>, vector<128x128xf32>, vector<16x128xf32> -> vector<16x128xf32>
    %13 = vector.extract_strided_slice %12 {offsets = [0, 0], sizes = [16, 32], strides = [1, 1]} : vector<16x128xf32> to vector<16x32xf32>
    %14 = vector.extract_strided_slice %12 {offsets = [0, 32], sizes = [16, 96], strides = [1, 1]} : vector<16x128xf32> to vector<16x96xf32>
    %15 = vector.broadcast %4 : vector<1x96xf32> to vector<16x96xf32>
    %16 = arith.addf %14, %15 : vector<16x96xf32>
    %c0_11 = arith.constant 0 : index
    %c0_12 = arith.constant 0 : index
    %17 = vector.load %arg1[%c0_11, %c0_12] : memref<16x32xf32, #tpu.memory_space<vmem>>, vector<16x32xf32>
    %18 = vector.extract_strided_slice %16 {offsets = [0, 0], sizes = [2, 96], strides = [1, 1]} : vector<16x96xf32> to vector<2x96xf32>
    %19 = vector.extract_strided_slice %16 {offsets = [2, 0], sizes = [2, 96], strides = [1, 1]} : vector<16x96xf32> to vector<2x96xf32>
    %20 = vector.extract_strided_slice %16 {offsets = [4, 0], sizes = [2, 96], strides = [1, 1]} : vector<16x96xf32> to vector<2x96xf32>
    %21 = vector.extract_strided_slice %16 {offsets = [6, 0], sizes = [2, 96], strides = [1, 1]} : vector<16x96xf32> to vector<2x96xf32>
    %22 = vector.extract_strided_slice %16 {offsets = [8, 0], sizes = [2, 96], strides = [1, 1]} : vector<16x96xf32> to vector<2x96xf32>
    %23 = vector.extract_strided_slice %16 {offsets = [10, 0], sizes = [2, 96], strides = [1, 1]} : vector<16x96xf32> to vector<2x96xf32>
    %24 = vector.extract_strided_slice %16 {offsets = [12, 0], sizes = [2, 96], strides = [1, 1]} : vector<16x96xf32> to vector<2x96xf32>
    %25 = vector.extract_strided_slice %16 {offsets = [14, 0], sizes = [2, 96], strides = [1, 1]} : vector<16x96xf32> to vector<2x96xf32>
    %26 = vector.extract_strided_slice %17 {offsets = [0, 0], sizes = [2, 32], strides = [1, 1]} : vector<16x32xf32> to vector<2x32xf32>
    %27 = vector.extract_strided_slice %17 {offsets = [2, 0], sizes = [2, 32], strides = [1, 1]} : vector<16x32xf32> to vector<2x32xf32>
    %28 = vector.extract_strided_slice %17 {offsets = [4, 0], sizes = [2, 32], strides = [1, 1]} : vector<16x32xf32> to vector<2x32xf32>
    %29 = vector.extract_strided_slice %17 {offsets = [6, 0], sizes = [2, 32], strides = [1, 1]} : vector<16x32xf32> to vector<2x32xf32>
    %30 = vector.extract_strided_slice %17 {offsets = [8, 0], sizes = [2, 32], strides = [1, 1]} : vector<16x32xf32> to vector<2x32xf32>
    %31 = vector.extract_strided_slice %17 {offsets = [10, 0], sizes = [2, 32], strides = [1, 1]} : vector<16x32xf32> to vector<2x32xf32>
    %32 = vector.extract_strided_slice %17 {offsets = [12, 0], sizes = [2, 32], strides = [1, 1]} : vector<16x32xf32> to vector<2x32xf32>
    %33 = vector.extract_strided_slice %17 {offsets = [14, 0], sizes = [2, 32], strides = [1, 1]} : vector<16x32xf32> to vector<2x32xf32>
    %cst_13 = arith.constant 0.000000e+00 : f32
    %34 = vector.broadcast %cst_13 : f32 to vector<2x32xf32>
    %35 = arith.subf %18, %25 : vector<2x96xf32>
    %36 = vector.broadcast %6 : vector<1x96xf32> to vector<2x96xf32>
    %37 = arith.mulf %36, %35 : vector<2x96xf32>
    %38 = arith.addf %25, %37 : vector<2x96xf32>
    %cst_14 = arith.constant dense<0.000000e+00> : vector<2x96xf32>
    %39 = tpu.matmul %34, %2, %cst_14 {dimension_numbers = #tpu.dot_dimension_numbers<[1], [0], [0], [1], [0, 0, 1, 1], [], []>, precision = #tpu.contract_precision<fp32>} : vector<2x32xf32>, vector<32x96xf32>, vector<2x96xf32> -> vector<2x96xf32>
    %40 = vector.broadcast %5 : vector<1x96xf32> to vector<2x96xf32>
    %41 = arith.addf %39, %40 : vector<2x96xf32>
    %42 = vector.extract_strided_slice %38 {offsets = [0, 0], sizes = [2, 64], strides = [1, 1]} : vector<2x96xf32> to vector<2x64xf32>
    %43 = vector.extract_strided_slice %41 {offsets = [0, 0], sizes = [2, 64], strides = [1, 1]} : vector<2x96xf32> to vector<2x64xf32>
    %44 = arith.addf %42, %43 : vector<2x64xf32>
    %45 = arith.negf %44 : vector<2x64xf32>
    %46 = math.exp %45 : vector<2x64xf32>
    %cst_15 = arith.constant 1.000000e+00 : f32
    %47 = vector.broadcast %cst_15 : f32 to vector<2x64xf32>
    %48 = arith.addf %47, %46 : vector<2x64xf32>
    %49 = arith.divf %47, %48 : vector<2x64xf32>
    %50 = vector.extract_strided_slice %49 {offsets = [0, 0], sizes = [2, 32], strides = [1, 1]} : vector<2x64xf32> to vector<2x32xf32>
    %51 = vector.extract_strided_slice %49 {offsets = [0, 32], sizes = [2, 32], strides = [1, 1]} : vector<2x64xf32> to vector<2x32xf32>
    %52 = vector.extract_strided_slice %38 {offsets = [0, 64], sizes = [2, 32], strides = [1, 1]} : vector<2x96xf32> to vector<2x32xf32>
    %53 = vector.extract_strided_slice %41 {offsets = [0, 64], sizes = [2, 32], strides = [1, 1]} : vector<2x96xf32> to vector<2x32xf32>
    %54 = arith.mulf %50, %53 : vector<2x32xf32>
    %55 = arith.addf %52, %54 : vector<2x32xf32>
    %56 = math.tanh %55 : vector<2x32xf32>
    %57 = arith.subf %34, %56 : vector<2x32xf32>
    %58 = arith.mulf %51, %57 : vector<2x32xf32>
    %59 = arith.addf %56, %58 : vector<2x32xf32>
    %60 = arith.subf %59, %34 : vector<2x32xf32>
    %61 = arith.mulf %26, %60 : vector<2x32xf32>
    %62 = arith.addf %34, %61 : vector<2x32xf32>
    %63 = arith.mulf %26, %62 : vector<2x32xf32>
    %64 = arith.subf %19, %24 : vector<2x96xf32>
    %65 = vector.broadcast %6 : vector<1x96xf32> to vector<2x96xf32>
    %66 = arith.mulf %65, %64 : vector<2x96xf32>
    %67 = arith.addf %24, %66 : vector<2x96xf32>
    %cst_16 = arith.constant dense<0.000000e+00> : vector<2x96xf32>
    %68 = tpu.matmul %62, %2, %cst_16 {dimension_numbers = #tpu.dot_dimension_numbers<[1], [0], [0], [1], [0, 0, 1, 1], [], []>, precision = #tpu.contract_precision<fp32>} : vector<2x32xf32>, vector<32x96xf32>, vector<2x96xf32> -> vector<2x96xf32>
    %69 = vector.broadcast %5 : vector<1x96xf32> to vector<2x96xf32>
    %70 = arith.addf %68, %69 : vector<2x96xf32>
    %71 = vector.extract_strided_slice %67 {offsets = [0, 0], sizes = [2, 64], strides = [1, 1]} : vector<2x96xf32> to vector<2x64xf32>
    %72 = vector.extract_strided_slice %70 {offsets = [0, 0], sizes = [2, 64], strides = [1, 1]} : vector<2x96xf32> to vector<2x64xf32>
    %73 = arith.addf %71, %72 : vector<2x64xf32>
    %74 = arith.negf %73 : vector<2x64xf32>
    %75 = math.exp %74 : vector<2x64xf32>
    %cst_17 = arith.constant 1.000000e+00 : f32
    %76 = vector.broadcast %cst_17 : f32 to vector<2x64xf32>
    %77 = arith.addf %76, %75 : vector<2x64xf32>
    %78 = arith.divf %76, %77 : vector<2x64xf32>
    %79 = vector.extract_strided_slice %78 {offsets = [0, 0], sizes = [2, 32], strides = [1, 1]} : vector<2x64xf32> to vector<2x32xf32>
    %80 = vector.extract_strided_slice %78 {offsets = [0, 32], sizes = [2, 32], strides = [1, 1]} : vector<2x64xf32> to vector<2x32xf32>
    %81 = vector.extract_strided_slice %67 {offsets = [0, 64], sizes = [2, 32], strides = [1, 1]} : vector<2x96xf32> to vector<2x32xf32>
    %82 = vector.extract_strided_slice %70 {offsets = [0, 64], sizes = [2, 32], strides = [1, 1]} : vector<2x96xf32> to vector<2x32xf32>
    %83 = arith.mulf %79, %82 : vector<2x32xf32>
    %84 = arith.addf %81, %83 : vector<2x32xf32>
    %85 = math.tanh %84 : vector<2x32xf32>
    %86 = arith.subf %62, %85 : vector<2x32xf32>
    %87 = arith.mulf %80, %86 : vector<2x32xf32>
    %88 = arith.addf %85, %87 : vector<2x32xf32>
    %89 = arith.subf %88, %62 : vector<2x32xf32>
    %90 = arith.mulf %27, %89 : vector<2x32xf32>
    %91 = arith.addf %62, %90 : vector<2x32xf32>
    %92 = arith.mulf %27, %91 : vector<2x32xf32>
    %93 = arith.subf %20, %23 : vector<2x96xf32>
    %94 = vector.broadcast %6 : vector<1x96xf32> to vector<2x96xf32>
    %95 = arith.mulf %94, %93 : vector<2x96xf32>
    %96 = arith.addf %23, %95 : vector<2x96xf32>
    %cst_18 = arith.constant dense<0.000000e+00> : vector<2x96xf32>
    %97 = tpu.matmul %91, %2, %cst_18 {dimension_numbers = #tpu.dot_dimension_numbers<[1], [0], [0], [1], [0, 0, 1, 1], [], []>, precision = #tpu.contract_precision<fp32>} : vector<2x32xf32>, vector<32x96xf32>, vector<2x96xf32> -> vector<2x96xf32>
    %98 = vector.broadcast %5 : vector<1x96xf32> to vector<2x96xf32>
    %99 = arith.addf %97, %98 : vector<2x96xf32>
    %100 = vector.extract_strided_slice %96 {offsets = [0, 0], sizes = [2, 64], strides = [1, 1]} : vector<2x96xf32> to vector<2x64xf32>
    %101 = vector.extract_strided_slice %99 {offsets = [0, 0], sizes = [2, 64], strides = [1, 1]} : vector<2x96xf32> to vector<2x64xf32>
    %102 = arith.addf %100, %101 : vector<2x64xf32>
    %103 = arith.negf %102 : vector<2x64xf32>
    %104 = math.exp %103 : vector<2x64xf32>
    %cst_19 = arith.constant 1.000000e+00 : f32
    %105 = vector.broadcast %cst_19 : f32 to vector<2x64xf32>
    %106 = arith.addf %105, %104 : vector<2x64xf32>
    %107 = arith.divf %105, %106 : vector<2x64xf32>
    %108 = vector.extract_strided_slice %107 {offsets = [0, 0], sizes = [2, 32], strides = [1, 1]} : vector<2x64xf32> to vector<2x32xf32>
    %109 = vector.extract_strided_slice %107 {offsets = [0, 32], sizes = [2, 32], strides = [1, 1]} : vector<2x64xf32> to vector<2x32xf32>
    %110 = vector.extract_strided_slice %96 {offsets = [0, 64], sizes = [2, 32], strides = [1, 1]} : vector<2x96xf32> to vector<2x32xf32>
    %111 = vector.extract_strided_slice %99 {offsets = [0, 64], sizes = [2, 32], strides = [1, 1]} : vector<2x96xf32> to vector<2x32xf32>
    %112 = arith.mulf %108, %111 : vector<2x32xf32>
    %113 = arith.addf %110, %112 : vector<2x32xf32>
    %114 = math.tanh %113 : vector<2x32xf32>
    %115 = arith.subf %91, %114 : vector<2x32xf32>
    %116 = arith.mulf %109, %115 : vector<2x32xf32>
    %117 = arith.addf %114, %116 : vector<2x32xf32>
    %118 = arith.subf %117, %91 : vector<2x32xf32>
    %119 = arith.mulf %28, %118 : vector<2x32xf32>
    %120 = arith.addf %91, %119 : vector<2x32xf32>
    %121 = arith.mulf %28, %120 : vector<2x32xf32>
    %122 = arith.subf %21, %22 : vector<2x96xf32>
    %123 = vector.broadcast %6 : vector<1x96xf32> to vector<2x96xf32>
    %124 = arith.mulf %123, %122 : vector<2x96xf32>
    %125 = arith.addf %22, %124 : vector<2x96xf32>
    %cst_20 = arith.constant dense<0.000000e+00> : vector<2x96xf32>
    %126 = tpu.matmul %120, %2, %cst_20 {dimension_numbers = #tpu.dot_dimension_numbers<[1], [0], [0], [1], [0, 0, 1, 1], [], []>, precision = #tpu.contract_precision<fp32>} : vector<2x32xf32>, vector<32x96xf32>, vector<2x96xf32> -> vector<2x96xf32>
    %127 = vector.broadcast %5 : vector<1x96xf32> to vector<2x96xf32>
    %128 = arith.addf %126, %127 : vector<2x96xf32>
    %129 = vector.extract_strided_slice %125 {offsets = [0, 0], sizes = [2, 64], strides = [1, 1]} : vector<2x96xf32> to vector<2x64xf32>
    %130 = vector.extract_strided_slice %128 {offsets = [0, 0], sizes = [2, 64], strides = [1, 1]} : vector<2x96xf32> to vector<2x64xf32>
    %131 = arith.addf %129, %130 : vector<2x64xf32>
    %132 = arith.negf %131 : vector<2x64xf32>
    %133 = math.exp %132 : vector<2x64xf32>
    %cst_21 = arith.constant 1.000000e+00 : f32
    %134 = vector.broadcast %cst_21 : f32 to vector<2x64xf32>
    %135 = arith.addf %134, %133 : vector<2x64xf32>
    %136 = arith.divf %134, %135 : vector<2x64xf32>
    %137 = vector.extract_strided_slice %136 {offsets = [0, 0], sizes = [2, 32], strides = [1, 1]} : vector<2x64xf32> to vector<2x32xf32>
    %138 = vector.extract_strided_slice %136 {offsets = [0, 32], sizes = [2, 32], strides = [1, 1]} : vector<2x64xf32> to vector<2x32xf32>
    %139 = vector.extract_strided_slice %125 {offsets = [0, 64], sizes = [2, 32], strides = [1, 1]} : vector<2x96xf32> to vector<2x32xf32>
    %140 = vector.extract_strided_slice %128 {offsets = [0, 64], sizes = [2, 32], strides = [1, 1]} : vector<2x96xf32> to vector<2x32xf32>
    %141 = arith.mulf %137, %140 : vector<2x32xf32>
    %142 = arith.addf %139, %141 : vector<2x32xf32>
    %143 = math.tanh %142 : vector<2x32xf32>
    %144 = arith.subf %120, %143 : vector<2x32xf32>
    %145 = arith.mulf %138, %144 : vector<2x32xf32>
    %146 = arith.addf %143, %145 : vector<2x32xf32>
    %147 = arith.subf %146, %120 : vector<2x32xf32>
    %148 = arith.mulf %29, %147 : vector<2x32xf32>
    %149 = arith.addf %120, %148 : vector<2x32xf32>
    %150 = arith.mulf %29, %149 : vector<2x32xf32>
    %151 = arith.subf %22, %21 : vector<2x96xf32>
    %152 = vector.broadcast %6 : vector<1x96xf32> to vector<2x96xf32>
    %153 = arith.mulf %152, %151 : vector<2x96xf32>
    %154 = arith.addf %21, %153 : vector<2x96xf32>
    %cst_22 = arith.constant dense<0.000000e+00> : vector<2x96xf32>
    %155 = tpu.matmul %149, %2, %cst_22 {dimension_numbers = #tpu.dot_dimension_numbers<[1], [0], [0], [1], [0, 0, 1, 1], [], []>, precision = #tpu.contract_precision<fp32>} : vector<2x32xf32>, vector<32x96xf32>, vector<2x96xf32> -> vector<2x96xf32>
    %156 = vector.broadcast %5 : vector<1x96xf32> to vector<2x96xf32>
    %157 = arith.addf %155, %156 : vector<2x96xf32>
    %158 = vector.extract_strided_slice %154 {offsets = [0, 0], sizes = [2, 64], strides = [1, 1]} : vector<2x96xf32> to vector<2x64xf32>
    %159 = vector.extract_strided_slice %157 {offsets = [0, 0], sizes = [2, 64], strides = [1, 1]} : vector<2x96xf32> to vector<2x64xf32>
    %160 = arith.addf %158, %159 : vector<2x64xf32>
    %161 = arith.negf %160 : vector<2x64xf32>
    %162 = math.exp %161 : vector<2x64xf32>
    %cst_23 = arith.constant 1.000000e+00 : f32
    %163 = vector.broadcast %cst_23 : f32 to vector<2x64xf32>
    %164 = arith.addf %163, %162 : vector<2x64xf32>
    %165 = arith.divf %163, %164 : vector<2x64xf32>
    %166 = vector.extract_strided_slice %165 {offsets = [0, 0], sizes = [2, 32], strides = [1, 1]} : vector<2x64xf32> to vector<2x32xf32>
    %167 = vector.extract_strided_slice %165 {offsets = [0, 32], sizes = [2, 32], strides = [1, 1]} : vector<2x64xf32> to vector<2x32xf32>
    %168 = vector.extract_strided_slice %154 {offsets = [0, 64], sizes = [2, 32], strides = [1, 1]} : vector<2x96xf32> to vector<2x32xf32>
    %169 = vector.extract_strided_slice %157 {offsets = [0, 64], sizes = [2, 32], strides = [1, 1]} : vector<2x96xf32> to vector<2x32xf32>
    %170 = arith.mulf %166, %169 : vector<2x32xf32>
    %171 = arith.addf %168, %170 : vector<2x32xf32>
    %172 = math.tanh %171 : vector<2x32xf32>
    %173 = arith.subf %149, %172 : vector<2x32xf32>
    %174 = arith.mulf %167, %173 : vector<2x32xf32>
    %175 = arith.addf %172, %174 : vector<2x32xf32>
    %176 = arith.subf %175, %149 : vector<2x32xf32>
    %177 = arith.mulf %30, %176 : vector<2x32xf32>
    %178 = arith.addf %149, %177 : vector<2x32xf32>
    %179 = arith.mulf %30, %178 : vector<2x32xf32>
    %180 = arith.subf %23, %20 : vector<2x96xf32>
    %181 = vector.broadcast %6 : vector<1x96xf32> to vector<2x96xf32>
    %182 = arith.mulf %181, %180 : vector<2x96xf32>
    %183 = arith.addf %20, %182 : vector<2x96xf32>
    %cst_24 = arith.constant dense<0.000000e+00> : vector<2x96xf32>
    %184 = tpu.matmul %178, %2, %cst_24 {dimension_numbers = #tpu.dot_dimension_numbers<[1], [0], [0], [1], [0, 0, 1, 1], [], []>, precision = #tpu.contract_precision<fp32>} : vector<2x32xf32>, vector<32x96xf32>, vector<2x96xf32> -> vector<2x96xf32>
    %185 = vector.broadcast %5 : vector<1x96xf32> to vector<2x96xf32>
    %186 = arith.addf %184, %185 : vector<2x96xf32>
    %187 = vector.extract_strided_slice %183 {offsets = [0, 0], sizes = [2, 64], strides = [1, 1]} : vector<2x96xf32> to vector<2x64xf32>
    %188 = vector.extract_strided_slice %186 {offsets = [0, 0], sizes = [2, 64], strides = [1, 1]} : vector<2x96xf32> to vector<2x64xf32>
    %189 = arith.addf %187, %188 : vector<2x64xf32>
    %190 = arith.negf %189 : vector<2x64xf32>
    %191 = math.exp %190 : vector<2x64xf32>
    %cst_25 = arith.constant 1.000000e+00 : f32
    %192 = vector.broadcast %cst_25 : f32 to vector<2x64xf32>
    %193 = arith.addf %192, %191 : vector<2x64xf32>
    %194 = arith.divf %192, %193 : vector<2x64xf32>
    %195 = vector.extract_strided_slice %194 {offsets = [0, 0], sizes = [2, 32], strides = [1, 1]} : vector<2x64xf32> to vector<2x32xf32>
    %196 = vector.extract_strided_slice %194 {offsets = [0, 32], sizes = [2, 32], strides = [1, 1]} : vector<2x64xf32> to vector<2x32xf32>
    %197 = vector.extract_strided_slice %183 {offsets = [0, 64], sizes = [2, 32], strides = [1, 1]} : vector<2x96xf32> to vector<2x32xf32>
    %198 = vector.extract_strided_slice %186 {offsets = [0, 64], sizes = [2, 32], strides = [1, 1]} : vector<2x96xf32> to vector<2x32xf32>
    %199 = arith.mulf %195, %198 : vector<2x32xf32>
    %200 = arith.addf %197, %199 : vector<2x32xf32>
    %201 = math.tanh %200 : vector<2x32xf32>
    %202 = arith.subf %178, %201 : vector<2x32xf32>
    %203 = arith.mulf %196, %202 : vector<2x32xf32>
    %204 = arith.addf %201, %203 : vector<2x32xf32>
    %205 = arith.subf %204, %178 : vector<2x32xf32>
    %206 = arith.mulf %31, %205 : vector<2x32xf32>
    %207 = arith.addf %178, %206 : vector<2x32xf32>
    %208 = arith.mulf %31, %207 : vector<2x32xf32>
    %209 = arith.subf %24, %19 : vector<2x96xf32>
    %210 = vector.broadcast %6 : vector<1x96xf32> to vector<2x96xf32>
    %211 = arith.mulf %210, %209 : vector<2x96xf32>
    %212 = arith.addf %19, %211 : vector<2x96xf32>
    %cst_26 = arith.constant dense<0.000000e+00> : vector<2x96xf32>
    %213 = tpu.matmul %207, %2, %cst_26 {dimension_numbers = #tpu.dot_dimension_numbers<[1], [0], [0], [1], [0, 0, 1, 1], [], []>, precision = #tpu.contract_precision<fp32>} : vector<2x32xf32>, vector<32x96xf32>, vector<2x96xf32> -> vector<2x96xf32>
    %214 = vector.broadcast %5 : vector<1x96xf32> to vector<2x96xf32>
    %215 = arith.addf %213, %214 : vector<2x96xf32>
    %216 = vector.extract_strided_slice %212 {offsets = [0, 0], sizes = [2, 64], strides = [1, 1]} : vector<2x96xf32> to vector<2x64xf32>
    %217 = vector.extract_strided_slice %215 {offsets = [0, 0], sizes = [2, 64], strides = [1, 1]} : vector<2x96xf32> to vector<2x64xf32>
    %218 = arith.addf %216, %217 : vector<2x64xf32>
    %219 = arith.negf %218 : vector<2x64xf32>
    %220 = math.exp %219 : vector<2x64xf32>
    %cst_27 = arith.constant 1.000000e+00 : f32
    %221 = vector.broadcast %cst_27 : f32 to vector<2x64xf32>
    %222 = arith.addf %221, %220 : vector<2x64xf32>
    %223 = arith.divf %221, %222 : vector<2x64xf32>
    %224 = vector.extract_strided_slice %223 {offsets = [0, 0], sizes = [2, 32], strides = [1, 1]} : vector<2x64xf32> to vector<2x32xf32>
    %225 = vector.extract_strided_slice %223 {offsets = [0, 32], sizes = [2, 32], strides = [1, 1]} : vector<2x64xf32> to vector<2x32xf32>
    %226 = vector.extract_strided_slice %212 {offsets = [0, 64], sizes = [2, 32], strides = [1, 1]} : vector<2x96xf32> to vector<2x32xf32>
    %227 = vector.extract_strided_slice %215 {offsets = [0, 64], sizes = [2, 32], strides = [1, 1]} : vector<2x96xf32> to vector<2x32xf32>
    %228 = arith.mulf %224, %227 : vector<2x32xf32>
    %229 = arith.addf %226, %228 : vector<2x32xf32>
    %230 = math.tanh %229 : vector<2x32xf32>
    %231 = arith.subf %207, %230 : vector<2x32xf32>
    %232 = arith.mulf %225, %231 : vector<2x32xf32>
    %233 = arith.addf %230, %232 : vector<2x32xf32>
    %234 = arith.subf %233, %207 : vector<2x32xf32>
    %235 = arith.mulf %32, %234 : vector<2x32xf32>
    %236 = arith.addf %207, %235 : vector<2x32xf32>
    %237 = arith.mulf %32, %236 : vector<2x32xf32>
    %238 = arith.subf %25, %18 : vector<2x96xf32>
    %239 = vector.broadcast %6 : vector<1x96xf32> to vector<2x96xf32>
    %240 = arith.mulf %239, %238 : vector<2x96xf32>
    %241 = arith.addf %18, %240 : vector<2x96xf32>
    %cst_28 = arith.constant dense<0.000000e+00> : vector<2x96xf32>
    %242 = tpu.matmul %236, %2, %cst_28 {dimension_numbers = #tpu.dot_dimension_numbers<[1], [0], [0], [1], [0, 0, 1, 1], [], []>, precision = #tpu.contract_precision<fp32>} : vector<2x32xf32>, vector<32x96xf32>, vector<2x96xf32> -> vector<2x96xf32>
    %243 = vector.broadcast %5 : vector<1x96xf32> to vector<2x96xf32>
    %244 = arith.addf %242, %243 : vector<2x96xf32>
    %245 = vector.extract_strided_slice %241 {offsets = [0, 0], sizes = [2, 64], strides = [1, 1]} : vector<2x96xf32> to vector<2x64xf32>
    %246 = vector.extract_strided_slice %244 {offsets = [0, 0], sizes = [2, 64], strides = [1, 1]} : vector<2x96xf32> to vector<2x64xf32>
    %247 = arith.addf %245, %246 : vector<2x64xf32>
    %248 = arith.negf %247 : vector<2x64xf32>
    %249 = math.exp %248 : vector<2x64xf32>
    %cst_29 = arith.constant 1.000000e+00 : f32
    %250 = vector.broadcast %cst_29 : f32 to vector<2x64xf32>
    %251 = arith.addf %250, %249 : vector<2x64xf32>
    %252 = arith.divf %250, %251 : vector<2x64xf32>
    %253 = vector.extract_strided_slice %252 {offsets = [0, 0], sizes = [2, 32], strides = [1, 1]} : vector<2x64xf32> to vector<2x32xf32>
    %254 = vector.extract_strided_slice %252 {offsets = [0, 32], sizes = [2, 32], strides = [1, 1]} : vector<2x64xf32> to vector<2x32xf32>
    %255 = vector.extract_strided_slice %241 {offsets = [0, 64], sizes = [2, 32], strides = [1, 1]} : vector<2x96xf32> to vector<2x32xf32>
    %256 = vector.extract_strided_slice %244 {offsets = [0, 64], sizes = [2, 32], strides = [1, 1]} : vector<2x96xf32> to vector<2x32xf32>
    %257 = arith.mulf %253, %256 : vector<2x32xf32>
    %258 = arith.addf %255, %257 : vector<2x32xf32>
    %259 = math.tanh %258 : vector<2x32xf32>
    %260 = arith.subf %236, %259 : vector<2x32xf32>
    %261 = arith.mulf %254, %260 : vector<2x32xf32>
    %262 = arith.addf %259, %261 : vector<2x32xf32>
    %263 = arith.subf %262, %236 : vector<2x32xf32>
    %264 = arith.mulf %33, %263 : vector<2x32xf32>
    %265 = arith.addf %236, %264 : vector<2x32xf32>
    %266 = arith.mulf %33, %265 : vector<2x32xf32>
    %267 = vector.extract_strided_slice %63 {offsets = [0, 0], sizes = [2, 16], strides = [1, 1]} : vector<2x32xf32> to vector<2x16xf32>
    %268 = vector.extract_strided_slice %92 {offsets = [0, 0], sizes = [2, 16], strides = [1, 1]} : vector<2x32xf32> to vector<2x16xf32>
    %269 = vector.extract_strided_slice %121 {offsets = [0, 0], sizes = [2, 16], strides = [1, 1]} : vector<2x32xf32> to vector<2x16xf32>
    %270 = vector.extract_strided_slice %150 {offsets = [0, 0], sizes = [2, 16], strides = [1, 1]} : vector<2x32xf32> to vector<2x16xf32>
    %271 = vector.extract_strided_slice %179 {offsets = [0, 0], sizes = [2, 16], strides = [1, 1]} : vector<2x32xf32> to vector<2x16xf32>
    %272 = vector.extract_strided_slice %208 {offsets = [0, 0], sizes = [2, 16], strides = [1, 1]} : vector<2x32xf32> to vector<2x16xf32>
    %273 = vector.extract_strided_slice %237 {offsets = [0, 0], sizes = [2, 16], strides = [1, 1]} : vector<2x32xf32> to vector<2x16xf32>
    %274 = vector.extract_strided_slice %266 {offsets = [0, 0], sizes = [2, 16], strides = [1, 1]} : vector<2x32xf32> to vector<2x16xf32>
    %275 = tpu.concatenate %267, %268, %269, %270, %271, %272, %273, %274 in 0 : vector<2x16xf32>, vector<2x16xf32>, vector<2x16xf32>, vector<2x16xf32>, vector<2x16xf32>, vector<2x16xf32>, vector<2x16xf32>, vector<2x16xf32> -> vector<16x16xf32>
    %276 = vector.extract_strided_slice %266 {offsets = [0, 16], sizes = [2, 16], strides = [1, 1]} : vector<2x32xf32> to vector<2x16xf32>
    %277 = vector.extract_strided_slice %237 {offsets = [0, 16], sizes = [2, 16], strides = [1, 1]} : vector<2x32xf32> to vector<2x16xf32>
    %278 = vector.extract_strided_slice %208 {offsets = [0, 16], sizes = [2, 16], strides = [1, 1]} : vector<2x32xf32> to vector<2x16xf32>
    %279 = vector.extract_strided_slice %179 {offsets = [0, 16], sizes = [2, 16], strides = [1, 1]} : vector<2x32xf32> to vector<2x16xf32>
    %280 = vector.extract_strided_slice %150 {offsets = [0, 16], sizes = [2, 16], strides = [1, 1]} : vector<2x32xf32> to vector<2x16xf32>
    %281 = vector.extract_strided_slice %121 {offsets = [0, 16], sizes = [2, 16], strides = [1, 1]} : vector<2x32xf32> to vector<2x16xf32>
    %282 = vector.extract_strided_slice %92 {offsets = [0, 16], sizes = [2, 16], strides = [1, 1]} : vector<2x32xf32> to vector<2x16xf32>
    %283 = vector.extract_strided_slice %63 {offsets = [0, 16], sizes = [2, 16], strides = [1, 1]} : vector<2x32xf32> to vector<2x16xf32>
    %284 = tpu.concatenate %276, %277, %278, %279, %280, %281, %282, %283 in 0 : vector<2x16xf32>, vector<2x16xf32>, vector<2x16xf32>, vector<2x16xf32>, vector<2x16xf32>, vector<2x16xf32>, vector<2x16xf32>, vector<2x16xf32> -> vector<16x16xf32>
    %cst_30 = arith.constant 0.000000e+00 : f32
    %285 = vector.broadcast %cst_30 : f32 to vector<16x64xf32>
    %286 = tpu.concatenate %13, %275, %284, %285 in 1 : vector<16x32xf32>, vector<16x16xf32>, vector<16x16xf32>, vector<16x64xf32> -> vector<16x128xf32>
    %c0_31 = arith.constant 0 : index
    %c0_32 = arith.constant 0 : index
    %287 = vector.load %arg4[%c0_31, %c0_32] : memref<16x128xf32, #tpu.memory_space<vmem>>, vector<16x128xf32>
    tpu.vector_store %arg4[%c0_31, %c0_32], %286 {strides = array<i32>} : memref<16x128xf32, #tpu.memory_space<vmem>>, vector<16x128xf32>,
    return
  }
}

</mosaic_0001>

<bundles_post_ra>
// kernel: global_encoder_forward.1
= control target key start
LH: loop header
LB: loop body
LE: loop exit
PB: predicated region body
PF: predicated region fallthrough
CT: control target
= control target key end

     0   :  { %s7430_s30 = smov 32   ;;  %vm7432_vm0 = vmmov 0   ;;  %s7433_s17 = smov 96   ;;  %vm1468_vm1 = vcmask 261120   ;;  %vm5885_vm2 = vcmask 1041408   ;;  %vm5887_vm3 = vcmask 1043456   ;;  %s9096_s2 = inlined_call_operand.vmem [shape: f32[128,256], index: 2, kind: input, shape index: {}]   ;;  %s9097_s0 = inlined_call_operand.vmem [shape: f32[16,128], index: 0, kind: input, shape index: {}]   ;;  %s9098_s3 = inlined_call_operand.vmem [shape: f32[36,128], index: 3, kind: input, shape index: {}]   ;;  %s9099_s1 = inlined_call_operand.vmem [shape: f32[16,32], index: 1, kind: input, shape index: {}]   ;;  %s9100_s4 = inlined_call_operand.vmem [shape: f32[16,128], index: 4, kind: output, shape index: {}]  }
   0x1   :  { %v32_v0 = vld [vmem:[%s9096_s2 + $0xf0] sm:$0xff]  ;;  %v31_v1 = vld [vmem:[%s9096_s2 + $0xe0] sm:$0xff]  ;;  %v58_v54 = vld [vmem:[%s9097_s0 + $0x8] sm:$0xff]  ;;  %s7434_s20 = smov 64   ;;  %vm5889_vm4 = vcmask 1045504   ;;  %vm5942_vm5 = vcmask 392192  }
   0x2   :  { %v30_v2 = vld [vmem:[%s9096_s2 + $0xd0] sm:$0xff]  ;;  %v7469_v3 = vand.u32 4294901760, %v32_v0  ;;  %v7471_v4 = vand.u32 4294901760, %v31_v1  ;;  %v29_v6 = vld [vmem:[%s9096_s2 + $0xc0] sm:$0xff]  ;;  %v7624_v62 = vand.u32 4294901760, %v58_v54  ;;  %vm5945_vm6 = vcmask 523264  }
   0x3   :  { %v7473_v5 = vand.u32 4294901760, %v30_v2  ;;  %v28_v7 = vld [vmem:[%s9096_s2 + $0xb0] sm:$0xff]  ;;  %v27_v8 = vld [vmem:[%s9096_s2 + $0xa0] sm:$0xff]  ;;  %v7484_v9 = vand.u32 4294901760, %v29_v6 }
   0x4   :  { %v7486_v10 = vand.u32 4294901760, %v28_v7  ;;  %v7488_v11 = vand.u32 4294901760, %v27_v8  ;;  %v26_v12 = vld [vmem:[%s9096_s2 + $0x90] sm:$0xff]  ;;  %v25_v13 = vld [vmem:[%s9096_s2 + $0x80] sm:$0xff]  ;;  %6422 = vmatprep.subr.mxu0 %v7469_v3  ;;  %v7498_v14 = vsub.f32 %v32_v0, %v7469_v3  ;;  %v7501_v15 = vsub.f32 %v31_v1, %v7471_v4 }
   0x5   :  { %v7503_v16 = vand.u32 4294901760, %v26_v12  ;;  %v7506_v17 = vsub.f32 %v30_v2, %v7473_v5  ;;  %v24_v18 = vld [vmem:[%s9096_s2 + $0x70] sm:$0xff]  ;;  %6423 = vmatpush3.msra.mxu0 %v7469_v3  ;;  %v7513_v19 = vsub.f32 %v29_v6, %v7484_v9  ;;  %v7528_v24 = vand.u32 4294901760, %v25_v13  ;;  %v23_v25 = vld [vmem:[%s9096_s2 + $0x60] sm:$0xff] }
   0x6   :  { %v7516_v20 = vsub.f32 %v28_v7, %v7486_v10  ;;  %6424 = vmatprep.subr.mxu0 %v7471_v4  ;;  %v7520_v21 = vand.u32 4294901760, %v7498_v14  ;;  %v7523_v22 = vand.u32 4294901760, %v7501_v15  ;;  %v7537_v27 = vand.u32 4294901760, %v24_v18  ;;  %v22_v35 = vld [vmem:[%s9096_s2 + $0x50] sm:$0xff]  ;;  %v21_v40 = vld [vmem:[%s9096_s2 + $0x40] sm:$0xff] }
   0x7   :  { %v7526_v23 = vand.u32 4294901760, %v7506_v17  ;;  %6425 = vmatpush3.msra.mxu0 %v7471_v4  ;;  %v7535_v26 = vand.u32 4294901760, %v7513_v19  ;;  %v7543_v29 = vsub.f32 %v27_v8, %v7488_v11  ;;  %v7553_v33 = vsub.f32 %v26_v12, %v7503_v16  ;;  %v20_v48 = vld [vmem:[%s9096_s2 + $0x30] sm:$0xff]  ;;  %v57_v49 = vld [vmem:[%s9097_s0] sm:$0xff] }
   0x8   :  { %v7540_v28 = vand.u32 4294901760, %v7516_v20  ;;  %6426 = vmatprep.subr.mxu0 %v7473_v5  ;;  %v168_v30 = vsub.f32 %v7498_v14, %v7520_v21  ;;  %v175_v31 = vsub.f32 %v7501_v15, %v7523_v22  ;;  %v7556_v34 = vand.u32 4294901760, %v23_v25  ;;  %v19_v59 = vld [vmem:[%s9096_s2 + $0x20] sm:$0xff]  ;;  %v18_v2 = vld [vmem:[%s9096_s2 + $0x10] sm:$0xff] }
   0x9   :  { %v182_v32 = vsub.f32 %v7506_v17, %v7526_v23  ;;  %6427 = vmatpush3.msra.mxu0 %v7473_v5  ;;  %v189_v38 = vsub.f32 %v7513_v19, %v7535_v26  ;;  %v7565_v39 = vand.u32 4294901760, %v7543_v29  ;;  %v7574_v42 = vand.u32 4294901760, %v7553_v33 }
   0xa   :  { %6428 = vmatprep.subr.mxu0 %v7484_v9  ;;  %v169_v36 = vand.u32 4294901760, %v168_v30  ;;  %v176_v37 = vand.u32 4294901760, %v175_v31  ;;  %v196_v41 = vsub.f32 %v7516_v20, %v7540_v28  ;;  %v7577_v43 = vsub.f32 %v25_v13, %v7528_v24 }
   0xb   :  { %6429 = vmatpush3.msra.mxu0 %v7484_v9  ;;  %v183_v44 = vand.u32 4294901760, %v182_v32  ;;  %v7580_v45 = vand.u32 4294901760, %v22_v35  ;;  %v7583_v46 = vsub.f32 %v24_v18, %v7537_v27  ;;  %v7586_v47 = vand.u32 4294901760, %v21_v40  ;;  %v17_v18 = vld [vmem:[%s9096_s2] sm:$0xff] }
   0xc   :  { %6430 = vmatprep.subr.mxu0 %v7486_v10  ;;  %6457 = vmatprep.subr.mxu1 %v169_v36  ;;  %v190_v50 = vand.u32 4294901760, %v189_v38  ;;  %v203_v51 = vsub.f32 %v7543_v29, %v7565_v39  ;;  %v7598_v52 = vand.u32 4294901760, %v7577_v43  ;;  %v7601_v53 = vsub.f32 %v23_v25, %v7556_v34 }
   0xd   :  { %6431 = vmatpush3.msra.mxu0 %v7486_v10  ;;  %6458 = vmatpush3.msra.mxu1 %v169_v36  ;;  %v197_v55 = vand.u32 4294901760, %v196_v41  ;;  %v210_v56 = vsub.f32 %v7553_v33, %v7574_v42  ;;  %v7610_v57 = vand.u32 4294901760, %v20_v48  ;;  %v7613_v58 = vand.u32 4294901760, %v7583_v46 }
   0xe   :  { %6432 = vmatprep.subr.mxu0 %v7488_v11  ;;  %6459 = vmatprep.subr.mxu1 %v176_v37  ;;  %v7619_v60 = vsub.f32 %v22_v35, %v7580_v45  ;;  %v7621_v61 = vand.u32 4294901760, %v57_v49  ;;  %v204_v63 = vand.u32 4294901760, %v203_v51  ;;  %v217_v0 = vsub.f32 %v7577_v43, %v7598_v52 }
   0xf   :  { %6433 = vmatpush3.msra.mxu0 %v7488_v11  ;;  %6460 = vmatpush3.msra.mxu1 %v176_v37  ;;  %v7630_v1 = vand.u32 4294901760, %v7601_v53  ;;  %v7636_v6 = vsub.f32 %v21_v40, %v7586_v47  ;;  %v211_v7 = vand.u32 4294901760, %v210_v56  ;;  %v7639_v8 = vand.u32 4294901760, %v19_v59 }
  0x10   :  { %6434 = vmatprep.subr.mxu0 %v7503_v16  ;;  %6461 = vmatprep.subr.mxu1 %v183_v44  ;;  %v224_v12 = vsub.f32 %v7583_v46, %v7613_v58  ;;  %v7645_v13 = vand.u32 4294901760, %v7619_v60  ;;  %v7651_v25 = vsub.f32 %v57_v49, %v7621_v61  ;;  %v7654_v30 = vsub.f32 %v20_v48, %v7610_v57 }
  0x11   :  { %6435 = vmatpush3.msra.mxu0 %v7503_v16  ;;  %6462 = vmatpush3.msra.mxu1 %v183_v44  ;;  %v7657_v31 = vand.u32 4294901760, %v18_v2  ;;  %v7660_v32 = vsub.f32 %v58_v54, %v7624_v62  ;;  %v218_v35 = vand.u32 4294901760, %v217_v0  ;;  %v231_v36 = vsub.f32 %v7601_v53, %v7630_v1 }
  0x12   :  { %6436 = vmatprep.subr.mxu0 %v7528_v24  ;;  %6463 = vmatprep.subr.mxu1 %v190_v50  ;;  %v7666_v37 = vand.u32 4294901760, %v7636_v6  ;;  %v7669_v38 = vand.u32 4294901760, %v17_v18  ;;  %v7672_v40 = vsub.f32 %v19_v59, %v7639_v8  ;;  %v225_v41 = vand.u32 4294901760, %v224_v12 }
  0x13   :  { %6437 = vmatpush3.msra.mxu0 %v7528_v24  ;;  %6464 = vmatpush3.msra.mxu1 %v190_v50  ;;  %v238_v44 = vsub.f32 %v7619_v60, %v7645_v13  ;;  %v9102_v48 = vand.u32 4294901760, %v7651_v25  ;;  %v7679_v49 = vand.u32 4294901760, %v7654_v30  ;;  %v9101_v50 = vand.u32 4294901760, %v7660_v32 }
  0x14   :  { %6438 = vmatprep.subr.mxu0 %v7537_v27  ;;  %6465 = vmatprep.subr.mxu1 %v197_v55  ;;  %v7684_v51 = vsub.f32 %v18_v2, %v7657_v31  ;;  %v232_v54 = vand.u32 4294901760, %v231_v36  ;;  %v7691_v56 = vand.u32 4294901760, %v7672_v40  ;;  %v7694_v59 = vsub.f32 %v17_v18, %v7669_v38 }
  0x15   :  { %6439 = vmatpush3.msra.mxu0 %v7537_v27  ;;  %6466 = vmatpush3.msra.mxu1 %v197_v55  ;;  %v245_v55 = vsub.f32 %v7636_v6, %v7666_v37  ;;  %v147_v0 = vsub.f32 %v7651_v25, %v9102_v48  ;;  %v252_v2 = vsub.f32 %v7654_v30, %v7679_v49 }
  0x16   :  { %6440 = vmatprep.subr.mxu0 %v7556_v34  ;;  %6467 = vmatprep.subr.mxu1 %v204_v63  ;;  %v7707_v12 = vand.u32 4294901760, %v7684_v51  ;;  %v7714_v36 = vand.u32 4294901760, %v7694_v59 }
  0x17   :  { %6441 = vmatpush3.msra.mxu0 %v7556_v34  ;;  %6468 = vmatpush3.msra.mxu1 %v204_v63  ;;  %v239_v63 = vand.u32 4294901760, %v238_v44  ;;  %v246_v18 = vand.u32 4294901760, %v245_v55  ;;  %v253_v44 = vand.u32 4294901760, %v252_v2  ;;  %v38_v2 = vld [vmem:[%s9096_s2 + $0x58] sm:$0xff] }
  0x18   :  { %6442 = vmatprep.subr.mxu0 %v7580_v45  ;;  %6469 = vmatprep.subr.mxu1 %v211_v7  ;;  %v266_v55 = vsub.f32 %v7684_v51, %v7707_v12  ;;  %v273_v48 = vsub.f32 %v7694_v59, %v7714_v36 }
  0x19   :  { %6443 = vmatpush3.msra.mxu0 %v7580_v45  ;;  %6470 = vmatpush3.msra.mxu1 %v211_v7  ;;  %v157_v7 = vsub.f32 %v7660_v32, %v9101_v50 }
  0x1a   :  { %6444 = vmatprep.subr.mxu0 %v7586_v47  ;;  %6471 = vmatprep.subr.mxu1 %v218_v35 }
  0x1b   :  { %6445 = vmatpush3.msra.mxu0 %v7586_v47  ;;  %6472 = vmatpush3.msra.mxu1 %v218_v35  ;;  %v259_v35 = vsub.f32 %v7672_v40, %v7691_v56  ;;  %v158_v50 = vand.u32 4294901760, %v157_v7 }
  0x1c   :  { %6446 = vmatprep.subr.mxu0 %v7610_v57  ;;  %6473 = vmatprep.subr.mxu1 %v225_v41 }
  0x1d   :  { %6447 = vmatpush3.msra.mxu0 %v7610_v57  ;;  %6474 = vmatpush3.msra.mxu1 %v225_v41  ;;  %v148_v41 = vand.u32 4294901760, %v147_v0  ;;  %v274_v0 = vand.u32 4294901760, %v273_v48  ;;  %v39_v48 = vld [vmem:[%s9096_s2 + $0x68] sm:$0xff] }
  0x1e   :  { %6448 = vmatprep.subr.mxu0 %v7639_v8  ;;  %6475 = vmatprep.subr.mxu1 %v232_v54 }
  0x1f   :  { %6449 = vmatpush3.msra.mxu0 %v7639_v8  ;;  %6476 = vmatpush3.msra.mxu1 %v232_v54  ;;  %v260_v54 = vand.u32 4294901760, %v259_v35  ;;  %v8007_v35 = vand.u32 4294901760, %v38_v2 }
  0x20   :  { %6450 = vmatprep.subr.mxu0 %v7657_v31  ;;  %6477 = vmatprep.subr.mxu1 %v239_v63 }
  0x21   :  { %6451 = vmatpush3.msra.mxu0 %v7657_v31  ;;  %6478 = vmatpush3.msra.mxu1 %v239_v63  ;;  %v267_v63 = vand.u32 4294901760, %v266_v55 }
  0x22   :  { %6452 = vmatprep.subr.mxu0 %v7669_v38  ;;  %6479 = vmatprep.subr.mxu1 %v246_v18 }
  0x23   :  { %6453 = vmatpush3.msra.mxu0 %v7669_v38  ;;  %6480 = vmatpush3.msra.mxu1 %v246_v18 }
  0x24   :  { %6454 = vmatprep.mubr.f32.mxu0 %v148_v41  ;;  %6481 = vmatprep.subr.mxu1 %v253_v44  ;;  %v37_v41 = vld [vmem:[%s9096_s2 + $0x48] sm:$0xff] }
  0x25   :  { %6492 = vmatprep.subr.mxu0 %v7498_v14  ;;  %6455 = vmatmul.mubr.f32.vlgmr.msra.gmra.mxu0 %v158_v50 }
  0x26   :  { %6482 = vmatpush3.msra.mxu1 %v253_v44  ;;  %6493 = vmatpush3.msra.mxu0 %v7498_v14  ;;  %v9119_v14 = vand.u32 4294901760, %v7651_v25 }
  0x27   :  { %6483 = vmatprep.subr.mxu1 %v260_v54  ;;  %6494 = vmatprep.subr.mxu0 %v7501_v15 }
  0x28   :  { %6484 = vmatpush3.msra.mxu1 %v260_v54  ;;  %6495 = vmatpush3.msra.mxu0 %v7501_v15  ;;  %v9120_v15 = vand.u32 4294901760, %v7660_v32 }
  0x29   :  { %6485 = vmatprep.subr.mxu1 %v267_v63  ;;  %6496 = vmatprep.subr.mxu0 %v7506_v17 }
  0x2a   :  { %6486 = vmatpush3.msra.mxu1 %v267_v63  ;;  %6497 = vmatpush3.msra.mxu0 %v7506_v17  ;;  %v8020_v63 = vsub.f32 %v38_v2, %v8007_v35 }
  0x2b   :  { %6487 = vmatprep.subr.mxu1 %v274_v0  ;;  %6498 = vmatprep.subr.mxu0 %v7513_v19 }
  0x2c   :  { %6488 = vmatpush3.msra.mxu1 %v274_v0  ;;  %6489 = vmatprep.mubr.f32.mxu1 %v7621_v61  ;;  %v8023_v0 = vand.u32 4294901760, %v37_v41 }
  0x2d   :  { %6499 = vmatpush3.msra.mxu0 %v7513_v19  ;;  %6490 = vmatmul.mubr.f32.vlgmr.msra.gmra.mxu1 %v7624_v62 }
  0x2e   :  { %6500 = vmatprep.subr.mxu0 %v7516_v20  ;;  %6527 = vmatprep.subr.mxu1 %v7469_v3 }
  0x2f   :  { %6501 = vmatpush3.msra.mxu0 %v7516_v20  ;;  %6528 = vmatpush3.msra.mxu1 %v7469_v3 }
  0x30   :  { %6502 = vmatprep.subr.mxu0 %v7543_v29  ;;  %6529 = vmatprep.subr.mxu1 %v7471_v4 }
  0x31   :  { %6503 = vmatpush3.msra.mxu0 %v7543_v29  ;;  %6530 = vmatpush3.msra.mxu1 %v7471_v4  ;;  %v44_v29 = vld [vmem:[%s9096_s2 + $0xb8] sm:$0xff] }
  0x32   :  { %6504 = vmatprep.subr.mxu0 %v7553_v33  ;;  %6531 = vmatprep.subr.mxu1 %v7473_v5 }
  0x33   :  { %6505 = vmatpush3.msra.mxu0 %v7553_v33  ;;  %6532 = vmatpush3.msra.mxu1 %v7473_v5 }
  0x34   :  { %6506 = vmatprep.subr.mxu0 %v7577_v43  ;;  %6533 = vmatprep.subr.mxu1 %v7484_v9 }
  0x35   :  { %6507 = vmatpush3.msra.mxu0 %v7577_v43  ;;  %6534 = vmatpush3.msra.mxu1 %v7484_v9 }
  0x36   :  { %6508 = vmatprep.subr.mxu0 %v7583_v46  ;;  %6535 = vmatprep.subr.mxu1 %v7486_v10 }
  0x37   :  { %6509 = vmatpush3.msra.mxu0 %v7583_v46  ;;  %6536 = vmatpush3.msra.mxu1 %v7486_v10 }
  0x38   :  { %6510 = vmatprep.subr.mxu0 %v7601_v53  ;;  %6537 = vmatprep.subr.mxu1 %v7488_v11 }
  0x39   :  { %6511 = vmatpush3.msra.mxu0 %v7601_v53  ;;  %6538 = vmatpush3.msra.mxu1 %v7488_v11 }
  0x3a   :  { %6512 = vmatprep.subr.mxu0 %v7619_v60  ;;  %6539 = vmatprep.subr.mxu1 %v7503_v16 }
  0x3b   :  { %6513 = vmatpush3.msra.mxu0 %v7619_v60  ;;  %6540 = vmatpush3.msra.mxu1 %v7503_v16 }
  0x3c   :  { %6514 = vmatprep.subr.mxu0 %v7636_v6  ;;  %6541 = vmatprep.subr.mxu1 %v7528_v24 }
  0x3d   :  { %6515 = vmatpush3.msra.mxu0 %v7636_v6  ;;  %6542 = vmatpush3.msra.mxu1 %v7528_v24 }
  0x3e   :  { %6516 = vmatprep.subr.mxu0 %v7654_v30  ;;  %6543 = vmatprep.subr.mxu1 %v7537_v27 }
  0x3f   :  { %6517 = vmatpush3.msra.mxu0 %v7654_v30  ;;  %6544 = vmatpush3.msra.mxu1 %v7537_v27  ;;  %v40_v30 = vld [vmem:[%s9096_s2 + $0x78] sm:$0xff] }
  0x40   :  { %6518 = vmatprep.subr.mxu0 %v7672_v40  ;;  %6545 = vmatprep.subr.mxu1 %v7556_v34 }
  0x41   :  { %6519 = vmatpush3.msra.mxu0 %v7672_v40  ;;  %6546 = vmatpush3.msra.mxu1 %v7556_v34 }
  0x42   :  { %6520 = vmatprep.subr.mxu0 %v7684_v51  ;;  %6547 = vmatprep.subr.mxu1 %v7580_v45 }
  0x43   :  { %6521 = vmatpush3.msra.mxu0 %v7684_v51  ;;  %6548 = vmatpush3.msra.mxu1 %v7580_v45 }
  0x44   :  { %6522 = vmatprep.subr.mxu0 %v7694_v59  ;;  %6549 = vmatprep.subr.mxu1 %v7586_v47 }
  0x45   :  { %6523 = vmatpush3.msra.mxu0 %v7694_v59  ;;  %6524 = vmatprep.mubr.f32.mxu0 %v7651_v25 }
  0x46   :  { %6550 = vmatpush3.msra.mxu1 %v7586_v47  ;;  %6525 = vmatmul.mubr.f32.vlgmr.msra.gmra.mxu0 %v7660_v32 }
  0x47   :  { %6551 = vmatprep.subr.mxu1 %v7610_v57  ;;  %6562 = vmatprep.subr.mxu0 %v7520_v21 }
  0x48   :  { %6552 = vmatpush3.msra.mxu1 %v7610_v57  ;;  %6563 = vmatpush3.msra.mxu0 %v7520_v21 }
  0x49   :  { %6553 = vmatprep.subr.mxu1 %v7639_v8  ;;  %6564 = vmatprep.subr.mxu0 %v7523_v22 }
  0x4a   :  { %6554 = vmatpush3.msra.mxu1 %v7639_v8  ;;  %6565 = vmatpush3.msra.mxu0 %v7523_v22 }
  0x4b   :  { %6555 = vmatprep.subr.mxu1 %v7657_v31  ;;  %6566 = vmatprep.subr.mxu0 %v7526_v23 }
  0x4c   :  { %6556 = vmatpush3.msra.mxu1 %v7657_v31  ;;  %6567 = vmatpush3.msra.mxu0 %v7526_v23  ;;  %v46_v23 = vld [vmem:[%s9096_s2 + $0xd8] sm:$0xff] }
  0x4d   :  { %6557 = vmatprep.subr.mxu1 %v7669_v38  ;;  %6568 = vmatprep.subr.mxu0 %v7535_v26 }
  0x4e   :  { %6558 = vmatpush3.msra.mxu1 %v7669_v38  ;;  %6559 = vmatprep.mubr.f32.mxu1 %v9119_v14  ;;  %v36_v14 = vld [vmem:[%s9096_s2 + $0x38] sm:$0xff] }
  0x4f   :  { %6569 = vmatpush3.msra.mxu0 %v7535_v26  ;;  %6560 = vmatmul.mubr.f32.vlgmr.msra.gmra.mxu1 %v9120_v15  ;;  %v45_v26 = vld [vmem:[%s9096_s2 + $0xc8] sm:$0xff] }
  0x50   :  { %6570 = vmatprep.subr.mxu0 %v7540_v28  ;;  %6597 = vmatprep.subr.mxu1 %v7469_v3 }
  0x51   :  { %6571 = vmatpush3.msra.mxu0 %v7540_v28  ;;  %6598 = vmatpush3.msra.mxu1 %v7469_v3  ;;  %v48_v3 = vld [vmem:[%s9096_s2 + $0xf8] sm:$0xff]  ;;  %v7905_v28 = vand.u32 4294901760, %v45_v26 }
  0x52   :  { %6572 = vmatprep.subr.mxu0 %v7565_v39  ;;  %6599 = vmatprep.subr.mxu1 %v7471_v4 }
  0x53   :  { %6573 = vmatpush3.msra.mxu0 %v7565_v39  ;;  %6600 = vmatpush3.msra.mxu1 %v7471_v4  ;;  %v47_v4 = vld [vmem:[%s9096_s2 + $0xe8] sm:$0xff]  ;;  %v7918_v39 = vand.u32 4294901760, %v44_v29 }
  0x54   :  { %6574 = vmatprep.subr.mxu0 %v7574_v42  ;;  %6601 = vmatprep.subr.mxu1 %v7473_v5 }
  0x55   :  { %6575 = vmatpush3.msra.mxu0 %v7574_v42  ;;  %6602 = vmatpush3.msra.mxu1 %v7473_v5  ;;  %v7870_v5 = vand.u32 4294901760, %v48_v3  ;;  %v43_v42 = vld [vmem:[%s9096_s2 + $0xa8] sm:$0xff]  ;;  %v7931_v46 = vsub.f32 %v44_v29, %v7918_v39 }
  0x56   :  { %6576 = vmatprep.subr.mxu0 %v7598_v52  ;;  %6603 = vmatprep.subr.mxu1 %v7484_v9 }
  0x57   :  { %6577 = vmatpush3.msra.mxu0 %v7598_v52  ;;  %6604 = vmatpush3.msra.mxu1 %v7484_v9  ;;  %v7872_v9 = vand.u32 4294901760, %v47_v4  ;;  %v42_v52 = vld [vmem:[%s9096_s2 + $0x98] sm:$0xff] }
  0x58   :  { %6578 = vmatprep.subr.mxu0 %v7613_v58  ;;  %6605 = vmatprep.subr.mxu1 %v7486_v10 }
  0x59   :  { %6579 = vmatpush3.msra.mxu0 %v7613_v58  ;;  %6606 = vmatpush3.msra.mxu1 %v7486_v10  ;;  %v7875_v10 = vsub.f32 %v48_v3, %v7870_v5  ;;  %v7943_v58 = vand.u32 4294901760, %v7931_v46 }
  0x5a   :  { %6580 = vmatprep.subr.mxu0 %v7630_v1  ;;  %6607 = vmatprep.subr.mxu1 %v7488_v11 }
  0x5b   :  { %6581 = vmatpush3.msra.mxu0 %v7630_v1  ;;  %6608 = vmatpush3.msra.mxu1 %v7488_v11  ;;  %v7878_v11 = vsub.f32 %v47_v4, %v7872_v9  ;;  %v882_v6 = vsub.f32 %v7931_v46, %v7943_v58  ;;  %v8032_v4 = vand.u32 4294901760, %v8020_v63 }
  0x5c   :  { %6582 = vmatprep.subr.mxu0 %v7645_v13  ;;  %6609 = vmatprep.subr.mxu1 %v7503_v16 }
  0x5d   :  { %6583 = vmatpush3.msra.mxu0 %v7645_v13  ;;  %6610 = vmatpush3.msra.mxu1 %v7503_v16  ;;  %v7883_v16 = vand.u32 4294901760, %v7875_v10  ;;  %v7886_v17 = vand.u32 4294901760, %v7878_v11  ;;  %9123 = vst [vmem:[#allocation4_spill] sm:$0xff] %v8032_v4 }
  0x5e   :  { %6584 = vmatprep.subr.mxu0 %v7666_v37  ;;  %6611 = vmatprep.subr.mxu1 %v7528_v24 }
  0x5f   :  { %6585 = vmatpush3.msra.mxu0 %v7666_v37  ;;  %6612 = vmatpush3.msra.mxu1 %v7528_v24  ;;  %v854_v19 = vsub.f32 %v7875_v10, %v7883_v16  ;;  %v861_v20 = vsub.f32 %v7878_v11, %v7886_v17  ;;  %v7897_v24 = vand.u32 4294901760, %v46_v23 }
  0x60   :  { %6586 = vmatprep.subr.mxu0 %v7679_v49  ;;  %6613 = vmatprep.subr.mxu1 %v7537_v27 }
  0x61   :  { %6587 = vmatpush3.msra.mxu0 %v7679_v49  ;;  %6614 = vmatpush3.msra.mxu1 %v7537_v27  ;;  %v855_v21 = vand.u32 4294901760, %v854_v19  ;;  %v862_v22 = vand.u32 4294901760, %v861_v20  ;;  %v7903_v27 = vsub.f32 %v46_v23, %v7897_v24  ;;  %v8034_v19 = vand.u32 4294901760, %v36_v14 }
  0x62   :  { %6588 = vmatprep.subr.mxu0 %v7691_v56  ;;  %6615 = vmatprep.subr.mxu1 %v7556_v34  ;;  %v8038_v20 = vsub.f32 %v37_v41, %v8023_v0  ;;  %v924_v23 = vsub.f32 %v8020_v63, %v8032_v4 }
  0x63   :  { %6589 = vmatpush3.msra.mxu0 %v7691_v56  ;;  %6616 = vmatpush3.msra.mxu1 %v7556_v34  ;;  %v7913_v33 = vand.u32 4294901760, %v7903_v27  ;;  %v7916_v34 = vsub.f32 %v45_v26, %v7905_v28  ;;  %v7990_v56 = vand.u32 4294901760, %v39_v48  ;;  %v8047_v26 = vsub.f32 %v36_v14, %v8034_v19 }
  0x64   :  { %6590 = vmatprep.subr.mxu0 %v7707_v12  ;;  %6617 = vmatprep.subr.mxu1 %v7580_v45 }
  0x65   :  { %6591 = vmatpush3.msra.mxu0 %v7707_v12  ;;  %6618 = vmatpush3.msra.mxu1 %v7580_v45  ;;  %v868_v43 = vsub.f32 %v7903_v27, %v7913_v33  ;;  %v7928_v45 = vand.u32 4294901760, %v7916_v34  ;;  %v8005_v18 = vsub.f32 %v39_v48, %v7990_v56 }
  0x66   :  { %6592 = vmatprep.subr.mxu0 %v7714_v36  ;;  %6619 = vmatprep.subr.mxu1 %v7586_v47 }
  0x67   :  { %6593 = vmatpush3.msra.mxu0 %v7714_v36  ;;  %6594 = vmatprep.mubr.f32.mxu0 %v7621_v61  ;;  %v869_v53 = vand.u32 4294901760, %v868_v43  ;;  %v8017_v54 = vand.u32 4294901760, %v8005_v18  ;;  %v33_v43 = vld [vmem:[%s9096_s2 + $0x8] sm:$0xff] }
  0x68   :  { %6620 = vmatpush3.msra.mxu1 %v7586_v47  ;;  %6595 = vmatmul.mubr.f32.vlgmr.msra.gmra.mxu0 %v7624_v62  ;;  %v7933_v47 = vand.u32 4294901760, %v43_v42 }
  0x69   :  { %6621 = vmatprep.subr.mxu1 %v7610_v57  ;;  %6629 = vmatprep.mubr.f32.mxu1 %v7621_v61  ;;  %v7949_v61 = vand.u32 4294901760, %v42_v52  ;;  %9122 = vst [vmem:[#allocation3_spill] sm:$0xff] %v8017_v54  ;;  %v917_v3 = vsub.f32 %v8005_v18, %v8017_v54 }
  0x6a   :  { %6622 = vmatpush3.msra.mxu1 %v7610_v57  ;;  %6632 = vmatprep.subr.mxu0 %v7870_v5  ;;  %v875_v57 = vsub.f32 %v7916_v34, %v7928_v45  ;;  %v7946_v60 = vsub.f32 %v43_v42, %v7933_v47  ;;  %v34_v42 = vld [vmem:[%s9096_s2 + $0x18] sm:$0xff] }
  0x6b   :  { %6623 = vmatprep.subr.mxu1 %v7639_v8  ;;  %6633 = vmatpush3.msra.mxu0 %v7870_v5  ;;  %v7963_v25 = vsub.f32 %v42_v52, %v7949_v61  ;;  %v8059_v52 = vand.u32 4294901760, %v8038_v20 }
  0x6c   :  { %6624 = vmatpush3.msra.mxu1 %v7639_v8  ;;  %6634 = vmatprep.subr.mxu0 %v7872_v9  ;;  %v876_v1 = vand.u32 4294901760, %v875_v57  ;;  %v7958_v8 = vand.u32 4294901760, %v7946_v60  ;;  %v8063_v57 = vand.u32 4294901760, %v33_v43 }
  0x6d   :  { %6625 = vmatprep.subr.mxu1 %v7657_v31  ;;  %6635 = vmatpush3.msra.mxu0 %v7872_v9  ;;  %v7978_v40 = vand.u32 4294901760, %v7963_v25  ;;  %9124 = vst [vmem:[#allocation5_spill] sm:$0xff] %v8059_v52 }
  0x6e   :  { %6626 = vmatpush3.msra.mxu1 %v7657_v31  ;;  %6636 = vmatprep.subr.mxu0 %v7897_v24  ;;  %v883_v31 = vand.u32 4294901760, %v882_v6  ;;  %v889_v32 = vsub.f32 %v7946_v60, %v7958_v8 }
  0x6f   :  { %6627 = vmatprep.subr.mxu1 %v7669_v38  ;;  %6637 = vmatpush3.msra.mxu0 %v7897_v24  ;;  %v896_v59 = vsub.f32 %v7963_v25, %v7978_v40 }
  0x70   :  { %6628 = vmatpush3.msra.mxu1 %v7669_v38  ;;  %6638 = vmatprep.subr.mxu0 %v7905_v28  ;;  %v7974_v38 = vand.u32 4294901760, %v40_v30  ;;  %v890_v49 = vand.u32 4294901760, %v889_v32  ;;  %v8079_v32 = vsub.f32 %v33_v43, %v8063_v57 }
  0x71   :  { %6630 = vmatmul.mubr.f32.vlgmr.msra.gmra.mxu1 %v7624_v62  ;;  %6667 = vmatprep.subr.mxu1 %v855_v21  ;;  %v41_v62 = vld [vmem:[%s9096_s2 + $0x88] sm:$0xff]  ;;  %v897_v36 = vand.u32 4294901760, %v896_v59 }
  0x72   :  { %6668 = vmatpush3.msra.mxu1 %v855_v21  ;;  %6639 = vmatpush3.msra.mxu0 %v7905_v28  ;;  %v7960_v13 = vand.u32 4294901760, %v41_v62  ;;  %v7988_v51 = vsub.f32 %v40_v30, %v7974_v38  ;;  %v35_v21 = vld [vmem:[%s9096_s2 + $0x28] sm:$0xff]  ;;  %v931_v30 = vsub.f32 %v8038_v20, %v8059_v52 }
  0x73   :  { %6669 = vmatprep.subr.mxu1 %v862_v22  ;;  %6640 = vmatprep.subr.mxu0 %v7918_v39  ;;  %v8049_v29 = vand.u32 4294901760, %v35_v21 }
  0x74   :  { %6670 = vmatpush3.msra.mxu1 %v862_v22  ;;  %6641 = vmatpush3.msra.mxu0 %v7918_v39  ;;  %v7972_v37 = vsub.f32 %v41_v62, %v7960_v13  ;;  %v8002_v12 = vand.u32 4294901760, %v7988_v51  ;;  %v918_v22 = vand.u32 4294901760, %v917_v3  ;;  %v925_v62 = vand.u32 4294901760, %v924_v23  ;;  %v5954_v23 = vld [vmem:[%s9098_s3 + $0x20] ss:$0 sm:$0xff] }
  0x75   :  { %6642 = vmatprep.subr.mxu0 %v7933_v47  ;;  %6671 = vmatprep.subr.mxu1 %v869_v53  ;;  %v8070_v6 = vsub.f32 %v35_v21, %v8049_v29  ;;  %v932_v59 = vand.u32 4294901760, %v931_v30  ;;  %v5955_v21 = vld [vmem:[%s9098_s3 + $0x21] ss:$0 sm:$0xff] }
  0x76   :  { %6643 = vmatpush3.msra.mxu0 %v7933_v47  ;;  %6672 = vmatpush3.msra.mxu1 %v869_v53  ;;  %v7985_v50 = vand.u32 4294901760, %v7972_v37  ;;  %9121 = vst [vmem:[#allocation2_spill] sm:$0xff] %v8002_v12  ;;  %v910_v55 = vsub.f32 %v7988_v51, %v8002_v12  ;;  %v8061_v53 = vand.u32 4294901760, %v34_v42 }
  0x77   :  { %6644 = vmatprep.subr.mxu0 %v7949_v61  ;;  %6673 = vmatprep.subr.mxu1 %v876_v1 }
  0x78   :  { %6645 = vmatpush3.msra.mxu0 %v7949_v61  ;;  %6674 = vmatpush3.msra.mxu1 %v876_v1  ;;  %v903_v7 = vsub.f32 %v7972_v37, %v7985_v50  ;;  %v911_v15 = vand.u32 4294901760, %v910_v55  ;;  %v8067_v1 = vand.u32 4294901760, %v8047_v26 }
  0x79   :  { %6646 = vmatprep.subr.mxu0 %v7960_v13  ;;  %6675 = vmatprep.subr.mxu1 %v883_v31 }
  0x7a   :  { %6647 = vmatpush3.msra.mxu0 %v7960_v13  ;;  %6676 = vmatpush3.msra.mxu1 %v883_v31  ;;  %v904_v44 = vand.u32 4294901760, %v903_v7  ;;  %9125 = vst [vmem:[#allocation6_spill] sm:$0xff] %v8067_v1  ;;  %v8076_v31 = vsub.f32 %v34_v42, %v8061_v53  ;;  %v938_v48 = vsub.f32 %v8047_v26, %v8067_v1  ;;  %v8092_v7 = vand.u32 4294901760, %v8079_v32 }
  0x7b   :  { %6648 = vmatprep.subr.mxu0 %v7974_v38  ;;  %6677 = vmatprep.subr.mxu1 %v890_v49 }
  0x7c   :  { %6649 = vmatpush3.msra.mxu0 %v7974_v38  ;;  %6678 = vmatpush3.msra.mxu1 %v890_v49  ;;  %v8085_v49 = vand.u32 4294901760, %v8070_v6  ;;  %v8089_v2 = vand.u32 4294901760, %v8076_v31  ;;  %9128 = vst [vmem:[#allocation9_spill] sm:$0xff] %v8092_v7  ;;  %v959_v55 = vsub.f32 %v8079_v32, %v8092_v7 }
  0x7d   :  { %6650 = vmatprep.subr.mxu0 %v7990_v56  ;;  %6679 = vmatprep.subr.mxu1 %v897_v36 }
  0x7e   :  { %6651 = vmatpush3.msra.mxu0 %v7990_v56  ;;  %6680 = vmatpush3.msra.mxu1 %v897_v36  ;;  %9126 = vst [vmem:[#allocation7_spill] sm:$0xff] %v8085_v49  ;;  %9127 = vst [vmem:[#allocation8_spill] sm:$0xff] %v8089_v2  ;;  %v939_v36 = vand.u32 4294901760, %v938_v48  ;;  %v945_v41 = vsub.f32 %v8070_v6, %v8085_v49  ;;  %v960_v3 = vand.u32 4294901760, %v959_v55 }
  0x7f   :  { %6652 = vmatprep.subr.mxu0 %v8007_v35  ;;  %6681 = vmatprep.subr.mxu1 %v904_v44 }
  0x80   :  { %6653 = vmatpush3.msra.mxu0 %v8007_v35  ;;  %6682 = vmatpush3.msra.mxu1 %v904_v44  ;;  %v952_v44 = vsub.f32 %v8076_v31, %v8089_v2  ;;  %v946_v14 = vand.u32 4294901760, %v945_v41 }
  0x81   :  { %6654 = vmatprep.subr.mxu0 %v8023_v0  ;;  %6683 = vmatprep.subr.mxu1 %v911_v15 }
  0x82   :  { %6655 = vmatpush3.msra.mxu0 %v8023_v0  ;;  %6684 = vmatpush3.msra.mxu1 %v911_v15  ;;  %v953_v15 = vand.u32 4294901760, %v952_v44 }
  0x83   :  { %6656 = vmatprep.subr.mxu0 %v8034_v19  ;;  %6685 = vmatprep.subr.mxu1 %v918_v22 }
  0x84   :  { %6657 = vmatpush3.msra.mxu0 %v8034_v19  ;;  %6686 = vmatpush3.msra.mxu1 %v918_v22 }
  0x85   :  { %6658 = vmatprep.subr.mxu0 %v8049_v29  ;;  %6687 = vmatprep.subr.mxu1 %v925_v62 }
  0x86   :  { %6659 = vmatpush3.msra.mxu0 %v8049_v29  ;;  %6688 = vmatpush3.msra.mxu1 %v925_v62 }
  0x87   :  { %6660 = vmatprep.subr.mxu0 %v8061_v53  ;;  %6689 = vmatprep.subr.mxu1 %v932_v59 }
  0x88   :  { %6661 = vmatpush3.msra.mxu0 %v8061_v53  ;;  %6690 = vmatpush3.msra.mxu1 %v932_v59 }
  0x89   :  { %6662 = vmatprep.subr.mxu0 %v8063_v57  ;;  %6691 = vmatprep.subr.mxu1 %v939_v36 }
  0x8a   :  { %6663 = vmatpush3.msra.mxu0 %v8063_v57  ;;  %6692 = vmatpush3.msra.mxu1 %v939_v36 }
  0x8b   :  { %6702 = vmatprep.subr.mxu0 %v7875_v10  ;;  %6693 = vmatprep.subr.mxu1 %v946_v14 }
  0x8c   :  { %6694 = vmatpush3.msra.mxu1 %v946_v14  ;;  %1438 = vrot.lane.b32.xlu0 %v5955_v21, %s7430_s30 }
  0x8d   :  { %6695 = vmatprep.subr.mxu1 %v953_v15 }
  0x8e   :  { %6696 = vmatpush3.msra.mxu1 %v953_v15 }
  0x8f   :  { %6697 = vmatprep.subr.mxu1 %v960_v3 }
  0x90   :  { %6698 = vmatpush3.msra.mxu1 %v960_v3 }
  0x91   :  { %6737 = vmatprep.subr.mxu1 %v7870_v5 }
  0xe5   :  { %v6456_v22 = vpop.f32.mrf.mxu0 }
  0xe6   :  { %v161_v30 = vadd.f32 %v6456_v22, %v5954_v23 }
  0xe7   :  { %v150_v42 = vpop.f32.mrf.mxu0 }
  0xe8   :  { %v151_v59 = vadd.f32 %v5954_v23, %v150_v42 }
  0xed   :  { %v6491_v43 = vpop.f32.mrf.mxu1 }
  0xee   :  { %v318_v44 = vadd.f32 %v6491_v43, %v161_v30 }
  0xef   :  { %v311_v48 = vpop.f32.mrf.mxu1 }
  0xf0   :  { %v312_v14 = vadd.f32 %v311_v48, %v151_v59 }
 0x106   :  { %v6526_v62 = vpop.f32.mrf.mxu0 }
 0x107   :  { %v429_v15 = vadd.f32 %v6526_v62, %v318_v44 }
 0x108   :  { %v421_v36 = vpop.f32.mrf.mxu0 }
 0x109   :  { %v422_v7 = vadd.f32 %v421_v36, %v312_v14 }
 0x10f   :  { %v6561_v41 = vpop.f32.mrf.mxu1 }
 0x110   :  { %v526_v21 = vadd.f32 %v6561_v41, %v429_v15 }
 0x111   :  { %v517_v3 = vpop.f32.mrf.mxu1 }
 0x112   :  { %v518_v49 = vadd.f32 %v517_v3, %v422_v7 }
 0x128   :  { %v6596_v55 = vpop.f32.mrf.mxu0 }
 0x129   :  { %v651_v1 = vadd.f32 %v6596_v55, %v526_v21 }
 0x12a   :  { %v644_v2 = vpop.f32.mrf.mxu0 }
 0x12b   :  { %v645_v4 = vadd.f32 %v644_v2, %v518_v49 }
 0x131   :  { %v6631_v52 = vpop.f32.mrf.mxu1 }
 0x132   :  { %v744_v54 = vadd.f32 %v6631_v52, %v651_v1 }
 0x133   :  { %v737_v12 = vpop.f32.mrf.mxu1 }
 0x134   :  { %7375 = vtanh.f32 %v744_v54  ;;  %v738_v22 = vadd.f32 %v737_v12, %v645_v4 }
 0x136   :  { %7377 = vtanh.f32 %v738_v22  ;;  %v1439_v22 = vpop.permute.xlu0 %1438 }
 0x141   :  { %v7376_v23 = vpop.eup %7375 }
 0x142   :  { %v8113_v42 = vand.u32 4294901760, %v7376_v23 }
 0x143   :  { %v7378_v43 = vpop.eup %7377 }
 0x144   :  { %v8115_v30 = vand.u32 4294901760, %v7378_v43  ;;  %v8118_v62 = vsub.f32 %v7376_v23, %v8113_v42 }
 0x146   :  { %6699 = vmatprep.mubr.f32.mxu1 %v8115_v30  ;;  %v831_v7 = vsub.f32 %v7378_v43, %v8115_v30  ;;  %v842_v49 = vand.u32 4294901760, %v8118_v62 }
 0x147   :  { %6700 = vmatmul.mubr.f32.vlgmr.msra.gmra.mxu1 %v8113_v42 }
 0x148   :  { %6738 = vmatpush3.msra.mxu1 %v7870_v5  ;;  %v832_v12 = vand.u32 4294901760, %v831_v7  ;;  %v843_v54 = vsub.f32 %v8118_v62, %v842_v49 }
 0x149   :  { %6739 = vmatprep.subr.mxu1 %v7872_v9 }
 0x14a   :  { %6740 = vmatpush3.msra.mxu1 %v7872_v9  ;;  %6769 = vmatprep.mubr.f32.mxu1 %v832_v12  ;;  %v833_v4 = vsub.f32 %v831_v7, %v832_v12  ;;  %v844_v1 = vand.u32 4294901760, %v843_v54  ;;  %v8422_v54 = vld [vmem:[%s9098_s3 + $0x22] ss:$0 sm:$0xff] }
 0x14b   :  { %6741 = vmatprep.subr.mxu1 %v7897_v24 }
 0x14c   :  { %6742 = vmatpush3.msra.mxu1 %v7897_v24  ;;  %v834_v52 = vand.u32 4294901760, %v833_v4 }
 0x14d   :  { %6743 = vmatprep.subr.mxu1 %v7905_v28 }
 0x14e   :  { %6744 = vmatpush3.msra.mxu1 %v7905_v28  ;;  %6664 = vmatprep.mubr.f32.mxu0 %v834_v52 }
 0x14f   :  { %6745 = vmatprep.subr.mxu1 %v7918_v39  ;;  %6665 = vmatmul.mubr.f32.vlgmr.msra.gmra.mxu0 %v844_v1 }
 0x150   :  { %6703 = vmatpush3.msra.mxu0 %v7875_v10  ;;  %6746 = vmatpush3.msra.mxu1 %v7918_v39 }
 0x151   :  { %6704 = vmatprep.subr.mxu0 %v7878_v11  ;;  %6734 = vmatprep.mubr.f32.mxu0 %v831_v7 }
 0x152   :  { %6747 = vmatprep.subr.mxu1 %v7933_v47  ;;  %6705 = vmatpush3.msra.mxu0 %v7878_v11  ;;  %v50_v11 = vld [vmem:[%s9098_s3 + $0x8] sm:$0xff] }
 0x153   :  { %6748 = vmatpush3.msra.mxu1 %v7933_v47  ;;  %6706 = vmatprep.subr.mxu0 %v7903_v27 }
 0x154   :  { %6749 = vmatprep.subr.mxu1 %v7949_v61  ;;  %6707 = vmatpush3.msra.mxu0 %v7903_v27  ;;  %v49_v27 = vld [vmem:[%s9098_s3] sm:$0xff] }
 0x155   :  { %6750 = vmatpush3.msra.mxu1 %v7949_v61  ;;  %6708 = vmatprep.subr.mxu0 %v7916_v34 }
 0x156   :  { %6751 = vmatprep.subr.mxu1 %v7960_v13  ;;  %6709 = vmatpush3.msra.mxu0 %v7916_v34 }
 0x157   :  { %6752 = vmatpush3.msra.mxu1 %v7960_v13  ;;  %6710 = vmatprep.subr.mxu0 %v7931_v46 }
 0x158   :  { %6753 = vmatprep.subr.mxu1 %v7974_v38  ;;  %6711 = vmatpush3.msra.mxu0 %v7931_v46 }
 0x159   :  { %6754 = vmatpush3.msra.mxu1 %v7974_v38  ;;  %6712 = vmatprep.subr.mxu0 %v7946_v60 }
 0x15a   :  { %6755 = vmatprep.subr.mxu1 %v7990_v56  ;;  %6713 = vmatpush3.msra.mxu0 %v7946_v60 }
 0x15b   :  { %6756 = vmatpush3.msra.mxu1 %v7990_v56  ;;  %6714 = vmatprep.subr.mxu0 %v7963_v25 }
 0x15c   :  { %6757 = vmatprep.subr.mxu1 %v8007_v35  ;;  %6715 = vmatpush3.msra.mxu0 %v7963_v25  ;;  %v9132_v25 = vld [vmem:[#allocation5_spill] sm:$0xff] }
 0x15d   :  { %6758 = vmatpush3.msra.mxu1 %v8007_v35  ;;  %6716 = vmatprep.subr.mxu0 %v7972_v37 }
 0x15e   :  { %6759 = vmatprep.subr.mxu1 %v8023_v0  ;;  %6717 = vmatpush3.msra.mxu0 %v7972_v37 }
 0x15f   :  { %6760 = vmatpush3.msra.mxu1 %v8023_v0  ;;  %6718 = vmatprep.subr.mxu0 %v7988_v51 }
 0x160   :  { %6761 = vmatprep.subr.mxu1 %v8034_v19  ;;  %6719 = vmatpush3.msra.mxu0 %v7988_v51 }
 0x161   :  { %6762 = vmatpush3.msra.mxu1 %v8034_v19  ;;  %6720 = vmatprep.subr.mxu0 %v8005_v18 }
 0x162   :  { %6763 = vmatprep.subr.mxu1 %v8049_v29  ;;  %6721 = vmatpush3.msra.mxu0 %v8005_v18  ;;  %v7431_v18 = vmov 0.0  }
 0x163   :  { %6764 = vmatpush3.msra.mxu1 %v8049_v29  ;;  %6722 = vmatprep.subr.mxu0 %v8020_v63 }
 0x164   :  { %6765 = vmatprep.subr.mxu1 %v8061_v53  ;;  %6723 = vmatpush3.msra.mxu0 %v8020_v63 }
 0x165   :  { %6766 = vmatpush3.msra.mxu1 %v8061_v53  ;;  %6724 = vmatprep.subr.mxu0 %v8038_v20 }
 0x166   :  { %6767 = vmatprep.subr.mxu1 %v8063_v57  ;;  %6725 = vmatpush3.msra.mxu0 %v8038_v20 }
 0x167   :  { %6768 = vmatpush3.msra.mxu1 %v8063_v57  ;;  %6726 = vmatprep.subr.mxu0 %v8047_v26 }
 0x168   :  { %6770 = vmatmul.mubr.f32.vlgmr.msra.gmra.mxu1 %v842_v49  ;;  %6807 = vmatprep.subr.mxu1 %v7870_v5 }
 0x169   :  { %6727 = vmatpush3.msra.mxu0 %v8047_v26  ;;  %6808 = vmatpush3.msra.mxu1 %v7870_v5  ;;  %v52_v5 = vld [vmem:[%s9098_s3 + $0x18] sm:$0xff] }
 0x16a   :  { %6839 = vmatprep.mubr.f32.mxu1 %v8115_v30  ;;  %6728 = vmatprep.subr.mxu0 %v8070_v6  ;;  %v8221_v10 = vand.u32 4294901760, %v52_v5 }
 0x16b   :  { %6809 = vmatprep.subr.mxu1 %v7872_v9  ;;  %6729 = vmatpush3.msra.mxu0 %v8070_v6 }
 0x16c   :  { %6810 = vmatpush3.msra.mxu1 %v7872_v9  ;;  %6730 = vmatprep.subr.mxu0 %v8076_v31  ;;  %v51_v9 = vld [vmem:[%s9098_s3 + $0x10] sm:$0xff] }
 0x16d   :  { %6811 = vmatprep.subr.mxu1 %v7897_v24  ;;  %6731 = vmatpush3.msra.mxu0 %v8076_v31 }
 0x16e   :  { %6812 = vmatpush3.msra.mxu1 %v7897_v24  ;;  %6732 = vmatprep.subr.mxu0 %v8079_v32  ;;  %v8239_v24 = vsub.f32 %v52_v5, %v8221_v10 }
 0x16f   :  { %6813 = vmatprep.subr.mxu1 %v7905_v28  ;;  %6733 = vmatpush3.msra.mxu0 %v8079_v32 }
 0x170   :  { %6814 = vmatpush3.msra.mxu1 %v7905_v28  ;;  %6735 = vmatmul.mubr.f32.vlgmr.msra.gmra.mxu0 %v8118_v62 }
 0x171   :  { %6772 = vmatprep.subr.mxu0 %v7883_v16  ;;  %6815 = vmatprep.subr.mxu1 %v7918_v39 }
 0x172   :  { %6773 = vmatpush3.msra.mxu0 %v7883_v16  ;;  %6804 = vmatprep.mubr.f32.mxu0 %v8115_v30  ;;  %v8230_v16 = vand.u32 4294901760, %v51_v9 }
 0x173   :  { %6816 = vmatpush3.msra.mxu1 %v7918_v39  ;;  %6774 = vmatprep.subr.mxu0 %v7886_v17  ;;  %v8263_v39 = vand.u32 4294901760, %v8239_v24 }
 0x174   :  { %6817 = vmatprep.subr.mxu1 %v7933_v47  ;;  %6775 = vmatpush3.msra.mxu0 %v7886_v17  ;;  %v8236_v17 = vand.u32 4294901760, %v50_v11  ;;  %v8249_v28 = vsub.f32 %v51_v9, %v8230_v16 }
 0x175   :  { %6818 = vmatpush3.msra.mxu1 %v7933_v47  ;;  %6776 = vmatprep.subr.mxu0 %v7913_v33  ;;  %v9130_v47 = vld [vmem:[#allocation3_spill] sm:$0xff]  ;;  %v1579_v60 = vsub.f32 %v8239_v24, %v8263_v39 }
 0x176   :  { %6819 = vmatprep.subr.mxu1 %v7949_v61  ;;  %6777 = vmatpush3.msra.mxu0 %v7913_v33  ;;  %v8255_v33 = vand.u32 4294901760, %v49_v27  ;;  %v8258_v34 = vsub.f32 %v50_v11, %v8236_v17  ;;  %v8270_v46 = vand.u32 4294901760, %v8249_v28 }
 0x177   :  { %6820 = vmatpush3.msra.mxu1 %v7949_v61  ;;  %6778 = vmatprep.subr.mxu0 %v7928_v45  ;;  %v8294_v37 = vand.u32 4294901760, %v1579_v60 }
 0x178   :  { %6821 = vmatprep.subr.mxu1 %v7960_v13  ;;  %6779 = vmatpush3.msra.mxu0 %v7928_v45  ;;  %v9129_v45 = vld [vmem:[#allocation2_spill] sm:$0xff]  ;;  %v8282_v61 = vand.u32 4294901760, %v8258_v34 }
 0x179   :  { %6822 = vmatpush3.msra.mxu1 %v7960_v13  ;;  %6780 = vmatprep.subr.mxu0 %v7943_v58  ;;  %v1586_v13 = vsub.f32 %v8249_v28, %v8270_v46 }
 0x17a   :  { %6823 = vmatprep.subr.mxu1 %v7974_v38  ;;  %6781 = vmatpush3.msra.mxu0 %v7943_v58  ;;  %v8275_v58 = vsub.f32 %v49_v27, %v8255_v33 }
 0x17b   :  { %6824 = vmatpush3.msra.mxu1 %v7974_v38  ;;  %6782 = vmatprep.subr.mxu0 %v7958_v8  ;;  %v1593_v38 = vsub.f32 %v8258_v34, %v8282_v61  ;;  %v8305_v51 = vand.u32 4294901760, %v1586_v13 }
 0x17c   :  { %6825 = vmatprep.subr.mxu1 %v7990_v56  ;;  %6783 = vmatpush3.msra.mxu0 %v7958_v8  ;;  %v9131_v8 = vld [vmem:[#allocation4_spill] sm:$0xff] }
 0x17d   :  { %6826 = vmatpush3.msra.mxu1 %v7990_v56  ;;  %6784 = vmatprep.subr.mxu0 %v7978_v40  ;;  %v9134_v56 = vld [vmem:[#allocation7_spill] sm:$0xff] }
 0x17e   :  { %6827 = vmatprep.subr.mxu1 %v8007_v35  ;;  %6785 = vmatpush3.msra.mxu0 %v7978_v40  ;;  %v8299_v40 = vand.u32 4294901760, %v8275_v58 }
 0x17f   :  { %6828 = vmatpush3.msra.mxu1 %v8007_v35  ;;  %6786 = vmatprep.subr.mxu0 %v7985_v50  ;;  %v8311_v35 = vand.u32 4294901760, %v1593_v38 }
 0x180   :  { %6829 = vmatprep.subr.mxu1 %v8023_v0  ;;  %6787 = vmatpush3.msra.mxu0 %v7985_v50  ;;  %v9133_v50 = vld [vmem:[#allocation6_spill] sm:$0xff]  ;;  %v1600_v63 = vsub.f32 %v8275_v58, %v8299_v40 }
 0x181   :  { %6830 = vmatpush3.msra.mxu1 %v8023_v0  ;;  %6788 = vmatprep.subr.mxu0 %v9129_v45  ;;  %v9135_v0 = vld [vmem:[#allocation8_spill] sm:$0xff] }
 0x182   :  { %6831 = vmatprep.subr.mxu1 %v8034_v19  ;;  %6789 = vmatpush3.msra.mxu0 %v9129_v45  ;;  %v8323_v20 = vand.u32 4294901760, %v1600_v63 }
 0x183   :  { %6832 = vmatpush3.msra.mxu1 %v8034_v19  ;;  %6790 = vmatprep.subr.mxu0 %v9130_v47  ;;  %v9136_v19 = vld [vmem:[#allocation9_spill] sm:$0xff] }
 0x184   :  { %6833 = vmatprep.subr.mxu1 %v8049_v29  ;;  %6791 = vmatpush3.msra.mxu0 %v9130_v47 }
 0x185   :  { %6834 = vmatpush3.msra.mxu1 %v8049_v29  ;;  %6792 = vmatprep.subr.mxu0 %v9131_v8 }
 0x186   :  { %6835 = vmatprep.subr.mxu1 %v8061_v53  ;;  %6793 = vmatpush3.msra.mxu0 %v9131_v8 }
 0x187   :  { %6836 = vmatpush3.msra.mxu1 %v8061_v53  ;;  %6794 = vmatprep.subr.mxu0 %v9132_v25 }
 0x188   :  { %6837 = vmatprep.subr.mxu1 %v8063_v57  ;;  %6795 = vmatpush3.msra.mxu0 %v9132_v25 }
 0x189   :  { %6838 = vmatpush3.msra.mxu1 %v8063_v57  ;;  %6796 = vmatprep.subr.mxu0 %v9133_v50 }
 0x18a   :  { %6840 = vmatmul.mubr.f32.vlgmr.msra.gmra.mxu1 %v8113_v42  ;;  %6797 = vmatpush3.msra.mxu0 %v9133_v50 }
 0x18b   :  { %6798 = vmatprep.subr.mxu0 %v9134_v56  ;;  %6853 = vmatprep.subr.mxu1 %v7431_v18 }
 0x18c   :  { %6799 = vmatpush3.msra.mxu0 %v9134_v56  ;;  %6854 = vmatpush3.msra.mxu1 %v8294_v37 }
 0x18d   :  { %6800 = vmatprep.subr.mxu0 %v9135_v0  ;;  %6855 = vmatprep.subr.mxu1 %v7431_v18 }
 0x18e   :  { %6801 = vmatpush3.msra.mxu0 %v9135_v0  ;;  %6856 = vmatpush3.msra.mxu1 %v8305_v51 }
 0x18f   :  { %6802 = vmatprep.subr.mxu0 %v9136_v19  ;;  %6857 = vmatprep.subr.mxu1 %v7431_v18 }
 0x190   :  { %6803 = vmatpush3.msra.mxu0 %v9136_v19  ;;  %6858 = vmatpush3.msra.mxu1 %v8311_v35 }
 0x191   :  { %6805 = vmatmul.mubr.f32.vlgmr.msra.gmra.mxu0 %v8113_v42  ;;  %6842 = vmatprep.subr.mxu0 %v7431_v18 }
 0x192   :  { %6843 = vmatpush3.msra.mxu0 %v8221_v10  ;;  %6850 = vmatprep.mubr.msk.f32.mxu0 %vm7432_vm0, %v7431_v18 }
 0x193   :  { %6844 = vmatprep.subr.mxu0 %v7431_v18  ;;  %6859 = vmatprep.subr.mxu1 %v7431_v18 }
 0x194   :  { %6845 = vmatpush3.msra.mxu0 %v8230_v16  ;;  %6860 = vmatpush3.msra.mxu1 %v8323_v20 }
 0x195   :  { %6846 = vmatprep.subr.mxu0 %v7431_v18  ;;  %6861 = vmatprep.mubr.msk.f32.mxu1 %vm7432_vm0, %v7431_v18 }
 0x196   :  { %6847 = vmatpush3.msra.mxu0 %v8236_v17  ;;  %6875 = vmatprep.subr.mxu1 %v7431_v18 }
 0x197   :  { %6848 = vmatprep.subr.mxu0 %v7431_v18  ;;  %6862 = vmatmul.mubr.f32.vlgmr.msra.gmra.mxu1 %v7431_v18 }
 0x198   :  { %6849 = vmatpush3.msra.mxu0 %v8255_v33  ;;  %6876 = vmatpush3.msra.mxu1 %v8221_v10 }
 0x199   :  { %6864 = vmatprep.subr.mxu0 %v7431_v18  ;;  %6851 = vmatmul.mubr.f32.vlgmr.msra.gmra.mxu0 %v7431_v18 }
 0x19a   :  { %6865 = vmatpush3.msra.mxu0 %v8239_v24  ;;  %6877 = vmatprep.subr.mxu1 %v7431_v18 }
 0x19b   :  { %6866 = vmatprep.subr.mxu0 %v7431_v18  ;;  %6878 = vmatpush3.msra.mxu1 %v8230_v16 }
 0x19c   :  { %6867 = vmatpush3.msra.mxu0 %v8249_v28  ;;  %6879 = vmatprep.subr.mxu1 %v7431_v18 }
 0x19d   :  { %6868 = vmatprep.subr.mxu0 %v7431_v18  ;;  %6880 = vmatpush3.msra.mxu1 %v8236_v17 }
 0x19e   :  { %6869 = vmatpush3.msra.mxu0 %v8258_v34  ;;  %6872 = vmatprep.mubr.msk.f32.mxu0 %vm7432_vm0, %v7431_v18 }
 0x19f   :  { %6870 = vmatprep.subr.mxu0 %v7431_v18  ;;  %6881 = vmatprep.subr.mxu1 %v7431_v18 }
 0x1a0   :  { %6871 = vmatpush3.msra.mxu0 %v8275_v58  ;;  %6882 = vmatpush3.msra.mxu1 %v8255_v33 }
 0x1a1   :  { %6886 = vmatprep.subr.mxu0 %v7431_v18  ;;  %6873 = vmatmul.mubr.f32.vlgmr.msra.gmra.mxu0 %v7431_v18 }
 0x1a2   :  { %6887 = vmatpush3.msra.mxu0 %v8263_v39  ;;  %6883 = vmatprep.mubr.msk.f32.mxu1 %vm7432_vm0, %v7431_v18 }
 0x1a3   :  { %6888 = vmatprep.subr.mxu0 %v7431_v18  ;;  %6897 = vmatprep.subr.mxu1 %v7431_v18 }
 0x1a4   :  { %6884 = vmatmul.mubr.f32.vlgmr.msra.gmra.mxu1 %v7431_v18  ;;  %6889 = vmatpush3.msra.mxu0 %v8270_v46 }
 0x1a5   :  { %6898 = vmatpush3.msra.mxu1 %v8221_v10  ;;  %6890 = vmatprep.subr.mxu0 %v7431_v18 }
 0x1a6   :  { %6899 = vmatprep.subr.mxu1 %v7431_v18  ;;  %6891 = vmatpush3.msra.mxu0 %v8282_v61 }
 0x1a7   :  { %6900 = vmatpush3.msra.mxu1 %v8230_v16  ;;  %6892 = vmatprep.subr.mxu0 %v7431_v18 }
 0x1a8   :  { %6901 = vmatprep.subr.mxu1 %v7431_v18  ;;  %6893 = vmatpush3.msra.mxu0 %v8299_v40 }
 0x1a9   :  { %6894 = vmatprep.mubr.msk.f32.mxu0 %vm7432_vm0, %v7431_v18  ;;  %6902 = vmatpush3.msra.mxu1 %v8236_v17 }
 0x1aa   :  { %6895 = vmatmul.mubr.f32.vlgmr.msra.gmra.mxu0 %v7431_v18  ;;  %6903 = vmatprep.subr.mxu1 %v7431_v18 }
 0x1ab   :  { %6904 = vmatpush3.msra.mxu1 %v8255_v33  ;;  %6905 = vmatprep.mubr.msk.f32.mxu1 %vm7432_vm0, %v7431_v18 }
 0x1ac   :  { %6906 = vmatmul.mubr.f32.vlgmr.msra.gmra.mxu1 %v7431_v18  ;;  %6919 = vmatprep.subr.mxu1 %v7431_v18 }
 0x1ad   :  { %6920 = vmatpush3.msra.mxu1 %v8294_v37  ;;  %6908 = vmatprep.subr.mxu0 %v7431_v18 }
 0x1ae   :  { %6921 = vmatprep.subr.mxu1 %v7431_v18  ;;  %6927 = vmatprep.mubr.msk.f32.mxu1 %vm7432_vm0, %v7431_v18 }
 0x1af   :  { %6922 = vmatpush3.msra.mxu1 %v8305_v51  ;;  %6909 = vmatpush3.msra.mxu0 %v8221_v10 }
 0x1b0   :  { %6923 = vmatprep.subr.mxu1 %v7431_v18  ;;  %6910 = vmatprep.subr.mxu0 %v7431_v18 }
 0x1b1   :  { %6924 = vmatpush3.msra.mxu1 %v8311_v35  ;;  %6911 = vmatpush3.msra.mxu0 %v8230_v16 }
 0x1b2   :  { %6925 = vmatprep.subr.mxu1 %v7431_v18  ;;  %6912 = vmatprep.subr.mxu0 %v7431_v18 }
 0x1b3   :  { %6926 = vmatpush3.msra.mxu1 %v8323_v20  ;;  %6913 = vmatpush3.msra.mxu0 %v8236_v17 }
 0x1b4   :  { %6941 = vmatprep.subr.mxu1 %v7431_v18  ;;  %6914 = vmatprep.subr.mxu0 %v7431_v18 }
 0x1b5   :  { %6915 = vmatpush3.msra.mxu0 %v8255_v33  ;;  %6916 = vmatprep.mubr.msk.f32.mxu0 %vm7432_vm0, %v7431_v18 }
 0x1b6   :  { %6930 = vmatprep.subr.mxu0 %v7431_v18 }
 0x207   :  { %v6701_v29 = vpop.f32.mrf.mxu1 }
 0x209   :  { %v997_v6 = vpop.f32.mrf.mxu1 }
 0x20f   :  { %v6666_v26 = vpop.f32.mrf.mxu0 }
 0x210   :  { %v1004_v31 = vadd.f32 %v6701_v29, %v6666_v26  ;;  %v8434_v26 = vld [vmem:[%s9098_s3 + $0x23] ss:$0 sm:$0xff] }
 0x211   :  { %v836_v53 = vpop.f32.mrf.mxu0 }
 0x212   :  { %v998_v48 = vadd.f32 %v997_v6, %v836_v53 }
 0x228   :  { %v6771_v32 = vpop.f32.mrf.mxu1 }
 0x22a   :  { %v1203_v41 = vpop.f32.mrf.mxu1 }
 0x230   :  { %v6736_v57 = vpop.f32.mrf.mxu0 }
 0x231   :  { %v1115_v59 = vadd.f32 %v6736_v57, %v1004_v31 }
 0x232   :  { %v1107_v2 = vpop.f32.mrf.mxu0 }
 0x233   :  { %v1108_v36 = vadd.f32 %v1107_v2, %v998_v48  ;;  %v1212_v44 = vadd.f32 %v6771_v32, %v1115_v59 }
 0x235   :  { %v1204_v3 = vadd.f32 %v1203_v41, %v1108_v36 }
 0x24a   :  { %v6841_v55 = vpop.f32.mrf.mxu1 }
 0x24c   :  { %v1423_v43 = vpop.f32.mrf.mxu1 }
 0x251   :  { %v6806_v14 = vpop.f32.mrf.mxu0 }
 0x252   :  { %v1337_v15 = vadd.f32 %v6806_v14, %v1212_v44 }
 0x253   :  { %v1330_v21 = vpop.f32.mrf.mxu0 }
 0x254   :  { %v8408_v23 = vadd.f32 %v6841_v55, %v1337_v15  ;;  %v1331_v42 = vadd.f32 %v1330_v21, %v1204_v3 }
 0x256   :  { %v8410_v30 = vadd.f32 %v1423_v43, %v1331_v42  ;;  %v8413_v62 = vadd.f32 %v1439_v22, %v8408_v23 }
 0x257   :  { %v1638_v7 = vpop.f32.mrf.mxu1 }
 0x258   :  { %v8416_v49 = vadd.f32 %v1439_v22, %v8410_v30  ;;  %v1446_v12 = vrot.slane %v8413_v62, 6  ;;  %v1998_v22 = vrot.slane %v8413_v62, 2 }
 0x259   :  { %v1547_v4 = vpop.f32.mrf.mxu0  ;;  %v6863_v52 = vpop.f32.mrf.mxu1 }
 0x25a   :  { %v8425_v1 = vsub.f32 %v8416_v49, %v1446_v12  ;;  %v1548_v5 = vadd.f32 %v8422_v54, %v1547_v4 }
 0x25b   :  { %v6852_v9 = vpop.f32.mrf.mxu0 }
 0x25c   :  { %1454 = vrot.lane.b32.xlu0 %v8425_v1, %s7433_s17  ;;  %v1639_v11 = vadd.f32 %v1638_v7, %v1548_v5  ;;  %v8444_v7 = vsub.f32 %v8416_v49, %v1998_v22 }
 0x25e   :  { %v2002_v12 = vrot.slane %v8444_v7, 2 }
 0x261   :  { %v1718_v27 = vpop.f32.mrf.mxu0 }
 0x262   :  { %v1719_v45 = vadd.f32 %v1718_v27, %v1639_v11 }
 0x263   :  { %v6874_v47 = vpop.f32.mrf.mxu0 }
 0x264   :  { %v1795_v60 = vpop.f32.mrf.mxu1 }
 0x265   :  { %v1796_v13 = vadd.f32 %v1795_v60, %v1719_v45  ;;  %v8455_v45 = vld [vmem:[%s9099_s1] sm:$0xff] }
 0x266   :  { %v6885_v8 = vpop.f32.mrf.mxu1 }
 0x26a   :  { %v1878_v25 = vpop.f32.mrf.mxu0 }
 0x26b   :  { %v1879_v38 = vadd.f32 %v1878_v25, %v1796_v13 }
 0x26c   :  { %v1953_v50 = vpop.f32.mrf.mxu1  ;;  %v6896_v56 = vpop.f32.mrf.mxu0 }
 0x26d   :  { %v1954_v63 = vadd.f32 %v1953_v50, %v1879_v38 }
 0x26e   :  { %v6907_v0 = vpop.f32.mrf.mxu1 }
 0x26f   :  { %v1958_v19 = vrot.slane %v1954_v63, 2 }
 0x271   :  { %1969 = vrot.lane.b32.xlu0 %v1958_v19, %s7433_s17 }
 0x2ce   :  { %v1455_v29 = vpop.permute.xlu0 %1454 }
 0x2cf   :  { %v1457_v53 = vmul.f32 %v8434_v26, %v1455_v29 }
 0x2d1   :  { %v1459_v57 = vrot.slane %v1457_v53, 2 }
 0x2d3   :  { %1460 = vrot.lane.b32.xlu1 %v1459_v57, %s7430_s30 }
 0x2d7   :  { %1959 = vrot.lane.b32.xlu1 %v1958_v19, %s7430_s30 }
 0x2e3   :  { %v1970_v44 = vpop.permute.xlu0 %1969 }
 0x345   :  { %v1461_v6 = vpop.permute.xlu1 %1460 }
 0x346   :  { %v1463_v31 = vadd.f32 %v1461_v6, %v8413_v62 }
 0x349   :  { %v1960_v32 = vpop.permute.xlu1 %1959 }
 0x34a   :  { %v1962_v2 = vadd.f32 %v1960_v32, %v1463_v31 }
 0x34c   :  { %v5958_v48 = vmul.f32 -1.442695, %v1962_v2 }
 0x34e   :  { %7379 = vpow2.f32 %v5958_v48 }
 0x35b   :  { %v7380_v59 = vpop.eup %7379 }
 0x35c   :  { %v1966_v36 = vadd.f32 1.0, %v7380_v59 }
 0x35e   :  { %7381 = vrcp.f32 %v1966_v36 }
 0x36b   :  { %v7382_v41 = vpop.eup %7381 }
 0x36c   :  { %v1972_v55 = vmul.f32 %v7382_v41, %v1970_v44 }
 0x36e   :  { %1974 = vrot.lane.b32.xlu1 %v1972_v55, %s7434_s20 }
 0x3e0   :  { %v1975_v14 = vpop.permute.xlu1 %1974 }
 0x3e1   :  { %v1977_v15 = vadd.f32 %v1975_v14, %v1463_v31 }
 0x3e3   :  { %7383 = vtanh.f32 %v1977_v15 }
 0x3f0   :  { %v7384_v3 = vpop.eup %7383 }
 0x3f1   :  { %v1979_v21 = vsub.f32 0.0, %v7384_v3 }
 0x3f3   :  { %1981 = vrot.lane.b32.xlu0 %v1979_v21, %s7433_s17 }
 0x465   :  { %v1982_v42 = vpop.permute.xlu0 %1981 }
 0x466   :  { %v1984_v43 = vmul.f32 %v7382_v41, %v1982_v42 }
 0x468   :  { %1986 = vrot.lane.b32.xlu1 %v1984_v43, %s7430_s30 }
 0x46c   :  { %2003 = vrot.lane.b32.xlu1 %v2002_v12, %s7433_s17 }
 0x4da   :  { %v1987_v4 = vpop.permute.xlu1 %1986 }
 0x4db   :  { %v1989_v52 = vadd.f32 %v7384_v3, %v1987_v4 }
 0x4dd   :  { %v1991_v5 = vrot.slane %v1989_v52, 6 }
 0x4de   :  { %v2004_v9 = vpop.permute.xlu1 %2003 }
 0x4df   :  { %v2006_v11 = vmul.f32 %v8434_v26, %v2004_v9  ;;  %1992 = vrot.lane.b32.xlu0 %v1991_v5, %s7430_s30 }
 0x4e1   :  { %v2008_v27 = vrot.slane %v2006_v11, 4 }
 0x4e3   :  { %2009 = vrot.lane.b32.xlu0 %v2008_v27, %s7430_s30 }
 0x551   :  { %v1993_v47 = vpop.permute.xlu0 %1992 }
 0x552   :  { %v8458_v60 = vmul.f32 %v1993_v47, %v8455_v45 }
 0x554   :  { %v2014_v8 = vsel %vm1468_vm1, %v8458_v60, 0 }
 0x555   :  { %v2085_v13 = vand.u32 4294901760, %v2014_v8  ;;  %v2010_v21 = vpop.permute.xlu0 %2009 }
 0x556   :  { %v2012_v22 = vadd.f32 %v2010_v21, %v8413_v62 }
 0x557   :  { %v2086_v25 = vsub.f32 %v2014_v8, %v2085_v13  ;;  %6928 = vmatmul.mubr.f32.vlgmr.msra.gmra.mxu1 %v2085_v13 }
 0x558   :  { %6942 = vmatpush3.msra.mxu1 %v8221_v10  ;;  %6949 = vmatprep.mubr.msk.f32.mxu1 %vm7432_vm0, %v7431_v18 }
 0x559   :  { %6943 = vmatprep.subr.mxu1 %v7431_v18  ;;  %v2087_v38 = vand.u32 4294901760, %v2086_v25 }
 0x55a   :  { %6944 = vmatpush3.msra.mxu1 %v8230_v16 }
 0x55b   :  { %6945 = vmatprep.subr.mxu1 %v7431_v18  ;;  %v2088_v50 = vsub.f32 %v2086_v25, %v2087_v38 }
 0x55c   :  { %6946 = vmatpush3.msra.mxu1 %v8236_v17 }
 0x55d   :  { %6947 = vmatprep.subr.mxu1 %v7431_v18  ;;  %v2089_v56 = vand.u32 4294901760, %v2088_v50 }
 0x55e   :  { %6948 = vmatpush3.msra.mxu1 %v8255_v33 }
 0x55f   :  { %6950 = vmatmul.mubr.f32.vlgmr.msra.gmra.mxu1 %v2087_v38  ;;  %6963 = vmatprep.subr.mxu1 %v7431_v18 }
 0x560   :  { %6917 = vmatmul.mubr.f32.vlgmr.msra.gmra.mxu0 %v2089_v56  ;;  %6964 = vmatpush3.msra.mxu1 %v8221_v10  ;;  %v2540_v56 = vrot.slane %v8458_v60, 4 }
 0x561   :  { %6931 = vmatpush3.msra.mxu0 %v8239_v24  ;;  %6965 = vmatprep.subr.mxu1 %v7431_v18 }
 0x562   :  { %6932 = vmatprep.subr.mxu0 %v7431_v18  ;;  %6966 = vmatpush3.msra.mxu1 %v8230_v16 }
 0x563   :  { %6933 = vmatpush3.msra.mxu0 %v8249_v28  ;;  %6967 = vmatprep.subr.mxu1 %v7431_v18 }
 0x564   :  { %6934 = vmatprep.subr.mxu0 %v7431_v18  ;;  %6968 = vmatpush3.msra.mxu1 %v8236_v17 }
 0x565   :  { %6935 = vmatpush3.msra.mxu0 %v8258_v34  ;;  %6969 = vmatprep.subr.mxu1 %v7431_v18 }
 0x566   :  { %6936 = vmatprep.subr.mxu0 %v7431_v18  ;;  %6938 = vmatprep.mubr.msk.f32.mxu0 %vm7432_vm0, %v7431_v18 }
 0x567   :  { %6937 = vmatpush3.msra.mxu0 %v8275_v58  ;;  %6970 = vmatpush3.msra.mxu1 %v8255_v33 }
 0x568   :  { %6971 = vmatprep.mubr.msk.f32.mxu1 %vm7432_vm0, %v7431_v18  ;;  %6939 = vmatmul.mubr.f32.vlgmr.msra.gmra.mxu0 %v2086_v25 }
 0x569   :  { %6952 = vmatprep.subr.mxu0 %v7431_v18  ;;  %6972 = vmatmul.mubr.f32.vlgmr.msra.gmra.mxu1 %v2085_v13 }
 0x56a   :  { %6953 = vmatpush3.msra.mxu0 %v8263_v39  ;;  %6960 = vmatprep.mubr.msk.f32.mxu0 %vm7432_vm0, %v7431_v18 }
 0x56b   :  { %6954 = vmatprep.subr.mxu0 %v7431_v18  ;;  %6985 = vmatprep.subr.mxu1 %v7431_v18 }
 0x56c   :  { %6955 = vmatpush3.msra.mxu0 %v8270_v46  ;;  %6986 = vmatpush3.msra.mxu1 %v8294_v37 }
 0x56d   :  { %6956 = vmatprep.subr.mxu0 %v7431_v18  ;;  %6987 = vmatprep.subr.mxu1 %v7431_v18 }
 0x56e   :  { %6957 = vmatpush3.msra.mxu0 %v8282_v61  ;;  %6988 = vmatpush3.msra.mxu1 %v8305_v51 }
 0x56f   :  { %6958 = vmatprep.subr.mxu0 %v7431_v18  ;;  %6989 = vmatprep.subr.mxu1 %v7431_v18 }
 0x570   :  { %6959 = vmatpush3.msra.mxu0 %v8299_v40  ;;  %6990 = vmatpush3.msra.mxu1 %v8311_v35 }
 0x571   :  { %6961 = vmatmul.mubr.f32.vlgmr.msra.gmra.mxu0 %v2085_v13  ;;  %6991 = vmatprep.subr.mxu1 %v7431_v18 }
 0x572   :  { %6992 = vmatpush3.msra.mxu1 %v8323_v20  ;;  %6974 = vmatprep.subr.mxu0 %v7431_v18 }
 0x573   :  { %6993 = vmatprep.mubr.msk.f32.mxu1 %vm7432_vm0, %v7431_v18  ;;  %7007 = vmatprep.subr.mxu1 %v7431_v18 }
 0x574   :  { %6975 = vmatpush3.msra.mxu0 %v8221_v10  ;;  %6982 = vmatprep.mubr.msk.f32.mxu0 %vm7432_vm0, %v7431_v18 }
 0x575   :  { %6976 = vmatprep.subr.mxu0 %v7431_v18 }
 0x576   :  { %6977 = vmatpush3.msra.mxu0 %v8230_v16 }
 0x577   :  { %6978 = vmatprep.subr.mxu0 %v7431_v18 }
 0x578   :  { %6979 = vmatpush3.msra.mxu0 %v8236_v17 }
 0x579   :  { %6980 = vmatprep.subr.mxu0 %v7431_v18 }
 0x57a   :  { %6981 = vmatpush3.msra.mxu0 %v8255_v33 }
 0x57b   :  { %6996 = vmatprep.subr.mxu0 %v7431_v18 }
 0x617   :  { %v2182_v63 = vpop.f32.mrf.mxu1 }
 0x619   :  { %v6929_v0 = vpop.f32.mrf.mxu1 }
 0x61f   :  { %v2339_v19 = vpop.f32.mrf.mxu1 }
 0x620   :  { %v2091_v29 = vpop.f32.mrf.mxu0 }
 0x621   :  { %v6951_v53 = vpop.f32.mrf.mxu1  ;;  %v2092_v6 = vadd.f32 %v8422_v54, %v2091_v29 }
 0x622   :  { %v6918_v57 = vpop.f32.mrf.mxu0 }
 0x623   :  { %v2183_v2 = vadd.f32 %v2182_v63, %v2092_v6  ;;  %v2559_v63 = vrot.slane %v8425_v1, 4 }
 0x628   :  { %v2262_v31 = vpop.f32.mrf.mxu0 }
 0x629   :  { %v2497_v32 = vpop.f32.mrf.mxu1  ;;  %v2263_v36 = vadd.f32 %v2262_v31, %v2183_v2 }
 0x62a   :  { %v6940_v48 = vpop.f32.mrf.mxu0 }
 0x62b   :  { %v6973_v59 = vpop.f32.mrf.mxu1  ;;  %v2340_v41 = vadd.f32 %v2339_v19, %v2263_v36 }
 0x631   :  { %v2422_v44 = vpop.f32.mrf.mxu0 }
 0x632   :  { %v2423_v55 = vadd.f32 %v2422_v44, %v2340_v41 }
 0x633   :  { %v6962_v14 = vpop.f32.mrf.mxu0 }
 0x634   :  { %v2498_v15 = vadd.f32 %v2497_v32, %v2423_v55 }
 0x636   :  { %v2502_v3 = vrot.slane %v2498_v15, 4 }
 0x638   :  { %2503 = vrot.lane.b32.xlu1 %v2502_v3, %s7430_s30  ;;  %2513 = vrot.lane.b32.xlu0 %v2502_v3, %s7433_s17 }
 0x6aa   :  { %v2504_v42 = vpop.permute.xlu1 %2503  ;;  %v2514_v9 = vpop.permute.xlu0 %2513 }
 0x6ab   :  { %v2506_v43 = vadd.f32 %v2504_v42, %v2012_v22 }
 0x6ad   :  { %v5959_v12 = vmul.f32 -1.442695, %v2506_v43 }
 0x6af   :  { %7385 = vpow2.f32 %v5959_v12 }
 0x6bc   :  { %v7386_v4 = vpop.eup %7385 }
 0x6bd   :  { %v2510_v52 = vadd.f32 1.0, %v7386_v4 }
 0x6bf   :  { %7387 = vrcp.f32 %v2510_v52 }
 0x6cc   :  { %v7388_v5 = vpop.eup %7387 }
 0x6cd   :  { %v2516_v11 = vmul.f32 %v7388_v5, %v2514_v9 }
 0x6cf   :  { %2518 = vrot.lane.b32.xlu1 %v2516_v11, %s7434_s20 }
 0x741   :  { %v2519_v27 = vpop.permute.xlu1 %2518 }
 0x742   :  { %v2521_v47 = vadd.f32 %v2519_v27, %v2012_v22 }
 0x744   :  { %7389 = vtanh.f32 %v2521_v47 }
 0x751   :  { %v7390_v8 = vpop.eup %7389 }
 0x752   :  { %v2524_v13 = vrot.slane %v7390_v8, 4 }
 0x754   :  { %2525 = vrot.lane.b32.xlu0 %v2524_v13, %s7430_s30 }
 0x7c6   :  { %v2526_v25 = vpop.permute.xlu0 %2525 }
 0x7c7   :  { %v2528_v38 = vsub.f32 %v8458_v60, %v2526_v25 }
 0x7c9   :  { %v2530_v50 = vrot.slane %v2528_v38, 4 }
 0x7cb   :  { %2531 = vrot.lane.b32.xlu1 %v2530_v50, %s7434_s20 }
 0x7cf   :  { %2541 = vrot.lane.b32.xlu1 %v2540_v56, %s7433_s17 }
 0x7d3   :  { %2560 = vrot.lane.b32.xlu1 %v2559_v63, %s7433_s17 }
 0x83d   :  { %v2532_v0 = vpop.permute.xlu1 %2531 }
 0x83e   :  { %v2534_v19 = vmul.f32 %v7388_v5, %v2532_v0 }
 0x840   :  { %2536 = vrot.lane.b32.xlu0 %v2534_v19, %s7430_s30 }
 0x841   :  { %v2542_v29 = vpop.permute.xlu1 %2541 }
 0x845   :  { %v2561_v6 = vpop.permute.xlu1 %2560 }
 0x846   :  { %v2563_v32 = vmul.f32 %v8434_v26, %v2561_v6 }
 0x848   :  { %v2565_v48 = vrot.slane %v2563_v32, 6 }
 0x8b2   :  { %v2537_v53 = vpop.permute.xlu0 %2536 }
 0x8b3   :  { %v2539_v57 = vadd.f32 %v7390_v8, %v2537_v53 }
 0x8b5   :  { %v2544_v31 = vsub.f32 %v2539_v57, %v2542_v29 }
 0x8b7   :  { %v2546_v2 = vrot.slane %v2544_v31, 2 }
 0x8b9   :  { %2547 = vrot.lane.b32.xlu0 %v2546_v2, %s7430_s30 }
 0x8bd   :  { %2566 = vrot.lane.b32.xlu0 %v2565_v48, %s7430_s30 }
 0x92b   :  { %v2548_v1 = vpop.permute.xlu0 %2547 }
 0x92c   :  { %v2550_v59 = vmul.f32 %v2548_v1, %v8455_v45 }
 0x92e   :  { %v2552_v36 = vrot.slane %v2550_v59, 2 }
 0x92f   :  { %v2567_v19 = vpop.permute.xlu0 %2566 }
 0x930   :  { %v8540_v41 = vadd.f32 %v2552_v36, %v8458_v60  ;;  %v2569_v29 = vadd.f32 %v2567_v19, %v8413_v62 }
 0x932   :  { %v2570_v44 = vsel %vm1468_vm1, %v8540_v41, 0 }
 0x933   :  { %v2641_v55 = vand.u32 4294901760, %v2570_v44 }
 0x935   :  { %v2642_v14 = vsub.f32 %v2570_v44, %v2641_v55  ;;  %6994 = vmatmul.mubr.f32.vlgmr.msra.gmra.mxu1 %v2641_v55 }
 0x936   :  { %7008 = vmatpush3.msra.mxu1 %v8221_v10  ;;  %7015 = vmatprep.mubr.msk.f32.mxu1 %vm7432_vm0, %v7431_v18 }
 0x937   :  { %7009 = vmatprep.subr.mxu1 %v7431_v18  ;;  %v2643_v15 = vand.u32 4294901760, %v2642_v14 }
 0x938   :  { %7010 = vmatpush3.msra.mxu1 %v8230_v16 }
 0x939   :  { %7011 = vmatprep.subr.mxu1 %v7431_v18  ;;  %v2644_v3 = vsub.f32 %v2642_v14, %v2643_v15 }
 0x93a   :  { %7012 = vmatpush3.msra.mxu1 %v8236_v17 }
 0x93b   :  { %7013 = vmatprep.subr.mxu1 %v7431_v18  ;;  %v2645_v21 = vand.u32 4294901760, %v2644_v3 }
 0x93c   :  { %7014 = vmatpush3.msra.mxu1 %v8255_v33 }
 0x93d   :  { %7016 = vmatmul.mubr.f32.vlgmr.msra.gmra.mxu1 %v2643_v15  ;;  %7029 = vmatprep.subr.mxu1 %v7431_v18 }
 0x93e   :  { %6983 = vmatmul.mubr.f32.vlgmr.msra.gmra.mxu0 %v2645_v21  ;;  %7030 = vmatpush3.msra.mxu1 %v8221_v10  ;;  %v2556_v21 = vrot.slane %v8540_v41, 6 }
 0x93f   :  { %6997 = vmatpush3.msra.mxu0 %v8239_v24  ;;  %7031 = vmatprep.subr.mxu1 %v7431_v18 }
 0x940   :  { %6998 = vmatprep.subr.mxu0 %v7431_v18  ;;  %7032 = vmatpush3.msra.mxu1 %v8230_v16 }
 0x941   :  { %6999 = vmatpush3.msra.mxu0 %v8249_v28  ;;  %7033 = vmatprep.subr.mxu1 %v7431_v18 }
 0x942   :  { %7000 = vmatprep.subr.mxu0 %v7431_v18  ;;  %7034 = vmatpush3.msra.mxu1 %v8236_v17 }
 0x943   :  { %7001 = vmatpush3.msra.mxu0 %v8258_v34  ;;  %7035 = vmatprep.subr.mxu1 %v7431_v18 }
 0x944   :  { %7002 = vmatprep.subr.mxu0 %v7431_v18  ;;  %7004 = vmatprep.mubr.msk.f32.mxu0 %vm7432_vm0, %v7431_v18 }
 0x945   :  { %7003 = vmatpush3.msra.mxu0 %v8275_v58  ;;  %7036 = vmatpush3.msra.mxu1 %v8255_v33 }
 0x946   :  { %7037 = vmatprep.mubr.msk.f32.mxu1 %vm7432_vm0, %v7431_v18  ;;  %7005 = vmatmul.mubr.f32.vlgmr.msra.gmra.mxu0 %v2642_v14 }
 0x947   :  { %7018 = vmatprep.subr.mxu0 %v7431_v18  ;;  %7038 = vmatmul.mubr.f32.vlgmr.msra.gmra.mxu1 %v2641_v55 }
 0x948   :  { %7019 = vmatpush3.msra.mxu0 %v8263_v39  ;;  %7026 = vmatprep.mubr.msk.f32.mxu0 %vm7432_vm0, %v7431_v18 }
 0x949   :  { %7020 = vmatprep.subr.mxu0 %v7431_v18  ;;  %7051 = vmatprep.subr.mxu1 %v7431_v18 }
 0x94a   :  { %7021 = vmatpush3.msra.mxu0 %v8270_v46  ;;  %7052 = vmatpush3.msra.mxu1 %v8294_v37 }
 0x94b   :  { %7022 = vmatprep.subr.mxu0 %v7431_v18  ;;  %7053 = vmatprep.subr.mxu1 %v7431_v18 }
 0x94c   :  { %7023 = vmatpush3.msra.mxu0 %v8282_v61  ;;  %7054 = vmatpush3.msra.mxu1 %v8305_v51 }
 0x94d   :  { %7024 = vmatprep.subr.mxu0 %v7431_v18  ;;  %7055 = vmatprep.subr.mxu1 %v7431_v18 }
 0x94e   :  { %7025 = vmatpush3.msra.mxu0 %v8299_v40  ;;  %7056 = vmatpush3.msra.mxu1 %v8311_v35 }
 0x94f   :  { %7027 = vmatmul.mubr.f32.vlgmr.msra.gmra.mxu0 %v2641_v55  ;;  %7057 = vmatprep.subr.mxu1 %v7431_v18 }
 0x950   :  { %7058 = vmatpush3.msra.mxu1 %v8323_v20  ;;  %7040 = vmatprep.subr.mxu0 %v7431_v18 }
 0x951   :  { %7059 = vmatprep.mubr.msk.f32.mxu1 %vm7432_vm0, %v7431_v18  ;;  %7073 = vmatprep.subr.mxu1 %v7431_v18 }
 0x952   :  { %7041 = vmatpush3.msra.mxu0 %v8221_v10  ;;  %7048 = vmatprep.mubr.msk.f32.mxu0 %vm7432_vm0, %v7431_v18 }
 0x953   :  { %7042 = vmatprep.subr.mxu0 %v7431_v18 }
 0x954   :  { %7043 = vmatpush3.msra.mxu0 %v8230_v16 }
 0x955   :  { %7044 = vmatprep.subr.mxu0 %v7431_v18 }
 0x956   :  { %7045 = vmatpush3.msra.mxu0 %v8236_v17 }
 0x957   :  { %7046 = vmatprep.subr.mxu0 %v7431_v18 }
 0x958   :  { %7047 = vmatpush3.msra.mxu0 %v8255_v33 }
 0x959   :  { %7062 = vmatprep.subr.mxu0 %v7431_v18 }
 0x9f5   :  { %v2738_v22 = vpop.f32.mrf.mxu1 }
 0x9f7   :  { %v6995_v42 = vpop.f32.mrf.mxu1 }
 0x9fd   :  { %v2895_v43 = vpop.f32.mrf.mxu1 }
 0x9fe   :  { %v2647_v12 = vpop.f32.mrf.mxu0 }
 0x9ff   :  { %v7017_v4 = vpop.f32.mrf.mxu1  ;;  %v2648_v5 = vadd.f32 %v8422_v54, %v2647_v12 }
 0xa00   :  { %v6984_v52 = vpop.f32.mrf.mxu0 }
 0xa01   :  { %v2739_v27 = vadd.f32 %v2738_v22, %v2648_v5  ;;  %v3114_v22 = vrot.slane %v8444_v7, 6 }
 0xa06   :  { %v2818_v9 = vpop.f32.mrf.mxu0 }
 0xa07   :  { %v3053_v11 = vpop.f32.mrf.mxu1  ;;  %v2819_v13 = vadd.f32 %v2818_v9, %v2739_v27 }
 0xa08   :  { %v7006_v47 = vpop.f32.mrf.mxu0 }
 0xa09   :  { %v7039_v8 = vpop.f32.mrf.mxu1  ;;  %v2896_v25 = vadd.f32 %v2895_v43, %v2819_v13 }
 0xa0f   :  { %v2978_v38 = vpop.f32.mrf.mxu0 }
 0xa10   :  { %v2979_v50 = vadd.f32 %v2978_v38, %v2896_v25 }
 0xa11   :  { %v7028_v56 = vpop.f32.mrf.mxu0 }
 0xa12   :  { %v3054_v63 = vadd.f32 %v3053_v11, %v2979_v50 }
 0xa14   :  { %v3058_v0 = vrot.slane %v3054_v63, 6 }
 0xa16   :  { %3059 = vrot.lane.b32.xlu1 %v3058_v0, %s7430_s30  ;;  %3069 = vrot.lane.b32.xlu0 %v3058_v0, %s7433_s17 }
 0xa88   :  { %v3060_v53 = vpop.permute.xlu1 %3059  ;;  %v3070_v48 = vpop.permute.xlu0 %3069 }
 0xa89   :  { %v3062_v57 = vadd.f32 %v3060_v53, %v2569_v29 }
 0xa8b   :  { %v5960_v6 = vmul.f32 -1.442695, %v3062_v57 }
 0xa8d   :  { %7391 = vpow2.f32 %v5960_v6 }
 0xa9a   :  { %v7392_v31 = vpop.eup %7391 }
 0xa9b   :  { %v3066_v32 = vadd.f32 1.0, %v7392_v31 }
 0xa9d   :  { %7393 = vrcp.f32 %v3066_v32 }
 0xaaa   :  { %v7394_v2 = vpop.eup %7393 }
 0xaab   :  { %v3072_v1 = vmul.f32 %v7394_v2, %v3070_v48 }
 0xaad   :  { %3074 = vrot.lane.b32.xlu1 %v3072_v1, %s7434_s20 }
 0xb1f   :  { %v3075_v59 = vpop.permute.xlu1 %3074 }
 0xb20   :  { %v3077_v36 = vadd.f32 %v3075_v59, %v2569_v29 }
 0xb22   :  { %7395 = vtanh.f32 %v3077_v36 }
 0xb2f   :  { %v7396_v44 = vpop.eup %7395 }
 0xb30   :  { %v3080_v55 = vrot.slane %v7396_v44, 2 }
 0xb32   :  { %3081 = vrot.lane.b32.xlu0 %v3080_v55, %s7430_s30 }
 0xba4   :  { %v3082_v14 = vpop.permute.xlu0 %3081 }
 0xba5   :  { %v3084_v15 = vsub.f32 %v8540_v41, %v3082_v14 }
 0xba7   :  { %v3086_v3 = vrot.slane %v3084_v15, 6 }
 0xba9   :  { %3087 = vrot.lane.b32.xlu1 %v3086_v3, %s7434_s20 }
 0xbad   :  { %3096 = vrot.lane.b32.xlu1 %v2556_v21, %s7433_s17 }
 0xbb1   :  { %3115 = vrot.lane.b32.xlu1 %v3114_v22, %s7433_s17 }
 0xc1b   :  { %v3088_v42 = vpop.permute.xlu1 %3087 }
 0xc1c   :  { %v3090_v43 = vmul.f32 %v7394_v2, %v3088_v42 }
 0xc1e   :  { %3092 = vrot.lane.b32.xlu0 %v3090_v43, %s7430_s30 }
 0xc1f   :  { %v3097_v12 = vpop.permute.xlu1 %3096 }
 0xc23   :  { %v3116_v11 = vpop.permute.xlu1 %3115 }
 0xc24   :  { %v3118_v27 = vmul.f32 %v8434_v26, %v3116_v11 }
 0xc90   :  { %v3093_v4 = vpop.permute.xlu0 %3092 }
 0xc91   :  { %v3095_v52 = vadd.f32 %v7396_v44, %v3093_v4 }
 0xc93   :  { %v3099_v5 = vsub.f32 %v3095_v52, %v3097_v12 }
 0xc95   :  { %v3101_v9 = vrot.slane %v3099_v5, 6 }
 0xc97   :  { %3102 = vrot.lane.b32.xlu0 %v3101_v9, %s7430_s30 }
 0xc9b   :  { %3120 = vrot.lane.b32.xlu0 %v3118_v27, %s7430_s30 }
 0xd09   :  { %v3103_v47 = vpop.permute.xlu0 %3102 }
 0xd0a   :  { %v3105_v7 = vmul.f32 %v3103_v47, %v8455_v45 }
 0xd0c   :  { %v3107_v8 = vrot.slane %v3105_v7, 4 }
 0xd0d   :  { %v3121_v42 = vpop.permute.xlu0 %3120 }
 0xd0e   :  { %v8624_v13 = vadd.f32 %v3107_v8, %v8540_v41  ;;  %v3123_v43 = vadd.f32 %v3121_v42, %v8413_v62 }
 0xd10   :  { %v3124_v25 = vsel %vm1468_vm1, %v8624_v13, 0 }
 0xd11   :  { %v3195_v38 = vand.u32 4294901760, %v3124_v25 }
 0xd13   :  { %v3196_v50 = vsub.f32 %v3124_v25, %v3195_v38  ;;  %7060 = vmatmul.mubr.f32.vlgmr.msra.gmra.mxu1 %v3195_v38 }
 0xd14   :  { %7074 = vmatpush3.msra.mxu1 %v8221_v10  ;;  %7081 = vmatprep.mubr.msk.f32.mxu1 %vm7432_vm0, %v7431_v18 }
 0xd15   :  { %7075 = vmatprep.subr.mxu1 %v7431_v18  ;;  %v3197_v56 = vand.u32 4294901760, %v3196_v50 }
 0xd16   :  { %7076 = vmatpush3.msra.mxu1 %v8230_v16 }
 0xd17   :  { %7077 = vmatprep.subr.mxu1 %v7431_v18  ;;  %v3198_v63 = vsub.f32 %v3196_v50, %v3197_v56 }
 0xd18   :  { %7078 = vmatpush3.msra.mxu1 %v8236_v17 }
 0xd19   :  { %7079 = vmatprep.subr.mxu1 %v7431_v18  ;;  %v3199_v0 = vand.u32 4294901760, %v3198_v63 }
 0xd1a   :  { %7080 = vmatpush3.msra.mxu1 %v8255_v33 }
 0xd1b   :  { %7082 = vmatmul.mubr.f32.vlgmr.msra.gmra.mxu1 %v3197_v56  ;;  %7095 = vmatprep.subr.mxu1 %v7431_v18 }
 0xd1c   :  { %7049 = vmatmul.mubr.f32.vlgmr.msra.gmra.mxu0 %v3199_v0  ;;  %7096 = vmatpush3.msra.mxu1 %v8221_v10 }
 0xd1d   :  { %7063 = vmatpush3.msra.mxu0 %v8239_v24  ;;  %7097 = vmatprep.subr.mxu1 %v7431_v18 }
 0xd1e   :  { %7064 = vmatprep.subr.mxu0 %v7431_v18  ;;  %7098 = vmatpush3.msra.mxu1 %v8230_v16 }
 0xd1f   :  { %7065 = vmatpush3.msra.mxu0 %v8249_v28  ;;  %7099 = vmatprep.subr.mxu1 %v7431_v18 }
 0xd20   :  { %7066 = vmatprep.subr.mxu0 %v7431_v18  ;;  %7100 = vmatpush3.msra.mxu1 %v8236_v17 }
 0xd21   :  { %7067 = vmatpush3.msra.mxu0 %v8258_v34  ;;  %7101 = vmatprep.subr.mxu1 %v7431_v18 }
 0xd22   :  { %7068 = vmatprep.subr.mxu0 %v7431_v18  ;;  %7070 = vmatprep.mubr.msk.f32.mxu0 %vm7432_vm0, %v7431_v18 }
 0xd23   :  { %7069 = vmatpush3.msra.mxu0 %v8275_v58  ;;  %7102 = vmatpush3.msra.mxu1 %v8255_v33 }
 0xd24   :  { %7103 = vmatprep.mubr.msk.f32.mxu1 %vm7432_vm0, %v7431_v18  ;;  %7071 = vmatmul.mubr.f32.vlgmr.msra.gmra.mxu0 %v3196_v50  ;;  %v3666_v50 = vrot.slane %v8416_v49, 6 }
 0xd25   :  { %7084 = vmatprep.subr.mxu0 %v7431_v18  ;;  %7104 = vmatmul.mubr.f32.vlgmr.msra.gmra.mxu1 %v3195_v38 }
 0xd26   :  { %7085 = vmatpush3.msra.mxu0 %v8263_v39  ;;  %7092 = vmatprep.mubr.msk.f32.mxu0 %vm7432_vm0, %v7431_v18  ;;  %v8700_v56 = vsub.f32 %v8413_v62, %v3666_v50 }
 0xd27   :  { %7086 = vmatprep.subr.mxu0 %v7431_v18  ;;  %7117 = vmatprep.subr.mxu1 %v7431_v18 }
 0xd28   :  { %7087 = vmatpush3.msra.mxu0 %v8270_v46  ;;  %7118 = vmatpush3.msra.mxu1 %v8294_v37 }
 0xd29   :  { %7088 = vmatprep.subr.mxu0 %v7431_v18  ;;  %7119 = vmatprep.subr.mxu1 %v7431_v18 }
 0xd2a   :  { %7089 = vmatpush3.msra.mxu0 %v8282_v61  ;;  %7120 = vmatpush3.msra.mxu1 %v8305_v51 }
 0xd2b   :  { %7090 = vmatprep.subr.mxu0 %v7431_v18  ;;  %7121 = vmatprep.subr.mxu1 %v7431_v18 }
 0xd2c   :  { %7091 = vmatpush3.msra.mxu0 %v8299_v40  ;;  %7122 = vmatpush3.msra.mxu1 %v8311_v35 }
 0xd2d   :  { %7093 = vmatmul.mubr.f32.vlgmr.msra.gmra.mxu0 %v3195_v38  ;;  %7123 = vmatprep.subr.mxu1 %v7431_v18 }
 0xd2e   :  { %7124 = vmatpush3.msra.mxu1 %v8323_v20  ;;  %7106 = vmatprep.subr.mxu0 %v7431_v18 }
 0xd2f   :  { %7125 = vmatprep.mubr.msk.f32.mxu1 %vm7432_vm0, %v7431_v18  ;;  %7139 = vmatprep.subr.mxu1 %v7431_v18 }
 0xd30   :  { %7107 = vmatpush3.msra.mxu0 %v8221_v10  ;;  %7114 = vmatprep.mubr.msk.f32.mxu0 %vm7432_vm0, %v7431_v18 }
 0xd31   :  { %7108 = vmatprep.subr.mxu0 %v7431_v18 }
 0xd32   :  { %7109 = vmatpush3.msra.mxu0 %v8230_v16 }
 0xd33   :  { %7110 = vmatprep.subr.mxu0 %v7431_v18 }
 0xd34   :  { %7111 = vmatpush3.msra.mxu0 %v8236_v17 }
 0xd35   :  { %7112 = vmatprep.subr.mxu0 %v7431_v18 }
 0xd36   :  { %7113 = vmatpush3.msra.mxu0 %v8255_v33 }
 0xd37   :  { %7128 = vmatprep.subr.mxu0 %v7431_v18 }
 0xdd3   :  { %v3292_v19 = vpop.f32.mrf.mxu1 }
 0xdd5   :  { %v7061_v29 = vpop.f32.mrf.mxu1 }
 0xddb   :  { %v3449_v53 = vpop.f32.mrf.mxu1 }
 0xddc   :  { %v3201_v57 = vpop.f32.mrf.mxu0 }
 0xddd   :  { %v7083_v6 = vpop.f32.mrf.mxu1  ;;  %v3202_v32 = vadd.f32 %v8422_v54, %v3201_v57 }
 0xdde   :  { %v7050_v31 = vpop.f32.mrf.mxu0 }
 0xddf   :  { %v3293_v1 = vadd.f32 %v3292_v19, %v3202_v32 }
 0xde4   :  { %v3372_v2 = vpop.f32.mrf.mxu0 }
 0xde5   :  { %v3607_v48 = vpop.f32.mrf.mxu1  ;;  %v3373_v44 = vadd.f32 %v3372_v2, %v3293_v1 }
 0xde6   :  { %v7072_v59 = vpop.f32.mrf.mxu0 }
 0xde7   :  { %v7105_v36 = vpop.f32.mrf.mxu1  ;;  %v3450_v55 = vadd.f32 %v3449_v53, %v3373_v44 }
 0xde8   :  { %v3111_v36 = vrot.slane %v8624_v13, 4 }
 0xded   :  { %v3532_v14 = vpop.f32.mrf.mxu0 }
 0xdee   :  { %v3533_v15 = vadd.f32 %v3532_v14, %v3450_v55  ;;  %v8717_v14 = vmul.f32 %v3111_v36, %v8455_v45 }
 0xdef   :  { %v7094_v3 = vpop.f32.mrf.mxu0 }
 0xdf0   :  { %v3608_v22 = vadd.f32 %v3607_v48, %v3533_v15  ;;  %v8722_v15 = vmul.f32 %v2556_v21, %v8455_v45 }
 0xdf2   :  { %3612 = vrot.lane.b32.xlu1 %v3608_v22, %s7430_s30  ;;  %3622 = vrot.lane.b32.xlu0 %v3608_v22, %s7433_s17  ;;  %v5913_v41 = vrot.slane %v8722_v15, 6 }
 0xe64   :  { %v3613_v12 = vpop.permute.xlu1 %3612  ;;  %v3623_v11 = vpop.permute.xlu0 %3622 }
 0xe65   :  { %v3615_v54 = vadd.f32 %v3613_v12, %v3123_v43 }
 0xe67   :  { %v5961_v4 = vmul.f32 -1.442695, %v3615_v54 }
 0xe69   :  { %7397 = vpow2.f32 %v5961_v4 }
 0xe76   :  { %v7398_v52 = vpop.eup %7397 }
 0xe77   :  { %v3619_v5 = vadd.f32 1.0, %v7398_v52 }
 0xe79   :  { %7399 = vrcp.f32 %v3619_v5 }
 0xe86   :  { %v7400_v9 = vpop.eup %7399 }
 0xe87   :  { %v3625_v27 = vmul.f32 %v7400_v9, %v3623_v11 }
 0xe89   :  { %3627 = vrot.lane.b32.xlu1 %v3625_v27, %s7434_s20 }
 0xefb   :  { %v3628_v47 = vpop.permute.xlu1 %3627 }
 0xefc   :  { %v3630_v7 = vadd.f32 %v3628_v47, %v3123_v43  ;;  %v5910_v43 = vrot.slane %v8717_v14, 2 }
 0xefe   :  { %7401 = vtanh.f32 %v3630_v7  ;;  %v8799_v7 = vld [vmem:[%s9098_s3 + $0x22] ss:$0 sm:$0xff] }
 0xf0b   :  { %v7402_v8 = vpop.eup %7401 }
 0xf0c   :  { %3633 = vrot.lane.b32.xlu0 %v7402_v8, %s7430_s30 }
 0xf7e   :  { %v3634_v25 = vpop.permute.xlu0 %3633 }
 0xf7f   :  { %v3636_v38 = vsub.f32 %v8624_v13, %v3634_v25 }
 0xf81   :  { %3638 = vrot.lane.b32.xlu1 %v3636_v38, %s7434_s20 }
 0xf85   :  { %3647 = vrot.lane.b32.xlu1 %v8624_v13, %s7433_s17 }
 0xf89   :  { %3670 = vrot.lane.b32.xlu1 %v8700_v56, %s7433_s17 }
 0xff3   :  { %v3639_v63 = vpop.permute.xlu1 %3638 }
 0xff4   :  { %v3641_v0 = vmul.f32 %v7400_v9, %v3639_v63 }
 0xff6   :  { %3643 = vrot.lane.b32.xlu0 %v3641_v0, %s7430_s30 }
 0xff7   :  { %v3648_v19 = vpop.permute.xlu1 %3647 }
 0xffb   :  { %v3671_v57 = vpop.permute.xlu1 %3670 }
 0xffc   :  { %v3673_v31 = vmul.f32 %v8434_v26, %v3671_v57 }
 0xffe   :  { %v3675_v2 = vrot.slane %v3673_v31, 2 }
0x1068   :  { %v3644_v29 = vpop.permute.xlu0 %3643 }
0x1069   :  { %v3646_v53 = vadd.f32 %v7402_v8, %v3644_v29 }
0x106b   :  { %v3650_v6 = vsub.f32 %v3646_v53, %v3648_v19 }
0x106d   :  { %v3652_v32 = vrot.slane %v3650_v6, 2 }
0x106f   :  { %3653 = vrot.lane.b32.xlu0 %v3652_v32, %s7430_s30 }
0x1073   :  { %3676 = vrot.lane.b32.xlu0 %v3675_v2, %s7430_s30 }
0x10e1   :  { %v3654_v48 = vpop.permute.xlu0 %3653 }
0x10e2   :  { %v3656_v1 = vmul.f32 %v3654_v48, %v8455_v45 }
0x10e4   :  { %v3658_v59 = vrot.slane %v3656_v1, 6 }
0x10e5   :  { %v3677_v2 = vpop.permute.xlu0 %3676 }
0x10e6   :  { %v8711_v44 = vadd.f32 %v3658_v59, %v8624_v13  ;;  %v3679_v48 = vadd.f32 %v3677_v2, %v8416_v49 }
0x10e8   :  { %v3680_v55 = vsel %vm1468_vm1, %v8711_v44, 0  ;;  %v3662_v26 = vrot.slane %v8711_v44, 2 }
0x10e9   :  { %v3751_v3 = vand.u32 4294901760, %v3680_v55 }
0x10ea   :  { %v8727_v22 = vmul.f32 %v3662_v26, %v8455_v45 }
0x10eb   :  { %v3752_v13 = vsub.f32 %v3680_v55, %v3751_v3  ;;  %7126 = vmatmul.mubr.f32.vlgmr.msra.gmra.mxu1 %v3751_v3 }
0x10ec   :  { %7140 = vmatpush3.msra.mxu1 %v8221_v10  ;;  %7147 = vmatprep.mubr.msk.f32.mxu1 %vm7432_vm0, %v7431_v18  ;;  %v5907_v42 = vrot.slane %v8727_v22, 6 }
0x10ed   :  { %7141 = vmatprep.subr.mxu1 %v7431_v18  ;;  %v3753_v21 = vand.u32 4294901760, %v3752_v13 }
0x10ee   :  { %7142 = vmatpush3.msra.mxu1 %v8230_v16  ;;  %v5921_v45 = vsel %vm5885_vm2, %v5907_v42, %v5910_v43 }
0x10ef   :  { %7143 = vmatprep.subr.mxu1 %v7431_v18  ;;  %v3754_v12 = vsub.f32 %v3752_v13, %v3753_v21  ;;  %v8740_v54 = vsel %vm5887_vm3, %v5921_v45, %v5913_v41 }
0x10f0   :  { %7144 = vmatpush3.msra.mxu1 %v8236_v17 }
0x10f1   :  { %7145 = vmatprep.subr.mxu1 %v7431_v18  ;;  %v3755_v4 = vand.u32 4294901760, %v3754_v12 }
0x10f2   :  { %7146 = vmatpush3.msra.mxu1 %v8255_v33 }
0x10f3   :  { %7148 = vmatmul.mubr.f32.vlgmr.msra.gmra.mxu1 %v3753_v21  ;;  %7161 = vmatprep.subr.mxu1 %v7431_v18 }
0x10f4   :  { %7115 = vmatmul.mubr.f32.vlgmr.msra.gmra.mxu0 %v3755_v4  ;;  %7162 = vmatpush3.msra.mxu1 %v8221_v10 }
0x10f5   :  { %7129 = vmatpush3.msra.mxu0 %v8239_v24  ;;  %7163 = vmatprep.subr.mxu1 %v7431_v18 }
0x10f6   :  { %7130 = vmatprep.subr.mxu0 %v7431_v18  ;;  %7164 = vmatpush3.msra.mxu1 %v8230_v16 }
0x10f7   :  { %7131 = vmatpush3.msra.mxu0 %v8249_v28  ;;  %7165 = vmatprep.subr.mxu1 %v7431_v18 }
0x10f8   :  { %7132 = vmatprep.subr.mxu0 %v7431_v18  ;;  %7166 = vmatpush3.msra.mxu1 %v8236_v17 }
0x10f9   :  { %7133 = vmatpush3.msra.mxu0 %v8258_v34  ;;  %7167 = vmatprep.subr.mxu1 %v7431_v18 }
0x10fa   :  { %7134 = vmatprep.subr.mxu0 %v7431_v18  ;;  %7136 = vmatprep.mubr.msk.f32.mxu0 %vm7432_vm0, %v7431_v18 }
0x10fb   :  { %7135 = vmatpush3.msra.mxu0 %v8275_v58  ;;  %7168 = vmatpush3.msra.mxu1 %v8255_v33 }
0x10fc   :  { %7169 = vmatprep.mubr.msk.f32.mxu1 %vm7432_vm0, %v7431_v18  ;;  %7137 = vmatmul.mubr.f32.vlgmr.msra.gmra.mxu0 %v3752_v13 }
0x10fd   :  { %7150 = vmatprep.subr.mxu0 %v7431_v18  ;;  %7170 = vmatmul.mubr.f32.vlgmr.msra.gmra.mxu1 %v3751_v3 }
0x10fe   :  { %7151 = vmatpush3.msra.mxu0 %v8263_v39  ;;  %7158 = vmatprep.mubr.msk.f32.mxu0 %vm7432_vm0, %v7431_v18 }
0x10ff   :  { %7152 = vmatprep.subr.mxu0 %v7431_v18  ;;  %7183 = vmatprep.subr.mxu1 %v7431_v18 }
0x1100   :  { %7153 = vmatpush3.msra.mxu0 %v8270_v46  ;;  %7184 = vmatpush3.msra.mxu1 %v8294_v37 }
0x1101   :  { %7154 = vmatprep.subr.mxu0 %v7431_v18  ;;  %7185 = vmatprep.subr.mxu1 %v7431_v18 }
0x1102   :  { %7155 = vmatpush3.msra.mxu0 %v8282_v61  ;;  %7186 = vmatpush3.msra.mxu1 %v8305_v51 }
0x1103   :  { %7156 = vmatprep.subr.mxu0 %v7431_v18  ;;  %7187 = vmatprep.subr.mxu1 %v7431_v18 }
0x1104   :  { %7157 = vmatpush3.msra.mxu0 %v8299_v40  ;;  %7188 = vmatpush3.msra.mxu1 %v8311_v35 }
0x1105   :  { %7159 = vmatmul.mubr.f32.vlgmr.msra.gmra.mxu0 %v3751_v3  ;;  %7189 = vmatprep.subr.mxu1 %v7431_v18 }
0x1106   :  { %7190 = vmatpush3.msra.mxu1 %v8323_v20  ;;  %7172 = vmatprep.subr.mxu0 %v7431_v18 }
0x1107   :  { %7191 = vmatprep.mubr.msk.f32.mxu1 %vm7432_vm0, %v7431_v18  ;;  %7205 = vmatprep.subr.mxu1 %v7431_v18 }
0x1108   :  { %7173 = vmatpush3.msra.mxu0 %v8221_v10  ;;  %7180 = vmatprep.mubr.msk.f32.mxu0 %vm7432_vm0, %v7431_v18 }
0x1109   :  { %7174 = vmatprep.subr.mxu0 %v7431_v18 }
0x110a   :  { %7175 = vmatpush3.msra.mxu0 %v8230_v16 }
0x110b   :  { %7176 = vmatprep.subr.mxu0 %v7431_v18 }
0x110c   :  { %7177 = vmatpush3.msra.mxu0 %v8236_v17 }
0x110d   :  { %7178 = vmatprep.subr.mxu0 %v7431_v18 }
0x110e   :  { %7179 = vmatpush3.msra.mxu0 %v8255_v33 }
0x110f   :  { %7194 = vmatprep.subr.mxu0 %v7431_v18 }
0x11ab   :  { %v3848_v52 = vpop.f32.mrf.mxu1 }
0x11ad   :  { %v7127_v5 = vpop.f32.mrf.mxu1 }
0x11b3   :  { %v4005_v9 = vpop.f32.mrf.mxu1 }
0x11b4   :  { %v3757_v11 = vpop.f32.mrf.mxu0 }
0x11b5   :  { %v7149_v27 = vpop.f32.mrf.mxu1  ;;  %v3758_v8 = vadd.f32 %v8799_v7, %v3757_v11 }
0x11b6   :  { %v7116_v47 = vpop.f32.mrf.mxu0 }
0x11b7   :  { %v3849_v50 = vadd.f32 %v3848_v52, %v3758_v8 }
0x11bc   :  { %v3928_v25 = vpop.f32.mrf.mxu0 }
0x11bd   :  { %v4163_v38 = vpop.f32.mrf.mxu1  ;;  %v3929_v19 = vadd.f32 %v3928_v25, %v3849_v50 }
0x11be   :  { %v7138_v63 = vpop.f32.mrf.mxu0 }
0x11bf   :  { %v7171_v0 = vpop.f32.mrf.mxu1  ;;  %v4006_v29 = vadd.f32 %v4005_v9, %v3929_v19  ;;  %v4218_v9 = vrot.slane %v8416_v49, 2 }
0x11c1   :  { %v8811_v11 = vsub.f32 %v8413_v62, %v4218_v9  ;;  %v8822_v62 = vld [vmem:[%s9098_s3 + $0x23] ss:$0 sm:$0xff] }
0x11c3   :  { %v4222_v27 = vrot.slane %v8811_v11, 2 }
0x11c5   :  { %v4088_v53 = vpop.f32.mrf.mxu0 }
0x11c6   :  { %v4089_v57 = vadd.f32 %v4088_v53, %v4006_v29  ;;  %v8830_v53 = vld [vmem:[%s9099_s1 + $0x8] sm:$0xff] }
0x11c7   :  { %v7160_v6 = vpop.f32.mrf.mxu0 }
0x11c8   :  { %v4164_v31 = vadd.f32 %v4163_v38, %v4089_v57 }
0x11ca   :  { %v4168_v32 = vrot.slane %v4164_v31, 2 }
0x11cc   :  { %4169 = vrot.lane.b32.xlu1 %v4168_v32, %s7430_s30  ;;  %4179 = vrot.lane.b32.xlu0 %v4168_v32, %s7433_s17 }
0x123e   :  { %v4170_v1 = vpop.permute.xlu1 %4169  ;;  %v4180_v42 = vpop.permute.xlu0 %4179 }
0x123f   :  { %v4172_v59 = vadd.f32 %v4170_v1, %v3679_v48 }
0x1241   :  { %v5962_v36 = vmul.f32 -1.442695, %v4172_v59 }
0x1243   :  { %7403 = vpow2.f32 %v5962_v36 }
0x1250   :  { %v7404_v55 = vpop.eup %7403 }
0x1251   :  { %v4176_v3 = vadd.f32 1.0, %v7404_v55 }
0x1253   :  { %7405 = vrcp.f32 %v4176_v3 }
0x1260   :  { %v7406_v13 = vpop.eup %7405 }
0x1261   :  { %v4182_v43 = vmul.f32 %v7406_v13, %v4180_v42 }
0x1263   :  { %4184 = vrot.lane.b32.xlu1 %v4182_v43, %s7434_s20 }
0x12d5   :  { %v4185_v41 = vpop.permute.xlu1 %4184 }
0x12d6   :  { %v4187_v21 = vadd.f32 %v4185_v41, %v3679_v48 }
0x12d8   :  { %7407 = vtanh.f32 %v4187_v21 }
0x12e5   :  { %v7408_v45 = vpop.eup %7407 }
0x12e6   :  { %v4190_v12 = vrot.slane %v7408_v45, 6 }
0x12e8   :  { %4191 = vrot.lane.b32.xlu0 %v4190_v12, %s7430_s30 }
0x135a   :  { %v4192_v4 = vpop.permute.xlu0 %4191 }
0x135b   :  { %v4194_v52 = vsub.f32 %v8711_v44, %v4192_v4 }
0x135d   :  { %v4196_v5 = vrot.slane %v4194_v52, 2 }
0x135f   :  { %4197 = vrot.lane.b32.xlu1 %v4196_v5, %s7434_s20 }
0x1363   :  { %4206 = vrot.lane.b32.xlu1 %v3662_v26, %s7433_s17 }
0x1367   :  { %4223 = vrot.lane.b32.xlu1 %v4222_v27, %s7433_s17 }
0x13d1   :  { %v4198_v47 = vpop.permute.xlu1 %4197 }
0x13d2   :  { %v4200_v8 = vmul.f32 %v7406_v13, %v4198_v47 }
0x13d4   :  { %4202 = vrot.lane.b32.xlu0 %v4200_v8, %s7430_s30 }
0x13d5   :  { %v4207_v25 = vpop.permute.xlu1 %4206 }
0x13d9   :  { %v4224_v63 = vpop.permute.xlu1 %4223 }
0x13da   :  { %v4226_v26 = vmul.f32 %v8822_v62, %v4224_v63 }
0x13dc   :  { %v4228_v29 = vrot.slane %v4226_v26, 4 }
0x1446   :  { %v4203_v38 = vpop.permute.xlu0 %4202 }
0x1447   :  { %v4205_v50 = vadd.f32 %v7408_v45, %v4203_v38 }
0x1449   :  { %v4209_v0 = vsub.f32 %v4205_v50, %v4207_v25 }
0x144b   :  { %v4211_v19 = vrot.slane %v4209_v0, 6 }
0x144d   :  { %4212 = vrot.lane.b32.xlu0 %v4211_v19, %s7430_s30 }
0x1451   :  { %4229 = vrot.lane.b32.xlu0 %v4228_v29, %s7430_s30 }
0x14bf   :  { %v4213_v57 = vpop.permute.xlu0 %4212 }
0x14c0   :  { %v4215_v6 = vmul.f32 %v4213_v57, %v8830_v53 }
0x14c2   :  { %v8834_v31 = vadd.f32 %v4215_v6, %v8711_v44 }
0x14c3   :  { %v4230_v50 = vpop.permute.xlu0 %4229 }
0x14c4   :  { %v4234_v32 = vsel %vm1468_vm1, %v8834_v31, 0  ;;  %v4232_v63 = vadd.f32 %v4230_v50, %v8416_v49 }
0x14c5   :  { %v4305_v2 = vand.u32 4294901760, %v4234_v32 }
0x14c7   :  { %v4306_v48 = vsub.f32 %v4234_v32, %v4305_v2  ;;  %7192 = vmatmul.mubr.f32.vlgmr.msra.gmra.mxu1 %v4305_v2 }
0x14c8   :  { %7206 = vmatpush3.msra.mxu1 %v8221_v10  ;;  %7213 = vmatprep.mubr.msk.f32.mxu1 %vm7432_vm0, %v7431_v18 }
0x14c9   :  { %7207 = vmatprep.subr.mxu1 %v7431_v18  ;;  %v4307_v1 = vand.u32 4294901760, %v4306_v48 }
0x14ca   :  { %7208 = vmatpush3.msra.mxu1 %v8230_v16 }
0x14cb   :  { %7209 = vmatprep.subr.mxu1 %v7431_v18  ;;  %v4308_v44 = vsub.f32 %v4306_v48, %v4307_v1 }
0x14cc   :  { %7210 = vmatpush3.msra.mxu1 %v8236_v17 }
0x14cd   :  { %7211 = vmatprep.subr.mxu1 %v7431_v18  ;;  %v4309_v59 = vand.u32 4294901760, %v4308_v44 }
0x14ce   :  { %7212 = vmatpush3.msra.mxu1 %v8255_v33 }
0x14cf   :  { %7214 = vmatmul.mubr.f32.vlgmr.msra.gmra.mxu1 %v4307_v1  ;;  %7227 = vmatprep.subr.mxu1 %v7431_v18 }
0x14d0   :  { %7181 = vmatmul.mubr.f32.vlgmr.msra.gmra.mxu0 %v4309_v59  ;;  %7228 = vmatpush3.msra.mxu1 %v8221_v10 }
0x14d1   :  { %7195 = vmatpush3.msra.mxu0 %v8239_v24  ;;  %7229 = vmatprep.subr.mxu1 %v7431_v18 }
0x14d2   :  { %7196 = vmatprep.subr.mxu0 %v7431_v18  ;;  %7230 = vmatpush3.msra.mxu1 %v8230_v16 }
0x14d3   :  { %7197 = vmatpush3.msra.mxu0 %v8249_v28  ;;  %7231 = vmatprep.subr.mxu1 %v7431_v18 }
0x14d4   :  { %7198 = vmatprep.subr.mxu0 %v7431_v18  ;;  %7232 = vmatpush3.msra.mxu1 %v8236_v17 }
0x14d5   :  { %7199 = vmatpush3.msra.mxu0 %v8258_v34  ;;  %7233 = vmatprep.subr.mxu1 %v7431_v18 }
0x14d6   :  { %7200 = vmatprep.subr.mxu0 %v7431_v18  ;;  %7202 = vmatprep.mubr.msk.f32.mxu0 %vm7432_vm0, %v7431_v18 }
0x14d7   :  { %7201 = vmatpush3.msra.mxu0 %v8275_v58  ;;  %7234 = vmatpush3.msra.mxu1 %v8255_v33 }
0x14d8   :  { %7235 = vmatprep.mubr.msk.f32.mxu1 %vm7432_vm0, %v7431_v18  ;;  %7203 = vmatmul.mubr.f32.vlgmr.msra.gmra.mxu0 %v4306_v48 }
0x14d9   :  { %7216 = vmatprep.subr.mxu0 %v7431_v18  ;;  %7236 = vmatmul.mubr.f32.vlgmr.msra.gmra.mxu1 %v4305_v2 }
0x14da   :  { %7217 = vmatpush3.msra.mxu0 %v8263_v39  ;;  %7224 = vmatprep.mubr.msk.f32.mxu0 %vm7432_vm0, %v7431_v18 }
0x14db   :  { %7218 = vmatprep.subr.mxu0 %v7431_v18  ;;  %7249 = vmatprep.subr.mxu1 %v7431_v18 }
0x14dc   :  { %7219 = vmatpush3.msra.mxu0 %v8270_v46  ;;  %7250 = vmatpush3.msra.mxu1 %v8294_v37 }
0x14dd   :  { %7220 = vmatprep.subr.mxu0 %v7431_v18  ;;  %7251 = vmatprep.subr.mxu1 %v7431_v18 }
0x14de   :  { %7221 = vmatpush3.msra.mxu0 %v8282_v61  ;;  %7252 = vmatpush3.msra.mxu1 %v8305_v51 }
0x14df   :  { %7222 = vmatprep.subr.mxu0 %v7431_v18  ;;  %7253 = vmatprep.subr.mxu1 %v7431_v18 }
0x14e0   :  { %7223 = vmatpush3.msra.mxu0 %v8299_v40  ;;  %7254 = vmatpush3.msra.mxu1 %v8311_v35 }
0x14e1   :  { %7225 = vmatmul.mubr.f32.vlgmr.msra.gmra.mxu0 %v4305_v2  ;;  %7255 = vmatprep.subr.mxu1 %v7431_v18 }
0x14e2   :  { %7256 = vmatpush3.msra.mxu1 %v8323_v20  ;;  %7238 = vmatprep.subr.mxu0 %v7431_v18 }
0x14e3   :  { %7257 = vmatprep.mubr.msk.f32.mxu1 %vm7432_vm0, %v7431_v18  ;;  %7271 = vmatprep.subr.mxu1 %v7431_v18 }
0x14e4   :  { %7239 = vmatpush3.msra.mxu0 %v8221_v10  ;;  %7246 = vmatprep.mubr.msk.f32.mxu0 %vm7432_vm0, %v7431_v18 }
0x14e5   :  { %7240 = vmatprep.subr.mxu0 %v7431_v18 }
0x14e6   :  { %7241 = vmatpush3.msra.mxu0 %v8230_v16 }
0x14e7   :  { %7242 = vmatprep.subr.mxu0 %v7431_v18 }
0x14e8   :  { %7243 = vmatpush3.msra.mxu0 %v8236_v17 }
0x14e9   :  { %7244 = vmatprep.subr.mxu0 %v7431_v18 }
0x14ea   :  { %7245 = vmatpush3.msra.mxu0 %v8255_v33 }
0x14eb   :  { %7260 = vmatprep.subr.mxu0 %v7431_v18 }
0x1587   :  { %v4402_v36 = vpop.f32.mrf.mxu1 }
0x1589   :  { %v7193_v55 = vpop.f32.mrf.mxu1 }
0x158f   :  { %v4559_v3 = vpop.f32.mrf.mxu1 }
0x1590   :  { %v4311_v13 = vpop.f32.mrf.mxu0 }
0x1591   :  { %v7215_v42 = vpop.f32.mrf.mxu1  ;;  %v4312_v41 = vadd.f32 %v8799_v7, %v4311_v13  ;;  %v4760_v13 = vrot.slane %v8834_v31, 4 }
0x1592   :  { %v7182_v43 = vpop.f32.mrf.mxu0  ;;  %v4779_v42 = vrot.slane %v8700_v56, 4 }
0x1593   :  { %v4403_v12 = vadd.f32 %v4402_v36, %v4312_v41 }
0x1598   :  { %v4482_v21 = vpop.f32.mrf.mxu0 }
0x1599   :  { %v4717_v45 = vpop.f32.mrf.mxu1  ;;  %v4483_v5 = vadd.f32 %v4482_v21, %v4403_v12 }
0x159a   :  { %v7204_v4 = vpop.f32.mrf.mxu0 }
0x159b   :  { %v7237_v52 = vpop.f32.mrf.mxu1  ;;  %v4560_v9 = vadd.f32 %v4559_v3, %v4483_v5 }
0x15a1   :  { %v4642_v27 = vpop.f32.mrf.mxu0 }
0x15a2   :  { %v4643_v47 = vadd.f32 %v4642_v27, %v4560_v9 }
0x15a3   :  { %v7226_v8 = vpop.f32.mrf.mxu0 }
0x15a4   :  { %v4718_v25 = vadd.f32 %v4717_v45, %v4643_v47 }
0x15a6   :  { %v4722_v38 = vrot.slane %v4718_v25, 4 }
0x15a8   :  { %4723 = vrot.lane.b32.xlu1 %v4722_v38, %s7430_s30  ;;  %4733 = vrot.lane.b32.xlu0 %v4722_v38, %s7433_s17 }
0x161a   :  { %v4724_v0 = vpop.permute.xlu1 %4723  ;;  %v4734_v32 = vpop.permute.xlu0 %4733 }
0x161b   :  { %v4726_v26 = vadd.f32 %v4724_v0, %v4232_v63 }
0x161d   :  { %v5963_v19 = vmul.f32 -1.442695, %v4726_v26 }
0x161f   :  { %7409 = vpow2.f32 %v5963_v19 }
0x162c   :  { %v7410_v29 = vpop.eup %7409 }
0x162d   :  { %v4730_v57 = vadd.f32 1.0, %v7410_v29 }
0x162f   :  { %7411 = vrcp.f32 %v4730_v57 }
0x163c   :  { %v7412_v6 = vpop.eup %7411 }
0x163d   :  { %v4736_v2 = vmul.f32 %v7412_v6, %v4734_v32 }
0x163f   :  { %4738 = vrot.lane.b32.xlu1 %v4736_v2, %s7434_s20 }
0x16b1   :  { %v4739_v48 = vpop.permute.xlu1 %4738 }
0x16b2   :  { %v4741_v1 = vadd.f32 %v4739_v48, %v4232_v63 }
0x16b4   :  { %7413 = vtanh.f32 %v4741_v1 }
0x16c1   :  { %v7414_v44 = vpop.eup %7413 }
0x16c2   :  { %v4744_v59 = vrot.slane %v7414_v44, 4 }
0x16c4   :  { %4745 = vrot.lane.b32.xlu0 %v4744_v59, %s7430_s30 }
0x1736   :  { %v4746_v36 = vpop.permute.xlu0 %4745 }
0x1737   :  { %v4748_v55 = vsub.f32 %v8834_v31, %v4746_v36 }
0x1739   :  { %v4750_v3 = vrot.slane %v4748_v55, 4 }
0x173b   :  { %4751 = vrot.lane.b32.xlu1 %v4750_v3, %s7434_s20 }
0x173f   :  { %4761 = vrot.lane.b32.xlu1 %v4760_v13, %s7433_s17 }
0x1743   :  { %4780 = vrot.lane.b32.xlu1 %v4779_v42, %s7433_s17 }
0x17ad   :  { %v4752_v43 = vpop.permute.xlu1 %4751 }
0x17ae   :  { %v4754_v41 = vmul.f32 %v7412_v6, %v4752_v43 }
0x17b0   :  { %4756 = vrot.lane.b32.xlu0 %v4754_v41, %s7430_s30 }
0x17b1   :  { %v4762_v21 = vpop.permute.xlu1 %4761 }
0x17b5   :  { %v4781_v4 = vpop.permute.xlu1 %4780 }
0x17b6   :  { %v4783_v5 = vmul.f32 %v8822_v62, %v4781_v4 }
0x17b8   :  { %v4785_v27 = vrot.slane %v4783_v5, 6 }
0x1822   :  { %v4757_v45 = vpop.permute.xlu0 %4756 }
0x1823   :  { %v4759_v12 = vadd.f32 %v7414_v44, %v4757_v45 }
0x1825   :  { %v4764_v52 = vsub.f32 %v4759_v12, %v4762_v21 }
0x1827   :  { %v4766_v9 = vrot.slane %v4764_v52, 2 }
0x1829   :  { %4767 = vrot.lane.b32.xlu0 %v4766_v9, %s7430_s30 }
0x182d   :  { %4786 = vrot.lane.b32.xlu0 %v4785_v27, %s7430_s30 }
0x189b   :  { %v4768_v56 = vpop.permute.xlu0 %4767 }
0x189c   :  { %v4770_v47 = vmul.f32 %v4768_v56, %v8830_v53 }
0x189e   :  { %v4772_v8 = vrot.slane %v4770_v47, 2 }
0x189f   :  { %v4787_v41 = vpop.permute.xlu0 %4786 }
0x18a0   :  { %v8916_v25 = vadd.f32 %v4772_v8, %v8834_v31  ;;  %v4789_v21 = vadd.f32 %v4787_v41, %v8416_v49 }
0x18a2   :  { %v4790_v38 = vsel %vm1468_vm1, %v8916_v25, 0 }
0x18a3   :  { %v4861_v50 = vand.u32 4294901760, %v4790_v38 }
0x18a5   :  { %v4862_v63 = vsub.f32 %v4790_v38, %v4861_v50  ;;  %7258 = vmatmul.mubr.f32.vlgmr.msra.gmra.mxu1 %v4861_v50 }
0x18a6   :  { %7272 = vmatpush3.msra.mxu1 %v8221_v10  ;;  %7279 = vmatprep.mubr.msk.f32.mxu1 %vm7432_vm0, %v7431_v18 }
0x18a7   :  { %7273 = vmatprep.subr.mxu1 %v7431_v18  ;;  %v4863_v0 = vand.u32 4294901760, %v4862_v63 }
0x18a8   :  { %7274 = vmatpush3.msra.mxu1 %v8230_v16 }
0x18a9   :  { %7275 = vmatprep.subr.mxu1 %v7431_v18  ;;  %v4864_v26 = vsub.f32 %v4862_v63, %v4863_v0 }
0x18aa   :  { %7276 = vmatpush3.msra.mxu1 %v8236_v17 }
0x18ab   :  { %7277 = vmatprep.subr.mxu1 %v7431_v18  ;;  %v4865_v19 = vand.u32 4294901760, %v4864_v26 }
0x18ac   :  { %7278 = vmatpush3.msra.mxu1 %v8255_v33 }
0x18ad   :  { %7280 = vmatmul.mubr.f32.vlgmr.msra.gmra.mxu1 %v4863_v0  ;;  %7293 = vmatprep.subr.mxu1 %v7431_v18 }
0x18ae   :  { %7247 = vmatmul.mubr.f32.vlgmr.msra.gmra.mxu0 %v4865_v19  ;;  %7294 = vmatpush3.msra.mxu1 %v8221_v10  ;;  %v4776_v19 = vrot.slane %v8916_v25, 6 }
0x18af   :  { %7261 = vmatpush3.msra.mxu0 %v8239_v24  ;;  %7295 = vmatprep.subr.mxu1 %v7431_v18 }
0x18b0   :  { %7262 = vmatprep.subr.mxu0 %v7431_v18  ;;  %7296 = vmatpush3.msra.mxu1 %v8230_v16 }
0x18b1   :  { %7263 = vmatpush3.msra.mxu0 %v8249_v28  ;;  %7297 = vmatprep.subr.mxu1 %v7431_v18 }
0x18b2   :  { %7264 = vmatprep.subr.mxu0 %v7431_v18  ;;  %7298 = vmatpush3.msra.mxu1 %v8236_v17 }
0x18b3   :  { %7265 = vmatpush3.msra.mxu0 %v8258_v34  ;;  %7299 = vmatprep.subr.mxu1 %v7431_v18 }
0x18b4   :  { %7266 = vmatprep.subr.mxu0 %v7431_v18  ;;  %7268 = vmatprep.mubr.msk.f32.mxu0 %vm7432_vm0, %v7431_v18 }
0x18b5   :  { %7267 = vmatpush3.msra.mxu0 %v8275_v58  ;;  %7300 = vmatpush3.msra.mxu1 %v8255_v33 }
0x18b6   :  { %7301 = vmatprep.mubr.msk.f32.mxu1 %vm7432_vm0, %v7431_v18  ;;  %7269 = vmatmul.mubr.f32.vlgmr.msra.gmra.mxu0 %v4862_v63 }
0x18b7   :  { %7282 = vmatprep.subr.mxu0 %v7431_v18  ;;  %7302 = vmatmul.mubr.f32.vlgmr.msra.gmra.mxu1 %v4861_v50 }
0x18b8   :  { %7283 = vmatpush3.msra.mxu0 %v8263_v39  ;;  %7290 = vmatprep.mubr.msk.f32.mxu0 %vm7432_vm0, %v7431_v18 }
0x18b9   :  { %7284 = vmatprep.subr.mxu0 %v7431_v18  ;;  %7315 = vmatprep.subr.mxu1 %v7431_v18 }
0x18ba   :  { %7285 = vmatpush3.msra.mxu0 %v8270_v46  ;;  %7316 = vmatpush3.msra.mxu1 %v8294_v37 }
0x18bb   :  { %7286 = vmatprep.subr.mxu0 %v7431_v18  ;;  %7317 = vmatprep.subr.mxu1 %v7431_v18 }
0x18bc   :  { %7287 = vmatpush3.msra.mxu0 %v8282_v61  ;;  %7318 = vmatpush3.msra.mxu1 %v8305_v51 }
0x18bd   :  { %7288 = vmatprep.subr.mxu0 %v7431_v18  ;;  %7319 = vmatprep.subr.mxu1 %v7431_v18 }
0x18be   :  { %7289 = vmatpush3.msra.mxu0 %v8299_v40  ;;  %7320 = vmatpush3.msra.mxu1 %v8311_v35 }
0x18bf   :  { %7291 = vmatmul.mubr.f32.vlgmr.msra.gmra.mxu0 %v4861_v50  ;;  %7321 = vmatprep.subr.mxu1 %v7431_v18 }
0x18c0   :  { %7322 = vmatpush3.msra.mxu1 %v8323_v20  ;;  %7304 = vmatprep.subr.mxu0 %v7431_v18 }
0x18c1   :  { %7323 = vmatprep.mubr.msk.f32.mxu1 %vm7432_vm0, %v7431_v18  ;;  %7337 = vmatprep.subr.mxu1 %v7431_v18 }
0x18c2   :  { %7305 = vmatpush3.msra.mxu0 %v8221_v10  ;;  %7312 = vmatprep.mubr.msk.f32.mxu0 %vm7432_vm0, %v7431_v18 }
0x18c3   :  { %7306 = vmatprep.subr.mxu0 %v7431_v18 }
0x18c4   :  { %7307 = vmatpush3.msra.mxu0 %v8230_v16 }
0x18c5   :  { %7308 = vmatprep.subr.mxu0 %v7431_v18 }
0x18c6   :  { %7309 = vmatpush3.msra.mxu0 %v8236_v17 }
0x18c7   :  { %7310 = vmatprep.subr.mxu0 %v7431_v18 }
0x18c8   :  { %7311 = vmatpush3.msra.mxu0 %v8255_v33 }
0x18c9   :  { %7326 = vmatprep.subr.mxu0 %v7431_v18 }
0x1965   :  { %v4958_v37 = vpop.f32.mrf.mxu1 }
0x1967   :  { %v7259_v51 = vpop.f32.mrf.mxu1 }
0x196d   :  { %v5115_v35 = vpop.f32.mrf.mxu1 }
0x196e   :  { %v4867_v20 = vpop.f32.mrf.mxu0 }
0x196f   :  { %v7281_v29 = vpop.f32.mrf.mxu1  ;;  %v4868_v6 = vadd.f32 %v8799_v7, %v4867_v20 }
0x1970   :  { %v7248_v57 = vpop.f32.mrf.mxu0 }
0x1971   :  { %v4959_v48 = vadd.f32 %v4958_v37, %v4868_v6  ;;  %v5334_v37 = vrot.slane %v8811_v11, 6 }
0x1976   :  { %v5038_v32 = vpop.f32.mrf.mxu0 }
0x1977   :  { %v5273_v2 = vpop.f32.mrf.mxu1  ;;  %v5039_v59 = vadd.f32 %v5038_v32, %v4959_v48 }
0x1978   :  { %v7270_v1 = vpop.f32.mrf.mxu0 }
0x1979   :  { %v7303_v44 = vpop.f32.mrf.mxu1  ;;  %v5116_v36 = vadd.f32 %v5115_v35, %v5039_v59 }
0x197f   :  { %v5198_v55 = vpop.f32.mrf.mxu0 }
0x1980   :  { %v5199_v3 = vadd.f32 %v5198_v55, %v5116_v36 }
0x1981   :  { %v7292_v13 = vpop.f32.mrf.mxu0 }
0x1982   :  { %v5274_v42 = vadd.f32 %v5273_v2, %v5199_v3 }
0x1984   :  { %v5278_v43 = vrot.slane %v5274_v42, 6 }
0x1986   :  { %5279 = vrot.lane.b32.xlu1 %v5278_v43, %s7430_s30  ;;  %5289 = vrot.lane.b32.xlu0 %v5278_v43, %s7433_s17 }
0x19f8   :  { %v5280_v45 = vpop.permute.xlu1 %5279  ;;  %v5290_v27 = vpop.permute.xlu0 %5289 }
0x19f9   :  { %v5282_v12 = vadd.f32 %v5280_v45, %v4789_v21 }
0x19fb   :  { %v5964_v4 = vmul.f32 -1.442695, %v5282_v12 }
0x19fd   :  { %7415 = vpow2.f32 %v5964_v4 }
0x1a0a   :  { %v7416_v52 = vpop.eup %7415 }
0x1a0b   :  { %v5286_v5 = vadd.f32 1.0, %v7416_v52 }
0x1a0d   :  { %7417 = vrcp.f32 %v5286_v5 }
0x1a1a   :  { %v7418_v9 = vpop.eup %7417 }
0x1a1b   :  { %v5292_v56 = vmul.f32 %v7418_v9, %v5290_v27 }
0x1a1d   :  { %5294 = vrot.lane.b32.xlu1 %v5292_v56, %s7434_s20 }
0x1a8f   :  { %v5295_v47 = vpop.permute.xlu1 %5294 }
0x1a90   :  { %v5297_v8 = vadd.f32 %v5295_v47, %v4789_v21 }
0x1a92   :  { %7419 = vtanh.f32 %v5297_v8 }
0x1a9f   :  { %v7420_v38 = vpop.eup %7419 }
0x1aa0   :  { %v5300_v50 = vrot.slane %v7420_v38, 2 }
0x1aa2   :  { %5301 = vrot.lane.b32.xlu0 %v5300_v50, %s7430_s30 }
0x1b14   :  { %v5302_v63 = vpop.permute.xlu0 %5301 }
0x1b15   :  { %v5304_v0 = vsub.f32 %v8916_v25, %v5302_v63 }
0x1b17   :  { %v5306_v26 = vrot.slane %v5304_v0, 6 }
0x1b19   :  { %5307 = vrot.lane.b32.xlu1 %v5306_v26, %s7434_s20 }
0x1b1d   :  { %5316 = vrot.lane.b32.xlu1 %v4776_v19, %s7433_s17 }
0x1b21   :  { %5335 = vrot.lane.b32.xlu1 %v5334_v37, %s7433_s17  ;;  %v7429_v37 = vld [vmem:[%s9099_s1] sm:$0xff] }
0x1b8b   :  { %v5308_v51 = vpop.permute.xlu1 %5307 }
0x1b8c   :  { %v5310_v35 = vmul.f32 %v7418_v9, %v5308_v51  ;;  %v1997_v51 = vmul.f32 %v7429_v37, %v8458_v60 }
0x1b8e   :  { %5312 = vrot.lane.b32.xlu0 %v5310_v35, %s7430_s30  ;;  %v5886_v35 = vsel %vm5885_vm2, %v1997_v51, %v8722_v15 }
0x1b8f   :  { %v5317_v20 = vpop.permute.xlu1 %5316 }
0x1b93   :  { %v5336_v2 = vpop.permute.xlu1 %5335 }
0x1b94   :  { %v5338_v48 = vmul.f32 %v8822_v62, %v5336_v2 }
0x1c00   :  { %v5313_v29 = vpop.permute.xlu0 %5312 }
0x1c01   :  { %v5315_v57 = vadd.f32 %v7420_v38, %v5313_v29 }
0x1c03   :  { %v5319_v6 = vsub.f32 %v5315_v57, %v5317_v20  ;;  %v5888_v20 = vsel %vm5887_vm3, %v5886_v35, %v8717_v14 }
0x1c04   :  { %v5890_v29 = vsel %vm5889_vm4, %v5888_v20, %v8727_v22  ;;  %v4778_v22 = vmul.f32 %v4776_v19, %v8830_v53 }
0x1c05   :  { %v5321_v32 = vrot.slane %v5319_v6, 6 }
0x1c07   :  { %5322 = vrot.lane.b32.xlu0 %v5321_v32, %s7430_s30 }
0x1c0b   :  { %5340 = vrot.lane.b32.xlu0 %v5338_v48, %s7430_s30 }
0x1c79   :  { %v5323_v1 = vpop.permute.xlu0 %5322 }
0x1c7a   :  { %v5325_v11 = vmul.f32 %v5323_v1, %v8830_v53 }
0x1c7c   :  { %v5327_v44 = vrot.slane %v5325_v11, 4 }
0x1c7d   :  { %v5341_v4 = vpop.permute.xlu0 %5340 }
0x1c7e   :  { %v9000_v59 = vadd.f32 %v5327_v44, %v8916_v25  ;;  %v5343_v52 = vadd.f32 %v5341_v4, %v8416_v49  ;;  %v5901_v25 = vrot.slane %v4778_v22, 6 }
0x1c80   :  { %v5344_v36 = vsel %vm1468_vm1, %v9000_v59, 0  ;;  %v5331_v14 = vrot.slane %v9000_v59, 4 }
0x1c81   :  { %v5415_v55 = vand.u32 4294901760, %v5344_v36 }
0x1c83   :  { %v5416_v3 = vsub.f32 %v5344_v36, %v5415_v55  ;;  %7324 = vmatmul.mubr.f32.vlgmr.msra.gmra.mxu1 %v5415_v55 }
0x1c84   :  { %7338 = vmatpush3.msra.mxu1 %v8221_v10  ;;  %7345 = vmatprep.mubr.msk.f32.mxu1 %vm7432_vm0, %v7431_v18 }
0x1c85   :  { %7339 = vmatprep.subr.mxu1 %v7431_v18  ;;  %v5417_v62 = vand.u32 4294901760, %v5416_v3 }
0x1c86   :  { %7340 = vmatpush3.msra.mxu1 %v8230_v16 }
0x1c87   :  { %7341 = vmatprep.subr.mxu1 %v7431_v18  ;;  %v5418_v13 = vsub.f32 %v5416_v3, %v5417_v62 }
0x1c88   :  { %7342 = vmatpush3.msra.mxu1 %v8236_v17 }
0x1c89   :  { %7343 = vmatprep.subr.mxu1 %v7431_v18  ;;  %v5419_v42 = vand.u32 4294901760, %v5418_v13 }
0x1c8a   :  { %7344 = vmatpush3.msra.mxu1 %v8255_v33 }
0x1c8b   :  { %7346 = vmatmul.mubr.f32.vlgmr.msra.gmra.mxu1 %v5417_v62  ;;  %7359 = vmatprep.subr.mxu1 %v7431_v18  ;;  %v4217_v62 = vmul.f32 %v8834_v31, %v8830_v53 }
0x1c8c   :  { %7313 = vmatmul.mubr.f32.vlgmr.msra.gmra.mxu0 %v5419_v42  ;;  %7360 = vmatpush3.msra.mxu1 %v8221_v10 }
0x1c8d   :  { %7327 = vmatpush3.msra.mxu0 %v8239_v24  ;;  %7361 = vmatprep.subr.mxu1 %v7431_v18  ;;  %v5891_v42 = vsel %vm5885_vm2, %v4217_v62, %v4778_v22  ;;  %v5904_v19 = vrot.slane %v4217_v62, 2 }
0x1c8e   :  { %7328 = vmatprep.subr.mxu0 %v7431_v18  ;;  %7362 = vmatpush3.msra.mxu1 %v8230_v16 }
0x1c8f   :  { %7329 = vmatpush3.msra.mxu0 %v8249_v28  ;;  %7363 = vmatprep.subr.mxu1 %v7431_v18 }
0x1c90   :  { %7330 = vmatprep.subr.mxu0 %v7431_v18  ;;  %7364 = vmatpush3.msra.mxu1 %v8236_v17 }
0x1c91   :  { %7331 = vmatpush3.msra.mxu0 %v8258_v34  ;;  %7365 = vmatprep.subr.mxu1 %v7431_v18 }
0x1c92   :  { %7332 = vmatprep.subr.mxu0 %v7431_v18  ;;  %7334 = vmatprep.mubr.msk.f32.mxu0 %vm7432_vm0, %v7431_v18 }
0x1c93   :  { %7333 = vmatpush3.msra.mxu0 %v8275_v58  ;;  %7366 = vmatpush3.msra.mxu1 %v8255_v33 }
0x1c94   :  { %7367 = vmatprep.mubr.msk.f32.mxu1 %vm7432_vm0, %v7431_v18  ;;  %7335 = vmatmul.mubr.f32.vlgmr.msra.gmra.mxu0 %v5416_v3 }
0x1c95   :  { %7348 = vmatprep.subr.mxu0 %v7431_v18  ;;  %7368 = vmatmul.mubr.f32.vlgmr.msra.gmra.mxu1 %v5415_v55 }
0x1c96   :  { %7349 = vmatpush3.msra.mxu0 %v8263_v39  ;;  %7356 = vmatprep.mubr.msk.f32.mxu0 %vm7432_vm0, %v7431_v18 }
0x1c97   :  { %7350 = vmatprep.subr.mxu0 %v7431_v18 }
0x1c98   :  { %7351 = vmatpush3.msra.mxu0 %v8270_v46 }
0x1c99   :  { %7352 = vmatprep.subr.mxu0 %v7431_v18 }
0x1c9a   :  { %7353 = vmatpush3.msra.mxu0 %v8282_v61 }
0x1c9b   :  { %7354 = vmatprep.subr.mxu0 %v7431_v18 }
0x1c9c   :  { %7355 = vmatpush3.msra.mxu0 %v8299_v40 }
0x1c9d   :  { %7357 = vmatmul.mubr.f32.vlgmr.msra.gmra.mxu0 %v5415_v55  ;;  %v5333_v55 = vmul.f32 %v5331_v14, %v8830_v53 }
0x1d43   :  { %v5512_v10 = vpop.f32.mrf.mxu1 }
0x1d45   :  { %v7325_v16 = vpop.f32.mrf.mxu1 }
0x1d4b   :  { %v5669_v17 = vpop.f32.mrf.mxu1 }
0x1d4c   :  { %v5421_v24 = vpop.f32.mrf.mxu0 }
0x1d4d   :  { %v7347_v28 = vpop.f32.mrf.mxu1  ;;  %v5422_v34 = vadd.f32 %v8799_v7, %v5421_v24  ;;  %v5898_v24 = vrot.slane %v5333_v55, 2 }
0x1d4e   :  { %v7314_v33 = vpop.f32.mrf.mxu0  ;;  %v5916_v28 = vrot.slane %v1997_v51, 2 }
0x1d4f   :  { %v5513_v46 = vadd.f32 %v5512_v10, %v5422_v34  ;;  %v5892_v10 = vsel %vm5887_vm3, %v5891_v42, %v5333_v55 }
0x1d54   :  { %v5592_v39 = vpop.f32.mrf.mxu0 }
0x1d55   :  { %v5827_v58 = vpop.f32.mrf.mxu1  ;;  %v5593_v21 = vadd.f32 %v5592_v39, %v5513_v46 }
0x1d56   :  { %v7336_v43 = vpop.f32.mrf.mxu0 }
0x1d57   :  { %v7369_v41 = vpop.f32.mrf.mxu1  ;;  %v5670_v61 = vadd.f32 %v5669_v17, %v5593_v21 }
0x1d5d   :  { %v5752_v45 = vpop.f32.mrf.mxu0 }
0x1d5e   :  { %v5753_v18 = vadd.f32 %v5752_v45, %v5670_v61 }
0x1d5f   :  { %v7358_v12 = vpop.f32.mrf.mxu0 }
0x1d60   :  { %v5828_v40 = vadd.f32 %v5827_v58, %v5753_v18 }
0x1d62   :  { %5832 = vrot.lane.b32.xlu1 %v5828_v40, %s7430_s30  ;;  %5842 = vrot.lane.b32.xlu0 %v5828_v40, %s7433_s17 }
0x1dd4   :  { %v5833_v5 = vpop.permute.xlu1 %5832  ;;  %v5843_v8 = vpop.permute.xlu0 %5842 }
0x1dd5   :  { %v5835_v7 = vadd.f32 %v5833_v5, %v5343_v52 }
0x1dd7   :  { %v5965_v9 = vmul.f32 -1.442695, %v5835_v7 }
0x1dd9   :  { %7421 = vpow2.f32 %v5965_v9 }
0x1de6   :  { %v7422_v27 = vpop.eup %7421 }
0x1de7   :  { %v5839_v56 = vadd.f32 1.0, %v7422_v27 }
0x1de9   :  { %7423 = vrcp.f32 %v5839_v56 }
0x1df6   :  { %v7424_v47 = vpop.eup %7423 }
0x1df7   :  { %v5845_v38 = vmul.f32 %v7424_v47, %v5843_v8 }
0x1df9   :  { %5847 = vrot.lane.b32.xlu1 %v5845_v38, %s7434_s20 }
0x1e6b   :  { %v5848_v50 = vpop.permute.xlu1 %5847 }
0x1e6c   :  { %v5850_v63 = vadd.f32 %v5848_v50, %v5343_v52 }
0x1e6e   :  { %7425 = vtanh.f32 %v5850_v63 }
0x1e7b   :  { %v7426_v0 = vpop.eup %7425 }
0x1e7c   :  { %5853 = vrot.lane.b32.xlu0 %v7426_v0, %s7430_s30 }
0x1eee   :  { %v5854_v26 = vpop.permute.xlu0 %5853 }
0x1eef   :  { %v5856_v49 = vsub.f32 %v9000_v59, %v5854_v26 }
0x1ef1   :  { %5858 = vrot.lane.b32.xlu1 %v5856_v49, %s7434_s20 }
0x1ef5   :  { %5867 = vrot.lane.b32.xlu1 %v9000_v59, %s7433_s17 }
0x1ef9   :  { %5926 = vrot.lane.b32.xlu1 %v5890_v29, %s7430_s30 }
0x1f63   :  { %v5859_v57 = vpop.permute.xlu1 %5858 }
0x1f64   :  { %v5861_v6 = vmul.f32 %v7424_v47, %v5859_v57 }
0x1f66   :  { %5863 = vrot.lane.b32.xlu0 %v5861_v6, %s7430_s30 }
0x1f67   :  { %v5868_v2 = vpop.permute.xlu1 %5867 }
0x1f6b   :  { %v5927_v34 = vpop.permute.xlu1 %5926 }
0x1f6c   :  { %v5940_v58 = vsel %vm1468_vm1, %v8410_v30, %v5927_v34 }
0x1fd8   :  { %v5864_v60 = vpop.permute.xlu0 %5863 }
0x1fd9   :  { %v5866_v32 = vadd.f32 %v7426_v0, %v5864_v60 }
0x1fdb   :  { %v5870_v48 = vsub.f32 %v5866_v32, %v5868_v2 }
0x1fdd   :  { %v5872_v1 = vrot.slane %v5870_v48, 2 }
0x1fdf   :  { %5873 = vrot.lane.b32.xlu0 %v5872_v1, %s7430_s30 }
0x2051   :  { %v5874_v15 = vpop.permute.xlu0 %5873 }
0x2052   :  { %v5876_v11 = vmul.f32 %v5874_v15, %v8830_v53 }
0x2054   :  { %v5878_v44 = vrot.slane %v5876_v11, 6 }
0x2056   :  { %v5880_v36 = vadd.f32 %v5878_v44, %v9000_v59 }
0x2058   :  { %v5882_v3 = vrot.slane %v5880_v36, 2 }
0x205a   :  { %v5884_v13 = vmul.f32 %v5882_v3, %v8830_v53  ;;  %v5923_v53 = vsel %vm5889_vm4, %v8740_v54, %v5916_v28 }
0x205c   :  { %v5895_v16 = vrot.slane %v5884_v13, 6  ;;  %v5893_v17 = vsel %vm5889_vm4, %v5892_v10, %v5884_v13 }
0x205d   :  { %5928 = vrot.lane.b32.xlu0 %v5893_v17, %s7430_s30 }
0x205e   :  { %v5918_v59 = vsel %vm5885_vm2, %v5895_v16, %v5898_v24 }
0x205f   :  { %v5919_v33 = vsel %vm5887_vm3, %v5918_v59, %v5901_v25 }
0x2060   :  { %v5920_v31 = vsel %vm5889_vm4, %v5919_v33, %v5904_v19 }
0x2061   :  { %5934 = vrot.lane.b32.xlu1 %v5920_v31, %s7430_s30  ;;  %5936 = vrot.lane.b32.xlu0 %v5923_v53, %s7430_s30 }
0x20cf   :  { %v5929_v39 = vpop.permute.xlu0 %5928 }
0x20d0   :  { %v5941_v46 = vsel %vm1468_vm1, %v8408_v23, %v5929_v39 }
0x20d3   :  { %v5937_v43 = vpop.permute.xlu0 %5936  ;;  %v5935_v41 = vpop.permute.xlu1 %5934 }
0x20d4   :  { %v5944_v21 = vsel %vm5942_vm5, %v5941_v46, %v5937_v43  ;;  %v5943_v61 = vsel %vm5942_vm5, %v5940_v58, %v5935_v41 }
0x20d5   :  { %v5947_v45 = vsel %vm5945_vm6, %v5944_v21, 0.0  ;;  %v5946_v54 = vsel %vm5945_vm6, %v5943_v61, 0.0 }
0x20d6   :  { %5949 = vst [vmem:[%s9100_s4 + $0x8] sm:$0xff] %v5947_v45  ;;  %5948 = vst [vmem:[%s9100_s4] sm:$0xff] %v5946_v54 }

</bundles_post_ra>
